<compile_context>
chip_gen: v5e
topology: v5e:2x2
jax: 0.10.0
libtpu: 0.0.40
codegen_flags: <defaults>
</compile_context>

<pallas_src>
import math

import jax
import jax.numpy as jnp
from jax.experimental import pallas as pl
from jax.experimental.pallas import tpu as pltpu

# --- hyper-parameters from the PyTorch spec ---------------------------------
d_model = 16
dropout_p = 0.4          # eval-mode identity (see TODO in kernel)
n_heads = 4
pff_dim = 32
n_layers = 2
output_dim = 15

head_dim = d_model // n_heads      # 4
LANE = 128
_LN_EPS = 1e-5                     # torch.nn.LayerNorm default eps


def _round_up(x, m):
    return (x + m - 1) // m * m


Dp = _round_up(d_model, LANE)      # 128 : padded model dim (lane-dense)
Hp = _round_up(pff_dim, LANE)      # 128 : padded FFN hidden dim
Vp = _round_up(output_dim, LANE)   # 128 : padded vocab dim


# =============================================================================
# Fused decoder kernel: one grid step == one batch element, all weights
# VMEM-resident, activations live entirely in VMEM/vregs between sub-ops.
# =============================================================================
def _decoder_kernel(x_ref, enc_ref, tmask_ref, smask_ref,
                    wqkv_s_ref, bqkv_s_ref, wo_s_ref, bo_s_ref,
                    wqkv_e_ref, bqkv_e_ref, wo_e_ref, bo_e_ref,
                    w1_ref, b1_ref, w2_ref, b2_ref,
                    lng_ref, lnb_ref, fcw_ref, fcb_ref,
                    logits_ref, attn_ref):
    x = x_ref[0]            # (T, Dp)  zero-padded beyond d_model
    enc = enc_ref[0]        # (S, Dp)  zero-padded beyond d_model
    tmask = tmask_ref[0]    # (T, T)   1 = keep, 0 = mask
    smask = smask_ref[0]    # (T, S)

    col = jax.lax.broadcasted_iota(jnp.int32, (1, Dp), 1)
    dmask = (col < d_model).astype(jnp.float32)                   # real lanes
    head_masks = [
        jnp.logical_and(col >= h * head_dim,
                        col < (h + 1) * head_dim).astype(jnp.float32)
        for h in range(n_heads)
    ]

    def layer_norm(z, idx):
        # padded lanes of z are 0; gamma/beta are zero-padded, so padded lanes
        # of the output stay 0 (keeps the zero-pad invariant through the stack)
        g = lng_ref[idx]                                          # (1, Dp)
        b = lnb_ref[idx]
        mu = jnp.sum(z, axis=-1, keepdims=True) * (1.0 / d_model)
        zc = (z - mu) * dmask
        var = jnp.sum(zc * zc, axis=-1, keepdims=True) * (1.0 / d_model)
        return zc * jax.lax.rsqrt(var + _LN_EPS) * g + b

    def mha(q_in, kv_in, wqkv, bqkv, wo, bo, mask):
        # fused QKV projection; 1/sqrt(head_dim) already folded into Q columns
        qkv_q = jnp.dot(q_in, wqkv, preferred_element_type=jnp.float32) + bqkv
        qkv_kv = jnp.dot(kv_in, wqkv, preferred_element_type=jnp.float32) + bqkv
        q = qkv_q[:, 0:Dp]
        k = qkv_kv[:, Dp:2 * Dp]
        v = qkv_kv[:, 2 * Dp:3 * Dp]

        weighted = jnp.zeros_like(q_in)
        probs = []
        for hm in head_masks:
            # per-head scores via a lane-dense masked NT matmul: contraction
            # runs over the full 128-lane Dp axis, heads stay out of lanes.
            s = jax.lax.dot_general(q * hm, k, (((1,), (1,)), ((), ())),
                                    preferred_element_type=jnp.float32)
            s = jnp.where(mask == 0.0, -1e10, s)
            s = s - jnp.max(s, axis=-1, keepdims=True)
            e = jnp.exp(s)
            p = e / jnp.sum(e, axis=-1, keepdims=True)             # (T, Skv)
            probs.append(p)
            # head-h contribution: (p @ V) masked back to head-h columns
            weighted = weighted + hm * jnp.dot(
                p, v, preferred_element_type=jnp.float32)
        out = jnp.dot(weighted, wo, preferred_element_type=jnp.float32) + bo
        return out, probs

    # TODO(synk): train-mode dropout (embeddings / attention probs / residual
    # branches / FFN) is the eval-mode identity here; TPU-PRNG dropout is
    # intentionally omitted so the kernel also runs under interpret mode.
    for l in range(n_layers):
        # masked self-attention + residual LayerNorm
        sa, _ = mha(x, x, wqkv_s_ref[l], bqkv_s_ref[l],
                    wo_s_ref[l], bo_s_ref[l], tmask)
        x = layer_norm(x + sa, 3 * l + 0)

        # encoder-decoder attention + residual LayerNorm
        ea, probs = mha(x, enc, wqkv_e_ref[l], bqkv_e_ref[l],
                        wo_e_ref[l], bo_e_ref[l], smask)
        if l == n_layers - 1:
            # only the final layer's enc-attention probs are returned
            for h in range(n_heads):
                attn_ref[0, h] = probs[h].astype(attn_ref.dtype)
        x = layer_norm(x + ea, 3 * l + 1)

        # position-wise FFN + residual LayerNorm
        hid = jnp.dot(x, w1_ref[l], preferred_element_type=jnp.float32) + b1_ref[l]
        hid = jnp.maximum(hid, 0.0)
        ff = jnp.dot(hid, w2_ref[l], preferred_element_type=jnp.float32) + b2_ref[l]
        x = layer_norm(x + ff, 3 * l + 2)

    # vocab head: lane-dense (T, 128) store, real logits sliced in the wrapper
    logits_ref[0] = (jnp.dot(x, fcw_ref[...], preferred_element_type=jnp.float32)
                     + fcb_ref[...]).astype(logits_ref.dtype)


# =============================================================================
# Wrapper: embedding gather + PE in XLA, single pallas_call for the decoder
# =============================================================================
def decoder_forward(prep, trg_tokens, enc_src, trg_mask, src_mask):
    B, T = trg_tokens.shape
    S = enc_src.shape[1]

    # embedding row gather + fixed sinusoidal positional encoding (cheap XLA)
    x = jnp.take(prep['emb'], trg_tokens, axis=0) + prep['pe'][:T][None]
    x_p = jnp.pad(x.astype(jnp.float32), ((0, 0), (0, 0), (0, Dp - d_model)))
    enc_p = jnp.pad(enc_src.astype(jnp.float32),
                    ((0, 0), (0, 0), (0, Dp - d_model)))

    tmask = jnp.broadcast_to(trg_mask, (B, 1, T, T))[:, 0].astype(jnp.float32)
    smask = jnp.broadcast_to(src_mask, (B, 1, T, S))[:, 0].astype(jnp.float32)

    const3 = lambda *_: (0, 0, 0)
    const2 = lambda *_: (0, 0)
    batch3 = lambda b: (b, 0, 0)

    logits_p, attn = pl.pallas_call(
        _decoder_kernel,
        out_shape=(
            jax.ShapeDtypeStruct((B, T, Vp), jnp.float32),
            jax.ShapeDtypeStruct((B, n_heads, T, S), jnp.float32),
        ),
        grid_spec=pltpu.PrefetchScalarGridSpec(
            num_scalar_prefetch=0,
            grid=(B,),                                     # stream per batch elem
            in_specs=[
                pl.BlockSpec((1, T, Dp), batch3),          # x (streams)
                pl.BlockSpec((1, S, Dp), batch3),          # enc_src (streams)
                pl.BlockSpec((1, T, T), batch3),           # trg mask
                pl.BlockSpec((1, T, S), batch3),           # src mask
                # ---- all weights VMEM-resident (constant index_map) --------
                pl.BlockSpec((n_layers, Dp, 3 * Dp), const3),   # self Wqkv
                pl.BlockSpec((n_layers, 1, 3 * Dp), const3),    # self bqkv
                pl.BlockSpec((n_layers, Dp, Dp), const3),       # self Wo
                pl.BlockSpec((n_layers, 1, Dp), const3),        # self bo
                pl.BlockSpec((n_layers, Dp, 3 * Dp), const3),   # enc  Wqkv
                pl.BlockSpec((n_layers, 1, 3 * Dp), const3),    # enc  bqkv
                pl.BlockSpec((n_layers, Dp, Dp), const3),       # enc  Wo
                pl.BlockSpec((n_layers, 1, Dp), const3),        # enc  bo
                pl.BlockSpec((n_layers, Dp, Hp), const3),       # ffn  W1
                pl.BlockSpec((n_layers, 1, Hp), const3),        # ffn  b1
                pl.BlockSpec((n_layers, Hp, Dp), const3),       # ffn  W2
                pl.BlockSpec((n_layers, 1, Dp), const3),        # ffn  b2
                pl.BlockSpec((n_layers * 3, 1, Dp), const3),    # LN gammas
                pl.BlockSpec((n_layers * 3, 1, Dp), const3),    # LN betas
                pl.BlockSpec((Dp, Vp), const2),                 # vocab head W
                pl.BlockSpec((1, Vp), const2),                  # vocab head b
            ],
            out_specs=[
                pl.BlockSpec((1, T, Vp), batch3),
                pl.BlockSpec((1, n_heads, T, S), lambda b: (b, 0, 0, 0)),
            ],
        ),
        compiler_params=pltpu.CompilerParams(
            dimension_semantics=("parallel",),       # megacore-shard batch
            vmem_limit_bytes=32 * 1024 * 1024,       # resident weights ~1.5 MiB
        ),
    )(x_p, enc_p, tmask, smask,
      prep['wqkv_s'], prep['bqkv_s'], prep['wo_s'], prep['bo_s'],
      prep['wqkv_e'], prep['bqkv_e'], prep['wo_e'], prep['bo_e'],
      prep['w1'], prep['b1'], prep['w2'], prep['b2'],
      prep['ln_g'], prep['ln_b'], prep['fc_w'], prep['fc_b'])

    return logits_p[:, :, :output_dim], attn


# =============================================================================
# Parameter init (torch defaults), one-time weight padding / fusion / folding
# =============================================================================
def _positional_encoding(max_len, dm):
    pos = jnp.arange(max_len, dtype=jnp.float32)[:, None]
    div = jnp.exp(jnp.arange(0, dm, 2, dtype=jnp.float32)
                  * (-math.log(10000.0) / dm))
    pe = jnp.zeros((max_len, dm), jnp.float32)
    pe = pe.at[:, 0::2].set(jnp.sin(pos * div))
    pe = pe.at[:, 1::2].set(jnp.cos(pos * div))
    return pe


def _init_linear(key, fan_in, fan_out):
    kw, kb = jax.random.split(key)
    bound = 1.0 / math.sqrt(fan_in)
    w = jax.random.uniform(kw, (fan_in, fan_out), jnp.float32, -bound, bound)
    b = jax.random.uniform(kb, (fan_out,), jnp.float32, -bound, bound)
    return w, b


def _init_attention(key):
    ks = jax.random.split(key, 4)
    p = {}
    for name, k in zip(('q', 'k', 'v', 'o'), ks):
        w, b = _init_linear(k, d_model, d_model)
        p['w' + name], p['b' + name] = w, b
    return p


def init_decoder_params(key):
    keys = jax.random.split(key, 2 + n_layers)
    emb = jax.random.normal(keys[0], (output_dim, d_model), jnp.float32)
    fc_w, fc_b = _init_linear(keys[1], d_model, output_dim)
    layers = []
    for li in range(n_layers):
        lk = jax.random.split(keys[2 + li], 4)
        w1, b1 = _init_linear(lk[2], d_model, pff_dim)
        w2, b2 = _init_linear(lk[3], pff_dim, d_model)
        ones = jnp.ones((d_model,), jnp.float32)
        zeros = jnp.zeros((d_model,), jnp.float32)
        layers.append(dict(
            self=_init_attention(lk[0]), enc=_init_attention(lk[1]),
            ffn_w1=w1, ffn_b1=b1, ffn_w2=w2, ffn_b2=b2,
            ln1_g=ones, ln1_b=zeros, ln2_g=ones, ln2_b=zeros,
            ln3_g=ones, ln3_b=zeros))
    return dict(emb=emb, pe=_positional_encoding(1000, d_model),
                fc_w=fc_w, fc_b=fc_b, layers=layers)


def prepare_decoder_params(params):
    """One-time: pad weights to 128 lanes, fuse QKV, fold 1/sqrt(hd) into Q."""
    scale = math.sqrt(head_dim)

    def pad_mat(w, rows, cols):
        return jnp.pad(w.astype(jnp.float32),
                       ((0, rows - w.shape[0]), (0, cols - w.shape[1])))

    def pad_vec(v, cols):
        return jnp.pad(v.astype(jnp.float32).reshape(1, -1),
                       ((0, 0), (0, cols - v.shape[-1])))

    def attn_block(p):
        wqkv = jnp.zeros((Dp, 3 * Dp), jnp.float32)
        wqkv = wqkv.at[:d_model, 0:d_model].set(p['wq'] / scale)
        wqkv = wqkv.at[:d_model, Dp:Dp + d_model].set(p['wk'])
        wqkv = wqkv.at[:d_model, 2 * Dp:2 * Dp + d_model].set(p['wv'])
        bqkv = jnp.zeros((1, 3 * Dp), jnp.float32)
        bqkv = bqkv.at[0, 0:d_model].set(p['bq'] / scale)
        bqkv = bqkv.at[0, Dp:Dp + d_model].set(p['bk'])
        bqkv = bqkv.at[0, 2 * Dp:2 * Dp + d_model].set(p['bv'])
        return wqkv, bqkv, pad_mat(p['wo'], Dp, Dp), pad_vec(p['bo'], Dp)

    acc = {k: [] for k in ('wqkv_s', 'bqkv_s', 'wo_s', 'bo_s',
                           'wqkv_e', 'bqkv_e', 'wo_e', 'bo_e',
                           'w1', 'b1', 'w2', 'b2', 'ln_g', 'ln_b')}
    for lp in params['layers']:
        for tag, ap in (('s', lp['self']), ('e', lp['enc'])):
            a, b_, c, d = attn_block(ap)
            acc['wqkv_' + tag].append(a); acc['bqkv_' + tag].append(b_)
            acc['wo_' + tag].append(c); acc['bo_' + tag].append(d)
        acc['w1'].append(pad_mat(lp['ffn_w1'], Dp, Hp))
        acc['b1'].append(pad_vec(lp['ffn_b1'], Hp))
        acc['w2'].append(pad_mat(lp['ffn_w2'], Hp, Dp))
        acc['b2'].append(pad_vec(lp['ffn_b2'], Dp))
        for name in ('ln1', 'ln2', 'ln3'):
            acc['ln_g'].append(pad_vec(lp[name + '_g'], Dp))
            acc['ln_b'].append(pad_vec(lp[name + '_b'], Dp))

    prep = {k: jnp.stack(v, axis=0) for k, v in acc.items()}
    prep['emb'] = params['emb']
    prep['pe'] = params['pe']
    prep['fc_w'] = pad_mat(params['fc_w'], Dp, Vp)
    prep['fc_b'] = pad_vec(params['fc_b'], Vp)
    return prep


# =============================================================================
# Pure-JAX reference (eval-mode PyTorch semantics) for correctness checking
# =============================================================================
def _ref_mha(x_q, x_kv, p, mask):
    B, Sq, D = x_q.shape
    Sk = x_kv.shape[1]
    q = x_q @ p['wq'] + p['bq']
    k = x_kv @ p['wk'] + p['bk']
    v = x_kv @ p['wv'] + p['bv']
    qh = q.reshape(B, Sq, n_heads, head_dim).transpose(0, 2, 1, 3)
    kh = k.reshape(B, Sk, n_heads, head_dim).transpose(0, 2, 1, 3)
    vh = v.reshape(B, Sk, n_heads, head_dim).transpose(0, 2, 1, 3)
    e = jnp.einsum('bhqd,bhkd->bhqk', qh, kh) / math.sqrt(head_dim)
    e = jnp.where(mask == 0, -1e10, e)
    a = jax.nn.softmax(e, axis=-1)
    w = jnp.einsum('bhqk,bhkd->bhqd', a, vh)
    w = w.transpose(0, 2, 1, 3).reshape(B, Sq, D)
    return w @ p['wo'] + p['bo'], a


def _ref_ln(x, g, b):
    mu = x.mean(-1, keepdims=True)
    var = ((x - mu) ** 2).mean(-1, keepdims=True)
    return (x - mu) * jax.lax.rsqrt(var + _LN_EPS) * g + b


def decoder_reference(params, trg_tokens, enc_src, trg_mask, src_mask):
    B, T = trg_tokens.shape
    x = params['emb'][trg_tokens] + params['pe'][:T][None, :, :]
    attention = None
    for lp in params['layers']:
        sa, _ = _ref_mha(x, x, lp['self'], trg_mask)
        x = _ref_ln(x + sa, lp['ln1_g'], lp['ln1_b'])
        ea, attention = _ref_mha(x, enc_src, lp['enc'], src_mask)
        x = _ref_ln(x + ea, lp['ln2_g'], lp['ln2_b'])
        ff = jnp.maximum(x @ lp['ffn_w1'] + lp['ffn_b1'], 0.0) @ lp['ffn_w2'] + lp['ffn_b2']
        x = _ref_ln(x + ff, lp['ln3_g'], lp['ln3_b'])
    return x @ params['fc_w'] + params['fc_b'], attention


# =============================================================================
if __name__ == "__main__":
    key = jax.random.PRNGKey(0)
    k_par, k_trg, k_enc = jax.random.split(key, 3)

    batch, trg_len, src_len = 6, 8, 8
    params = init_decoder_params(k_par)
    prep = prepare_decoder_params(params)       # weight padding hoisted to init

    trg_tokens = jax.random.randint(k_trg, (batch, trg_len), 0, output_dim,
                                    dtype=jnp.int32)
    enc_src = jax.random.normal(k_enc, (batch, src_len, d_model), jnp.float32)
    trg_mask = jnp.broadcast_to(
        jnp.tril(jnp.ones((trg_len, trg_len), jnp.float32))[None, None],
        (batch, 1, trg_len, trg_len))
    src_mask = jnp.ones((batch, 1, 1, src_len), jnp.float32)

    fwd = jax.jit(decoder_forward)
    logits, attention = fwd(prep, trg_tokens, enc_src, trg_mask, src_mask)
    logits, attention = jax.block_until_ready((logits, attention))

    ref_logits, ref_attention = decoder_reference(params, trg_tokens, enc_src,
                                                  trg_mask, src_mask)

    assert logits.shape == (batch, trg_len, output_dim)
    assert attention.shape == (batch, n_heads, trg_len, src_len)
    assert jnp.allclose(logits, ref_logits, atol=1e-3, rtol=1e-3)
    assert jnp.allclose(attention, ref_attention, atol=1e-3, rtol=1e-3)

    print("KERNEL_OK")
</pallas_src>

<mosaic_0001>
module attributes {stable_mosaic.version = 11 : i64} {
  func.func @_decoder_kernel(%arg0: i32, %arg1: memref<1x8x128xf32, #tpu.memory_space<vmem>>, %arg2: memref<1x8x128xf32, #tpu.memory_space<vmem>>, %arg3: memref<1x8x8xf32, #tpu.memory_space<vmem>>, %arg4: memref<1x8x8xf32, #tpu.memory_space<vmem>>, %arg5: memref<2x128x384xf32, #tpu.memory_space<vmem>>, %arg6: memref<2x1x384xf32, #tpu.memory_space<vmem>>, %arg7: memref<2x128x128xf32, #tpu.memory_space<vmem>>, %arg8: memref<2x1x128xf32, #tpu.memory_space<vmem>>, %arg9: memref<2x128x384xf32, #tpu.memory_space<vmem>>, %arg10: memref<2x1x384xf32, #tpu.memory_space<vmem>>, %arg11: memref<2x128x128xf32, #tpu.memory_space<vmem>>, %arg12: memref<2x1x128xf32, #tpu.memory_space<vmem>>, %arg13: memref<2x128x128xf32, #tpu.memory_space<vmem>>, %arg14: memref<2x1x128xf32, #tpu.memory_space<vmem>>, %arg15: memref<2x128x128xf32, #tpu.memory_space<vmem>>, %arg16: memref<2x1x128xf32, #tpu.memory_space<vmem>>, %arg17: memref<6x1x128xf32, #tpu.memory_space<vmem>>, %arg18: memref<6x1x128xf32, #tpu.memory_space<vmem>>, %arg19: memref<128x128xf32, #tpu.memory_space<vmem>>, %arg20: memref<1x128xf32, #tpu.memory_space<vmem>>, %arg21: memref<1x8x128xf32, #tpu.memory_space<vmem>>, %arg22: memref<1x4x8x8xf32, #tpu.memory_space<vmem>>) attributes {dimension_semantics = [#tpu.dimension_semantics<parallel>], iteration_bounds = array<i64: 6>, scalar_prefetch = 0 : i64, scratch_operands = 0 : i64, tpu.core_type = #tpu.core_type<tc>, window_params = [{transform_indices = @transform_0, window_bounds = array<i64: 1, 8, 128>}, {transform_indices = @transform_1, window_bounds = array<i64: 1, 8, 128>}, {transform_indices = @transform_2, window_bounds = array<i64: 1, 8, 8>}, {transform_indices = @transform_3, window_bounds = array<i64: 1, 8, 8>}, {pipeline_mode = #tpu.pipeline_mode<synchronous>, transform_indices = @transform_4, window_bounds = array<i64: 2, 128, 384>}, {pipeline_mode = #tpu.pipeline_mode<synchronous>, transform_indices = @transform_5, window_bounds = array<i64: 2, 1, 384>}, {pipeline_mode = #tpu.pipeline_mode<synchronous>, transform_indices = @transform_6, window_bounds = array<i64: 2, 128, 128>}, {pipeline_mode = #tpu.pipeline_mode<synchronous>, transform_indices = @transform_7, window_bounds = array<i64: 2, 1, 128>}, {pipeline_mode = #tpu.pipeline_mode<synchronous>, transform_indices = @transform_8, window_bounds = array<i64: 2, 128, 384>}, {pipeline_mode = #tpu.pipeline_mode<synchronous>, transform_indices = @transform_9, window_bounds = array<i64: 2, 1, 384>}, {pipeline_mode = #tpu.pipeline_mode<synchronous>, transform_indices = @transform_10, window_bounds = array<i64: 2, 128, 128>}, {pipeline_mode = #tpu.pipeline_mode<synchronous>, transform_indices = @transform_11, window_bounds = array<i64: 2, 1, 128>}, {pipeline_mode = #tpu.pipeline_mode<synchronous>, transform_indices = @transform_12, window_bounds = array<i64: 2, 128, 128>}, {pipeline_mode = #tpu.pipeline_mode<synchronous>, transform_indices = @transform_13, window_bounds = array<i64: 2, 1, 128>}, {pipeline_mode = #tpu.pipeline_mode<synchronous>, transform_indices = @transform_14, window_bounds = array<i64: 2, 128, 128>}, {pipeline_mode = #tpu.pipeline_mode<synchronous>, transform_indices = @transform_15, window_bounds = array<i64: 2, 1, 128>}, {pipeline_mode = #tpu.pipeline_mode<synchronous>, transform_indices = @transform_16, window_bounds = array<i64: 6, 1, 128>}, {pipeline_mode = #tpu.pipeline_mode<synchronous>, transform_indices = @transform_17, window_bounds = array<i64: 6, 1, 128>}, {pipeline_mode = #tpu.pipeline_mode<synchronous>, transform_indices = @transform_18, window_bounds = array<i64: 128, 128>}, {pipeline_mode = #tpu.pipeline_mode<synchronous>, transform_indices = @transform_19, window_bounds = array<i64: 1, 128>}, {transform_indices = @transform_20, window_bounds = array<i64: 1, 8, 128>}, {transform_indices = @transform_21, window_bounds = array<i64: 1, 4, 8, 8>}]} {
    %c0 = arith.constant 0 : index
    %c0_0 = arith.constant 0 : index
    %c0_1 = arith.constant 0 : index
    %0 = vector.load %arg1[%c0, %c0_0, %c0_1] : memref<1x8x128xf32, #tpu.memory_space<vmem>>, vector<1x8x128xf32>
    %1 = vector.shape_cast %0 : vector<1x8x128xf32> to vector<8x128xf32>
    %c0_2 = arith.constant 0 : index
    %c0_3 = arith.constant 0 : index
    %c0_4 = arith.constant 0 : index
    %2 = vector.load %arg2[%c0_2, %c0_3, %c0_4] : memref<1x8x128xf32, #tpu.memory_space<vmem>>, vector<1x8x128xf32>
    %3 = vector.shape_cast %2 : vector<1x8x128xf32> to vector<8x128xf32>
    %c0_5 = arith.constant 0 : index
    %c0_6 = arith.constant 0 : index
    %c0_7 = arith.constant 0 : index
    %4 = vector.load %arg3[%c0_5, %c0_6, %c0_7] : memref<1x8x8xf32, #tpu.memory_space<vmem>>, vector<1x8x8xf32>
    %5 = vector.shape_cast %4 : vector<1x8x8xf32> to vector<8x8xf32>
    %c0_8 = arith.constant 0 : index
    %c0_9 = arith.constant 0 : index
    %c0_10 = arith.constant 0 : index
    %6 = vector.load %arg4[%c0_8, %c0_9, %c0_10] : memref<1x8x8xf32, #tpu.memory_space<vmem>>, vector<1x8x8xf32>
    %7 = vector.shape_cast %6 : vector<1x8x8xf32> to vector<8x8xf32>
    %8 = tpu.iota {dimensions = array<i32: 1>} : vector<1x128xi32>
    %c16_i32 = arith.constant 16 : i32
    %9 = vector.broadcast %c16_i32 : i32 to vector<1x128xi32>
    %10 = arith.cmpi slt, %8, %9 : vector<1x128xi32>
    %11 = arith.extui %10 : vector<1x128xi1> to vector<1x128xi32>
    %12 = arith.sitofp %11 : vector<1x128xi32> to vector<1x128xf32>
    %c0_i32 = arith.constant 0 : i32
    %13 = vector.broadcast %c0_i32 : i32 to vector<1x128xi32>
    %14 = arith.cmpi sge, %8, %13 : vector<1x128xi32>
    %c4_i32 = arith.constant 4 : i32
    %15 = vector.broadcast %c4_i32 : i32 to vector<1x128xi32>
    %16 = arith.cmpi slt, %8, %15 : vector<1x128xi32>
    %17 = arith.andi %14, %16 : vector<1x128xi1>
    %18 = arith.extui %17 : vector<1x128xi1> to vector<1x128xi32>
    %19 = arith.sitofp %18 : vector<1x128xi32> to vector<1x128xf32>
    %c4_i32_11 = arith.constant 4 : i32
    %20 = vector.broadcast %c4_i32_11 : i32 to vector<1x128xi32>
    %21 = arith.cmpi sge, %8, %20 : vector<1x128xi32>
    %c8_i32 = arith.constant 8 : i32
    %22 = vector.broadcast %c8_i32 : i32 to vector<1x128xi32>
    %23 = arith.cmpi slt, %8, %22 : vector<1x128xi32>
    %24 = arith.andi %21, %23 : vector<1x128xi1>
    %25 = arith.extui %24 : vector<1x128xi1> to vector<1x128xi32>
    %26 = arith.sitofp %25 : vector<1x128xi32> to vector<1x128xf32>
    %c8_i32_12 = arith.constant 8 : i32
    %27 = vector.broadcast %c8_i32_12 : i32 to vector<1x128xi32>
    %28 = arith.cmpi sge, %8, %27 : vector<1x128xi32>
    %c12_i32 = arith.constant 12 : i32
    %29 = vector.broadcast %c12_i32 : i32 to vector<1x128xi32>
    %30 = arith.cmpi slt, %8, %29 : vector<1x128xi32>
    %31 = arith.andi %28, %30 : vector<1x128xi1>
    %32 = arith.extui %31 : vector<1x128xi1> to vector<1x128xi32>
    %33 = arith.sitofp %32 : vector<1x128xi32> to vector<1x128xf32>
    %c12_i32_13 = arith.constant 12 : i32
    %34 = vector.broadcast %c12_i32_13 : i32 to vector<1x128xi32>
    %35 = arith.cmpi sge, %8, %34 : vector<1x128xi32>
    %c16_i32_14 = arith.constant 16 : i32
    %36 = vector.broadcast %c16_i32_14 : i32 to vector<1x128xi32>
    %37 = arith.cmpi slt, %8, %36 : vector<1x128xi32>
    %38 = arith.andi %35, %37 : vector<1x128xi1>
    %39 = arith.extui %38 : vector<1x128xi1> to vector<1x128xi32>
    %40 = arith.sitofp %39 : vector<1x128xi32> to vector<1x128xf32>
    %c0_15 = arith.constant 0 : index
    %c0_16 = arith.constant 0 : index
    %c0_17 = arith.constant 0 : index
    %41 = vector.load %arg5[%c0_15, %c0_16, %c0_17] : memref<2x128x384xf32, #tpu.memory_space<vmem>>, vector<1x128x384xf32>
    %42 = vector.shape_cast %41 : vector<1x128x384xf32> to vector<128x384xf32>
    %c0_18 = arith.constant 0 : index
    %c0_19 = arith.constant 0 : index
    %c0_20 = arith.constant 0 : index
    %43 = vector.load %arg6[%c0_18, %c0_19, %c0_20] : memref<2x1x384xf32, #tpu.memory_space<vmem>>, vector<1x1x384xf32>
    %44 = vector.shape_cast %43 : vector<1x1x384xf32> to vector<1x384xf32>
    %c0_21 = arith.constant 0 : index
    %c0_22 = arith.constant 0 : index
    %c0_23 = arith.constant 0 : index
    %45 = vector.load %arg7[%c0_21, %c0_22, %c0_23] : memref<2x128x128xf32, #tpu.memory_space<vmem>>, vector<1x128x128xf32>
    %46 = vector.shape_cast %45 : vector<1x128x128xf32> to vector<128x128xf32>
    %c0_24 = arith.constant 0 : index
    %c0_25 = arith.constant 0 : index
    %c0_26 = arith.constant 0 : index
    %47 = vector.load %arg8[%c0_24, %c0_25, %c0_26] : memref<2x1x128xf32, #tpu.memory_space<vmem>>, vector<1x1x128xf32>
    %48 = vector.shape_cast %47 : vector<1x1x128xf32> to vector<1x128xf32>
    %cst = arith.constant dense<0.000000e+00> : vector<8x384xf32>
    %49 = tpu.matmul %1, %42, %cst {dimension_numbers = #tpu.dot_dimension_numbers<[1], [0], [0], [1], [0, 0, 1, 1], [], []>} : vector<8x128xf32>, vector<128x384xf32>, vector<8x384xf32> -> vector<8x384xf32>
    %50 = vector.broadcast %44 : vector<1x384xf32> to vector<8x384xf32>
    %51 = arith.addf %49, %50 : vector<8x384xf32>
    %cst_27 = arith.constant dense<0.000000e+00> : vector<8x384xf32>
    %52 = tpu.matmul %1, %42, %cst_27 {dimension_numbers = #tpu.dot_dimension_numbers<[1], [0], [0], [1], [0, 0, 1, 1], [], []>} : vector<8x128xf32>, vector<128x384xf32>, vector<8x384xf32> -> vector<8x384xf32>
    %53 = vector.broadcast %44 : vector<1x384xf32> to vector<8x384xf32>
    %54 = arith.addf %52, %53 : vector<8x384xf32>
    %55 = vector.extract_strided_slice %51 {offsets = [0, 0], sizes = [8, 128], strides = [1, 1]} : vector<8x384xf32> to vector<8x128xf32>
    %56 = vector.extract_strided_slice %54 {offsets = [0, 128], sizes = [8, 128], strides = [1, 1]} : vector<8x384xf32> to vector<8x128xf32>
    %57 = vector.extract_strided_slice %54 {offsets = [0, 256], sizes = [8, 128], strides = [1, 1]} : vector<8x384xf32> to vector<8x128xf32>
    %cst_28 = arith.constant 0.000000e+00 : f32
    %58 = vector.broadcast %cst_28 : f32 to vector<8x128xf32>
    %59 = vector.broadcast %19 : vector<1x128xf32> to vector<8x128xf32>
    %60 = arith.mulf %55, %59 : vector<8x128xf32>
    %cst_29 = arith.constant dense<0.000000e+00> : vector<8x8xf32>
    %61 = tpu.matmul %60, %56, %cst_29 {dimension_numbers = #tpu.dot_dimension_numbers<[1], [1], [0], [0], [0, 0, 1, 0], [], []>} : vector<8x128xf32>, vector<8x128xf32>, vector<8x8xf32> -> vector<8x8xf32>
    %cst_30 = arith.constant 0.000000e+00 : f32
    %62 = vector.broadcast %cst_30 : f32 to vector<8x8xf32>
    %63 = arith.cmpf oeq, %5, %62 : vector<8x8xf32>
    %cst_31 = arith.constant -1.000000e+10 : f32
    %64 = vector.broadcast %cst_31 : f32 to vector<8x8xf32>
    %65 = arith.select %63, %64, %61 : vector<8x8xi1>, vector<8x8xf32>
    %cst_32 = arith.constant dense<0xFF800000> : vector<8xf32>
    %66 = vector.multi_reduction <maximumf>, %65, %cst_32 [1] : vector<8x8xf32> to vector<8xf32>
    %67 = vector.shape_cast %66 : vector<8xf32> to vector<8x1xf32>
    %68 = vector.broadcast %67 : vector<8x1xf32> to vector<8x8xf32>
    %69 = arith.subf %65, %68 : vector<8x8xf32>
    %70 = math.exp %69 : vector<8x8xf32>
    %cst_33 = arith.constant dense<0.000000e+00> : vector<8xf32>
    %71 = vector.multi_reduction <add>, %70, %cst_33 [1] : vector<8x8xf32> to vector<8xf32>
    %72 = vector.shape_cast %71 : vector<8xf32> to vector<8x1xf32>
    %73 = vector.broadcast %72 : vector<8x1xf32> to vector<8x8xf32>
    %74 = arith.divf %70, %73 : vector<8x8xf32>
    %cst_34 = arith.constant dense<0.000000e+00> : vector<8x128xf32>
    %75 = tpu.matmul %74, %57, %cst_34 {dimension_numbers = #tpu.dot_dimension_numbers<[1], [0], [0], [1], [0, 0, 1, 1], [], []>} : vector<8x8xf32>, vector<8x128xf32>, vector<8x128xf32> -> vector<8x128xf32>
    %76 = vector.broadcast %19 : vector<1x128xf32> to vector<8x128xf32>
    %77 = arith.mulf %76, %75 : vector<8x128xf32>
    %78 = arith.addf %58, %77 : vector<8x128xf32>
    %79 = vector.broadcast %26 : vector<1x128xf32> to vector<8x128xf32>
    %80 = arith.mulf %55, %79 : vector<8x128xf32>
    %cst_35 = arith.constant dense<0.000000e+00> : vector<8x8xf32>
    %81 = tpu.matmul %80, %56, %cst_35 {dimension_numbers = #tpu.dot_dimension_numbers<[1], [1], [0], [0], [0, 0, 1, 0], [], []>} : vector<8x128xf32>, vector<8x128xf32>, vector<8x8xf32> -> vector<8x8xf32>
    %cst_36 = arith.constant 0.000000e+00 : f32
    %82 = vector.broadcast %cst_36 : f32 to vector<8x8xf32>
    %83 = arith.cmpf oeq, %5, %82 : vector<8x8xf32>
    %cst_37 = arith.constant -1.000000e+10 : f32
    %84 = vector.broadcast %cst_37 : f32 to vector<8x8xf32>
    %85 = arith.select %83, %84, %81 : vector<8x8xi1>, vector<8x8xf32>
    %cst_38 = arith.constant dense<0xFF800000> : vector<8xf32>
    %86 = vector.multi_reduction <maximumf>, %85, %cst_38 [1] : vector<8x8xf32> to vector<8xf32>
    %87 = vector.shape_cast %86 : vector<8xf32> to vector<8x1xf32>
    %88 = vector.broadcast %87 : vector<8x1xf32> to vector<8x8xf32>
    %89 = arith.subf %85, %88 : vector<8x8xf32>
    %90 = math.exp %89 : vector<8x8xf32>
    %cst_39 = arith.constant dense<0.000000e+00> : vector<8xf32>
    %91 = vector.multi_reduction <add>, %90, %cst_39 [1] : vector<8x8xf32> to vector<8xf32>
    %92 = vector.shape_cast %91 : vector<8xf32> to vector<8x1xf32>
    %93 = vector.broadcast %92 : vector<8x1xf32> to vector<8x8xf32>
    %94 = arith.divf %90, %93 : vector<8x8xf32>
    %cst_40 = arith.constant dense<0.000000e+00> : vector<8x128xf32>
    %95 = tpu.matmul %94, %57, %cst_40 {dimension_numbers = #tpu.dot_dimension_numbers<[1], [0], [0], [1], [0, 0, 1, 1], [], []>} : vector<8x8xf32>, vector<8x128xf32>, vector<8x128xf32> -> vector<8x128xf32>
    %96 = vector.broadcast %26 : vector<1x128xf32> to vector<8x128xf32>
    %97 = arith.mulf %96, %95 : vector<8x128xf32>
    %98 = arith.addf %78, %97 : vector<8x128xf32>
    %99 = vector.broadcast %33 : vector<1x128xf32> to vector<8x128xf32>
    %100 = arith.mulf %55, %99 : vector<8x128xf32>
    %cst_41 = arith.constant dense<0.000000e+00> : vector<8x8xf32>
    %101 = tpu.matmul %100, %56, %cst_41 {dimension_numbers = #tpu.dot_dimension_numbers<[1], [1], [0], [0], [0, 0, 1, 0], [], []>} : vector<8x128xf32>, vector<8x128xf32>, vector<8x8xf32> -> vector<8x8xf32>
    %cst_42 = arith.constant 0.000000e+00 : f32
    %102 = vector.broadcast %cst_42 : f32 to vector<8x8xf32>
    %103 = arith.cmpf oeq, %5, %102 : vector<8x8xf32>
    %cst_43 = arith.constant -1.000000e+10 : f32
    %104 = vector.broadcast %cst_43 : f32 to vector<8x8xf32>
    %105 = arith.select %103, %104, %101 : vector<8x8xi1>, vector<8x8xf32>
    %cst_44 = arith.constant dense<0xFF800000> : vector<8xf32>
    %106 = vector.multi_reduction <maximumf>, %105, %cst_44 [1] : vector<8x8xf32> to vector<8xf32>
    %107 = vector.shape_cast %106 : vector<8xf32> to vector<8x1xf32>
    %108 = vector.broadcast %107 : vector<8x1xf32> to vector<8x8xf32>
    %109 = arith.subf %105, %108 : vector<8x8xf32>
    %110 = math.exp %109 : vector<8x8xf32>
    %cst_45 = arith.constant dense<0.000000e+00> : vector<8xf32>
    %111 = vector.multi_reduction <add>, %110, %cst_45 [1] : vector<8x8xf32> to vector<8xf32>
    %112 = vector.shape_cast %111 : vector<8xf32> to vector<8x1xf32>
    %113 = vector.broadcast %112 : vector<8x1xf32> to vector<8x8xf32>
    %114 = arith.divf %110, %113 : vector<8x8xf32>
    %cst_46 = arith.constant dense<0.000000e+00> : vector<8x128xf32>
    %115 = tpu.matmul %114, %57, %cst_46 {dimension_numbers = #tpu.dot_dimension_numbers<[1], [0], [0], [1], [0, 0, 1, 1], [], []>} : vector<8x8xf32>, vector<8x128xf32>, vector<8x128xf32> -> vector<8x128xf32>
    %116 = vector.broadcast %33 : vector<1x128xf32> to vector<8x128xf32>
    %117 = arith.mulf %116, %115 : vector<8x128xf32>
    %118 = arith.addf %98, %117 : vector<8x128xf32>
    %119 = vector.broadcast %40 : vector<1x128xf32> to vector<8x128xf32>
    %120 = arith.mulf %55, %119 : vector<8x128xf32>
    %cst_47 = arith.constant dense<0.000000e+00> : vector<8x8xf32>
    %121 = tpu.matmul %120, %56, %cst_47 {dimension_numbers = #tpu.dot_dimension_numbers<[1], [1], [0], [0], [0, 0, 1, 0], [], []>} : vector<8x128xf32>, vector<8x128xf32>, vector<8x8xf32> -> vector<8x8xf32>
    %cst_48 = arith.constant 0.000000e+00 : f32
    %122 = vector.broadcast %cst_48 : f32 to vector<8x8xf32>
    %123 = arith.cmpf oeq, %5, %122 : vector<8x8xf32>
    %cst_49 = arith.constant -1.000000e+10 : f32
    %124 = vector.broadcast %cst_49 : f32 to vector<8x8xf32>
    %125 = arith.select %123, %124, %121 : vector<8x8xi1>, vector<8x8xf32>
    %cst_50 = arith.constant dense<0xFF800000> : vector<8xf32>
    %126 = vector.multi_reduction <maximumf>, %125, %cst_50 [1] : vector<8x8xf32> to vector<8xf32>
    %127 = vector.shape_cast %126 : vector<8xf32> to vector<8x1xf32>
    %128 = vector.broadcast %127 : vector<8x1xf32> to vector<8x8xf32>
    %129 = arith.subf %125, %128 : vector<8x8xf32>
    %130 = math.exp %129 : vector<8x8xf32>
    %cst_51 = arith.constant dense<0.000000e+00> : vector<8xf32>
    %131 = vector.multi_reduction <add>, %130, %cst_51 [1] : vector<8x8xf32> to vector<8xf32>
    %132 = vector.shape_cast %131 : vector<8xf32> to vector<8x1xf32>
    %133 = vector.broadcast %132 : vector<8x1xf32> to vector<8x8xf32>
    %134 = arith.divf %130, %133 : vector<8x8xf32>
    %cst_52 = arith.constant dense<0.000000e+00> : vector<8x128xf32>
    %135 = tpu.matmul %134, %57, %cst_52 {dimension_numbers = #tpu.dot_dimension_numbers<[1], [0], [0], [1], [0, 0, 1, 1], [], []>} : vector<8x8xf32>, vector<8x128xf32>, vector<8x128xf32> -> vector<8x128xf32>
    %136 = vector.broadcast %40 : vector<1x128xf32> to vector<8x128xf32>
    %137 = arith.mulf %136, %135 : vector<8x128xf32>
    %138 = arith.addf %118, %137 : vector<8x128xf32>
    %cst_53 = arith.constant dense<0.000000e+00> : vector<8x128xf32>
    %139 = tpu.matmul %138, %46, %cst_53 {dimension_numbers = #tpu.dot_dimension_numbers<[1], [0], [0], [1], [0, 0, 1, 1], [], []>} : vector<8x128xf32>, vector<128x128xf32>, vector<8x128xf32> -> vector<8x128xf32>
    %140 = vector.broadcast %48 : vector<1x128xf32> to vector<8x128xf32>
    %141 = arith.addf %139, %140 : vector<8x128xf32>
    %142 = arith.addf %1, %141 : vector<8x128xf32>
    %c0_54 = arith.constant 0 : index
    %c0_55 = arith.constant 0 : index
    %c0_56 = arith.constant 0 : index
    %143 = vector.load %arg17[%c0_54, %c0_55, %c0_56] : memref<6x1x128xf32, #tpu.memory_space<vmem>>, vector<1x1x128xf32>
    %144 = vector.shape_cast %143 : vector<1x1x128xf32> to vector<1x128xf32>
    %c0_57 = arith.constant 0 : index
    %c0_58 = arith.constant 0 : index
    %c0_59 = arith.constant 0 : index
    %145 = vector.load %arg18[%c0_57, %c0_58, %c0_59] : memref<6x1x128xf32, #tpu.memory_space<vmem>>, vector<1x1x128xf32>
    %146 = vector.shape_cast %145 : vector<1x1x128xf32> to vector<1x128xf32>
    %cst_60 = arith.constant dense<0.000000e+00> : vector<8xf32>
    %147 = vector.multi_reduction <add>, %142, %cst_60 [1] : vector<8x128xf32> to vector<8xf32>
    %148 = vector.shape_cast %147 : vector<8xf32> to vector<8x1xf32>
    %cst_61 = arith.constant 6.250000e-02 : f32
    %149 = vector.broadcast %cst_61 : f32 to vector<8x1xf32>
    %150 = arith.mulf %148, %149 : vector<8x1xf32>
    %151 = vector.broadcast %150 : vector<8x1xf32> to vector<8x128xf32>
    %152 = arith.subf %142, %151 : vector<8x128xf32>
    %153 = vector.broadcast %12 : vector<1x128xf32> to vector<8x128xf32>
    %154 = arith.mulf %152, %153 : vector<8x128xf32>
    %155 = arith.mulf %154, %154 : vector<8x128xf32>
    %cst_62 = arith.constant dense<0.000000e+00> : vector<8xf32>
    %156 = vector.multi_reduction <add>, %155, %cst_62 [1] : vector<8x128xf32> to vector<8xf32>
    %157 = vector.shape_cast %156 : vector<8xf32> to vector<8x1xf32>
    %cst_63 = arith.constant 6.250000e-02 : f32
    %158 = vector.broadcast %cst_63 : f32 to vector<8x1xf32>
    %159 = arith.mulf %157, %158 : vector<8x1xf32>
    %cst_64 = arith.constant 9.99999974E-6 : f32
    %160 = vector.broadcast %cst_64 : f32 to vector<8x1xf32>
    %161 = arith.addf %159, %160 : vector<8x1xf32>
    %162 = math.rsqrt %161 : vector<8x1xf32>
    %163 = vector.broadcast %162 : vector<8x1xf32> to vector<8x128xf32>
    %164 = arith.mulf %154, %163 : vector<8x128xf32>
    %165 = vector.broadcast %144 : vector<1x128xf32> to vector<8x128xf32>
    %166 = arith.mulf %164, %165 : vector<8x128xf32>
    %167 = vector.broadcast %146 : vector<1x128xf32> to vector<8x128xf32>
    %168 = arith.addf %166, %167 : vector<8x128xf32>
    %c0_65 = arith.constant 0 : index
    %c0_66 = arith.constant 0 : index
    %c0_67 = arith.constant 0 : index
    %169 = vector.load %arg9[%c0_65, %c0_66, %c0_67] : memref<2x128x384xf32, #tpu.memory_space<vmem>>, vector<1x128x384xf32>
    %170 = vector.shape_cast %169 : vector<1x128x384xf32> to vector<128x384xf32>
    %c0_68 = arith.constant 0 : index
    %c0_69 = arith.constant 0 : index
    %c0_70 = arith.constant 0 : index
    %171 = vector.load %arg10[%c0_68, %c0_69, %c0_70] : memref<2x1x384xf32, #tpu.memory_space<vmem>>, vector<1x1x384xf32>
    %172 = vector.shape_cast %171 : vector<1x1x384xf32> to vector<1x384xf32>
    %c0_71 = arith.constant 0 : index
    %c0_72 = arith.constant 0 : index
    %c0_73 = arith.constant 0 : index
    %173 = vector.load %arg11[%c0_71, %c0_72, %c0_73] : memref<2x128x128xf32, #tpu.memory_space<vmem>>, vector<1x128x128xf32>
    %174 = vector.shape_cast %173 : vector<1x128x128xf32> to vector<128x128xf32>
    %c0_74 = arith.constant 0 : index
    %c0_75 = arith.constant 0 : index
    %c0_76 = arith.constant 0 : index
    %175 = vector.load %arg12[%c0_74, %c0_75, %c0_76] : memref<2x1x128xf32, #tpu.memory_space<vmem>>, vector<1x1x128xf32>
    %176 = vector.shape_cast %175 : vector<1x1x128xf32> to vector<1x128xf32>
    %cst_77 = arith.constant dense<0.000000e+00> : vector<8x384xf32>
    %177 = tpu.matmul %168, %170, %cst_77 {dimension_numbers = #tpu.dot_dimension_numbers<[1], [0], [0], [1], [0, 0, 1, 1], [], []>} : vector<8x128xf32>, vector<128x384xf32>, vector<8x384xf32> -> vector<8x384xf32>
    %178 = vector.broadcast %172 : vector<1x384xf32> to vector<8x384xf32>
    %179 = arith.addf %177, %178 : vector<8x384xf32>
    %cst_78 = arith.constant dense<0.000000e+00> : vector<8x384xf32>
    %180 = tpu.matmul %3, %170, %cst_78 {dimension_numbers = #tpu.dot_dimension_numbers<[1], [0], [0], [1], [0, 0, 1, 1], [], []>} : vector<8x128xf32>, vector<128x384xf32>, vector<8x384xf32> -> vector<8x384xf32>
    %181 = vector.broadcast %172 : vector<1x384xf32> to vector<8x384xf32>
    %182 = arith.addf %180, %181 : vector<8x384xf32>
    %183 = vector.extract_strided_slice %179 {offsets = [0, 0], sizes = [8, 128], strides = [1, 1]} : vector<8x384xf32> to vector<8x128xf32>
    %184 = vector.extract_strided_slice %182 {offsets = [0, 128], sizes = [8, 128], strides = [1, 1]} : vector<8x384xf32> to vector<8x128xf32>
    %185 = vector.extract_strided_slice %182 {offsets = [0, 256], sizes = [8, 128], strides = [1, 1]} : vector<8x384xf32> to vector<8x128xf32>
    %cst_79 = arith.constant 0.000000e+00 : f32
    %186 = vector.broadcast %cst_79 : f32 to vector<8x128xf32>
    %187 = vector.broadcast %19 : vector<1x128xf32> to vector<8x128xf32>
    %188 = arith.mulf %183, %187 : vector<8x128xf32>
    %cst_80 = arith.constant dense<0.000000e+00> : vector<8x8xf32>
    %189 = tpu.matmul %188, %184, %cst_80 {dimension_numbers = #tpu.dot_dimension_numbers<[1], [1], [0], [0], [0, 0, 1, 0], [], []>} : vector<8x128xf32>, vector<8x128xf32>, vector<8x8xf32> -> vector<8x8xf32>
    %cst_81 = arith.constant 0.000000e+00 : f32
    %190 = vector.broadcast %cst_81 : f32 to vector<8x8xf32>
    %191 = arith.cmpf oeq, %7, %190 : vector<8x8xf32>
    %cst_82 = arith.constant -1.000000e+10 : f32
    %192 = vector.broadcast %cst_82 : f32 to vector<8x8xf32>
    %193 = arith.select %191, %192, %189 : vector<8x8xi1>, vector<8x8xf32>
    %cst_83 = arith.constant dense<0xFF800000> : vector<8xf32>
    %194 = vector.multi_reduction <maximumf>, %193, %cst_83 [1] : vector<8x8xf32> to vector<8xf32>
    %195 = vector.shape_cast %194 : vector<8xf32> to vector<8x1xf32>
    %196 = vector.broadcast %195 : vector<8x1xf32> to vector<8x8xf32>
    %197 = arith.subf %193, %196 : vector<8x8xf32>
    %198 = math.exp %197 : vector<8x8xf32>
    %cst_84 = arith.constant dense<0.000000e+00> : vector<8xf32>
    %199 = vector.multi_reduction <add>, %198, %cst_84 [1] : vector<8x8xf32> to vector<8xf32>
    %200 = vector.shape_cast %199 : vector<8xf32> to vector<8x1xf32>
    %201 = vector.broadcast %200 : vector<8x1xf32> to vector<8x8xf32>
    %202 = arith.divf %198, %201 : vector<8x8xf32>
    %cst_85 = arith.constant dense<0.000000e+00> : vector<8x128xf32>
    %203 = tpu.matmul %202, %185, %cst_85 {dimension_numbers = #tpu.dot_dimension_numbers<[1], [0], [0], [1], [0, 0, 1, 1], [], []>} : vector<8x8xf32>, vector<8x128xf32>, vector<8x128xf32> -> vector<8x128xf32>
    %204 = vector.broadcast %19 : vector<1x128xf32> to vector<8x128xf32>
    %205 = arith.mulf %204, %203 : vector<8x128xf32>
    %206 = arith.addf %186, %205 : vector<8x128xf32>
    %207 = vector.broadcast %26 : vector<1x128xf32> to vector<8x128xf32>
    %208 = arith.mulf %183, %207 : vector<8x128xf32>
    %cst_86 = arith.constant dense<0.000000e+00> : vector<8x8xf32>
    %209 = tpu.matmul %208, %184, %cst_86 {dimension_numbers = #tpu.dot_dimension_numbers<[1], [1], [0], [0], [0, 0, 1, 0], [], []>} : vector<8x128xf32>, vector<8x128xf32>, vector<8x8xf32> -> vector<8x8xf32>
    %cst_87 = arith.constant 0.000000e+00 : f32
    %210 = vector.broadcast %cst_87 : f32 to vector<8x8xf32>
    %211 = arith.cmpf oeq, %7, %210 : vector<8x8xf32>
    %cst_88 = arith.constant -1.000000e+10 : f32
    %212 = vector.broadcast %cst_88 : f32 to vector<8x8xf32>
    %213 = arith.select %211, %212, %209 : vector<8x8xi1>, vector<8x8xf32>
    %cst_89 = arith.constant dense<0xFF800000> : vector<8xf32>
    %214 = vector.multi_reduction <maximumf>, %213, %cst_89 [1] : vector<8x8xf32> to vector<8xf32>
    %215 = vector.shape_cast %214 : vector<8xf32> to vector<8x1xf32>
    %216 = vector.broadcast %215 : vector<8x1xf32> to vector<8x8xf32>
    %217 = arith.subf %213, %216 : vector<8x8xf32>
    %218 = math.exp %217 : vector<8x8xf32>
    %cst_90 = arith.constant dense<0.000000e+00> : vector<8xf32>
    %219 = vector.multi_reduction <add>, %218, %cst_90 [1] : vector<8x8xf32> to vector<8xf32>
    %220 = vector.shape_cast %219 : vector<8xf32> to vector<8x1xf32>
    %221 = vector.broadcast %220 : vector<8x1xf32> to vector<8x8xf32>
    %222 = arith.divf %218, %221 : vector<8x8xf32>
    %cst_91 = arith.constant dense<0.000000e+00> : vector<8x128xf32>
    %223 = tpu.matmul %222, %185, %cst_91 {dimension_numbers = #tpu.dot_dimension_numbers<[1], [0], [0], [1], [0, 0, 1, 1], [], []>} : vector<8x8xf32>, vector<8x128xf32>, vector<8x128xf32> -> vector<8x128xf32>
    %224 = vector.broadcast %26 : vector<1x128xf32> to vector<8x128xf32>
    %225 = arith.mulf %224, %223 : vector<8x128xf32>
    %226 = arith.addf %206, %225 : vector<8x128xf32>
    %227 = vector.broadcast %33 : vector<1x128xf32> to vector<8x128xf32>
    %228 = arith.mulf %183, %227 : vector<8x128xf32>
    %cst_92 = arith.constant dense<0.000000e+00> : vector<8x8xf32>
    %229 = tpu.matmul %228, %184, %cst_92 {dimension_numbers = #tpu.dot_dimension_numbers<[1], [1], [0], [0], [0, 0, 1, 0], [], []>} : vector<8x128xf32>, vector<8x128xf32>, vector<8x8xf32> -> vector<8x8xf32>
    %cst_93 = arith.constant 0.000000e+00 : f32
    %230 = vector.broadcast %cst_93 : f32 to vector<8x8xf32>
    %231 = arith.cmpf oeq, %7, %230 : vector<8x8xf32>
    %cst_94 = arith.constant -1.000000e+10 : f32
    %232 = vector.broadcast %cst_94 : f32 to vector<8x8xf32>
    %233 = arith.select %231, %232, %229 : vector<8x8xi1>, vector<8x8xf32>
    %cst_95 = arith.constant dense<0xFF800000> : vector<8xf32>
    %234 = vector.multi_reduction <maximumf>, %233, %cst_95 [1] : vector<8x8xf32> to vector<8xf32>
    %235 = vector.shape_cast %234 : vector<8xf32> to vector<8x1xf32>
    %236 = vector.broadcast %235 : vector<8x1xf32> to vector<8x8xf32>
    %237 = arith.subf %233, %236 : vector<8x8xf32>
    %238 = math.exp %237 : vector<8x8xf32>
    %cst_96 = arith.constant dense<0.000000e+00> : vector<8xf32>
    %239 = vector.multi_reduction <add>, %238, %cst_96 [1] : vector<8x8xf32> to vector<8xf32>
    %240 = vector.shape_cast %239 : vector<8xf32> to vector<8x1xf32>
    %241 = vector.broadcast %240 : vector<8x1xf32> to vector<8x8xf32>
    %242 = arith.divf %238, %241 : vector<8x8xf32>
    %cst_97 = arith.constant dense<0.000000e+00> : vector<8x128xf32>
    %243 = tpu.matmul %242, %185, %cst_97 {dimension_numbers = #tpu.dot_dimension_numbers<[1], [0], [0], [1], [0, 0, 1, 1], [], []>} : vector<8x8xf32>, vector<8x128xf32>, vector<8x128xf32> -> vector<8x128xf32>
    %244 = vector.broadcast %33 : vector<1x128xf32> to vector<8x128xf32>
    %245 = arith.mulf %244, %243 : vector<8x128xf32>
    %246 = arith.addf %226, %245 : vector<8x128xf32>
    %247 = vector.broadcast %40 : vector<1x128xf32> to vector<8x128xf32>
    %248 = arith.mulf %183, %247 : vector<8x128xf32>
    %cst_98 = arith.constant dense<0.000000e+00> : vector<8x8xf32>
    %249 = tpu.matmul %248, %184, %cst_98 {dimension_numbers = #tpu.dot_dimension_numbers<[1], [1], [0], [0], [0, 0, 1, 0], [], []>} : vector<8x128xf32>, vector<8x128xf32>, vector<8x8xf32> -> vector<8x8xf32>
    %cst_99 = arith.constant 0.000000e+00 : f32
    %250 = vector.broadcast %cst_99 : f32 to vector<8x8xf32>
    %251 = arith.cmpf oeq, %7, %250 : vector<8x8xf32>
    %cst_100 = arith.constant -1.000000e+10 : f32
    %252 = vector.broadcast %cst_100 : f32 to vector<8x8xf32>
    %253 = arith.select %251, %252, %249 : vector<8x8xi1>, vector<8x8xf32>
    %cst_101 = arith.constant dense<0xFF800000> : vector<8xf32>
    %254 = vector.multi_reduction <maximumf>, %253, %cst_101 [1] : vector<8x8xf32> to vector<8xf32>
    %255 = vector.shape_cast %254 : vector<8xf32> to vector<8x1xf32>
    %256 = vector.broadcast %255 : vector<8x1xf32> to vector<8x8xf32>
    %257 = arith.subf %253, %256 : vector<8x8xf32>
    %258 = math.exp %257 : vector<8x8xf32>
    %cst_102 = arith.constant dense<0.000000e+00> : vector<8xf32>
    %259 = vector.multi_reduction <add>, %258, %cst_102 [1] : vector<8x8xf32> to vector<8xf32>
    %260 = vector.shape_cast %259 : vector<8xf32> to vector<8x1xf32>
    %261 = vector.broadcast %260 : vector<8x1xf32> to vector<8x8xf32>
    %262 = arith.divf %258, %261 : vector<8x8xf32>
    %cst_103 = arith.constant dense<0.000000e+00> : vector<8x128xf32>
    %263 = tpu.matmul %262, %185, %cst_103 {dimension_numbers = #tpu.dot_dimension_numbers<[1], [0], [0], [1], [0, 0, 1, 1], [], []>} : vector<8x8xf32>, vector<8x128xf32>, vector<8x128xf32> -> vector<8x128xf32>
    %264 = vector.broadcast %40 : vector<1x128xf32> to vector<8x128xf32>
    %265 = arith.mulf %264, %263 : vector<8x128xf32>
    %266 = arith.addf %246, %265 : vector<8x128xf32>
    %cst_104 = arith.constant dense<0.000000e+00> : vector<8x128xf32>
    %267 = tpu.matmul %266, %174, %cst_104 {dimension_numbers = #tpu.dot_dimension_numbers<[1], [0], [0], [1], [0, 0, 1, 1], [], []>} : vector<8x128xf32>, vector<128x128xf32>, vector<8x128xf32> -> vector<8x128xf32>
    %268 = vector.broadcast %176 : vector<1x128xf32> to vector<8x128xf32>
    %269 = arith.addf %267, %268 : vector<8x128xf32>
    %270 = arith.addf %168, %269 : vector<8x128xf32>
    %c1 = arith.constant 1 : index
    %c0_105 = arith.constant 0 : index
    %c0_106 = arith.constant 0 : index
    %271 = vector.load %arg17[%c1, %c0_105, %c0_106] : memref<6x1x128xf32, #tpu.memory_space<vmem>>, vector<1x1x128xf32>
    %272 = vector.shape_cast %271 : vector<1x1x128xf32> to vector<1x128xf32>
    %c1_107 = arith.constant 1 : index
    %c0_108 = arith.constant 0 : index
    %c0_109 = arith.constant 0 : index
    %273 = vector.load %arg18[%c1_107, %c0_108, %c0_109] : memref<6x1x128xf32, #tpu.memory_space<vmem>>, vector<1x1x128xf32>
    %274 = vector.shape_cast %273 : vector<1x1x128xf32> to vector<1x128xf32>
    %cst_110 = arith.constant dense<0.000000e+00> : vector<8xf32>
    %275 = vector.multi_reduction <add>, %270, %cst_110 [1] : vector<8x128xf32> to vector<8xf32>
    %276 = vector.shape_cast %275 : vector<8xf32> to vector<8x1xf32>
    %cst_111 = arith.constant 6.250000e-02 : f32
    %277 = vector.broadcast %cst_111 : f32 to vector<8x1xf32>
    %278 = arith.mulf %276, %277 : vector<8x1xf32>
    %279 = vector.broadcast %278 : vector<8x1xf32> to vector<8x128xf32>
    %280 = arith.subf %270, %279 : vector<8x128xf32>
    %281 = vector.broadcast %12 : vector<1x128xf32> to vector<8x128xf32>
    %282 = arith.mulf %280, %281 : vector<8x128xf32>
    %283 = arith.mulf %282, %282 : vector<8x128xf32>
    %cst_112 = arith.constant dense<0.000000e+00> : vector<8xf32>
    %284 = vector.multi_reduction <add>, %283, %cst_112 [1] : vector<8x128xf32> to vector<8xf32>
    %285 = vector.shape_cast %284 : vector<8xf32> to vector<8x1xf32>
    %cst_113 = arith.constant 6.250000e-02 : f32
    %286 = vector.broadcast %cst_113 : f32 to vector<8x1xf32>
    %287 = arith.mulf %285, %286 : vector<8x1xf32>
    %cst_114 = arith.constant 9.99999974E-6 : f32
    %288 = vector.broadcast %cst_114 : f32 to vector<8x1xf32>
    %289 = arith.addf %287, %288 : vector<8x1xf32>
    %290 = math.rsqrt %289 : vector<8x1xf32>
    %291 = vector.broadcast %290 : vector<8x1xf32> to vector<8x128xf32>
    %292 = arith.mulf %282, %291 : vector<8x128xf32>
    %293 = vector.broadcast %272 : vector<1x128xf32> to vector<8x128xf32>
    %294 = arith.mulf %292, %293 : vector<8x128xf32>
    %295 = vector.broadcast %274 : vector<1x128xf32> to vector<8x128xf32>
    %296 = arith.addf %294, %295 : vector<8x128xf32>
    %c0_115 = arith.constant 0 : index
    %c0_116 = arith.constant 0 : index
    %c0_117 = arith.constant 0 : index
    %297 = vector.load %arg13[%c0_115, %c0_116, %c0_117] : memref<2x128x128xf32, #tpu.memory_space<vmem>>, vector<1x128x128xf32>
    %298 = vector.shape_cast %297 : vector<1x128x128xf32> to vector<128x128xf32>
    %cst_118 = arith.constant dense<0.000000e+00> : vector<8x128xf32>
    %299 = tpu.matmul %296, %298, %cst_118 {dimension_numbers = #tpu.dot_dimension_numbers<[1], [0], [0], [1], [0, 0, 1, 1], [], []>} : vector<8x128xf32>, vector<128x128xf32>, vector<8x128xf32> -> vector<8x128xf32>
    %c0_119 = arith.constant 0 : index
    %c0_120 = arith.constant 0 : index
    %c0_121 = arith.constant 0 : index
    %300 = vector.load %arg14[%c0_119, %c0_120, %c0_121] : memref<2x1x128xf32, #tpu.memory_space<vmem>>, vector<1x1x128xf32>
    %301 = vector.shape_cast %300 : vector<1x1x128xf32> to vector<1x128xf32>
    %302 = vector.broadcast %301 : vector<1x128xf32> to vector<8x128xf32>
    %303 = arith.addf %299, %302 : vector<8x128xf32>
    %cst_122 = arith.constant 0.000000e+00 : f32
    %304 = vector.broadcast %cst_122 : f32 to vector<8x128xf32>
    %305 = arith.maximumf %303, %304 : vector<8x128xf32>
    %c0_123 = arith.constant 0 : index
    %c0_124 = arith.constant 0 : index
    %c0_125 = arith.constant 0 : index
    %306 = vector.load %arg15[%c0_123, %c0_124, %c0_125] : memref<2x128x128xf32, #tpu.memory_space<vmem>>, vector<1x128x128xf32>
    %307 = vector.shape_cast %306 : vector<1x128x128xf32> to vector<128x128xf32>
    %cst_126 = arith.constant dense<0.000000e+00> : vector<8x128xf32>
    %308 = tpu.matmul %305, %307, %cst_126 {dimension_numbers = #tpu.dot_dimension_numbers<[1], [0], [0], [1], [0, 0, 1, 1], [], []>} : vector<8x128xf32>, vector<128x128xf32>, vector<8x128xf32> -> vector<8x128xf32>
    %c0_127 = arith.constant 0 : index
    %c0_128 = arith.constant 0 : index
    %c0_129 = arith.constant 0 : index
    %309 = vector.load %arg16[%c0_127, %c0_128, %c0_129] : memref<2x1x128xf32, #tpu.memory_space<vmem>>, vector<1x1x128xf32>
    %310 = vector.shape_cast %309 : vector<1x1x128xf32> to vector<1x128xf32>
    %311 = vector.broadcast %310 : vector<1x128xf32> to vector<8x128xf32>
    %312 = arith.addf %308, %311 : vector<8x128xf32>
    %313 = arith.addf %296, %312 : vector<8x128xf32>
    %c2 = arith.constant 2 : index
    %c0_130 = arith.constant 0 : index
    %c0_131 = arith.constant 0 : index
    %314 = vector.load %arg17[%c2, %c0_130, %c0_131] : memref<6x1x128xf32, #tpu.memory_space<vmem>>, vector<1x1x128xf32>
    %315 = vector.shape_cast %314 : vector<1x1x128xf32> to vector<1x128xf32>
    %c2_132 = arith.constant 2 : index
    %c0_133 = arith.constant 0 : index
    %c0_134 = arith.constant 0 : index
    %316 = vector.load %arg18[%c2_132, %c0_133, %c0_134] : memref<6x1x128xf32, #tpu.memory_space<vmem>>, vector<1x1x128xf32>
    %317 = vector.shape_cast %316 : vector<1x1x128xf32> to vector<1x128xf32>
    %cst_135 = arith.constant dense<0.000000e+00> : vector<8xf32>
    %318 = vector.multi_reduction <add>, %313, %cst_135 [1] : vector<8x128xf32> to vector<8xf32>
    %319 = vector.shape_cast %318 : vector<8xf32> to vector<8x1xf32>
    %cst_136 = arith.constant 6.250000e-02 : f32
    %320 = vector.broadcast %cst_136 : f32 to vector<8x1xf32>
    %321 = arith.mulf %319, %320 : vector<8x1xf32>
    %322 = vector.broadcast %321 : vector<8x1xf32> to vector<8x128xf32>
    %323 = arith.subf %313, %322 : vector<8x128xf32>
    %324 = vector.broadcast %12 : vector<1x128xf32> to vector<8x128xf32>
    %325 = arith.mulf %323, %324 : vector<8x128xf32>
    %326 = arith.mulf %325, %325 : vector<8x128xf32>
    %cst_137 = arith.constant dense<0.000000e+00> : vector<8xf32>
    %327 = vector.multi_reduction <add>, %326, %cst_137 [1] : vector<8x128xf32> to vector<8xf32>
    %328 = vector.shape_cast %327 : vector<8xf32> to vector<8x1xf32>
    %cst_138 = arith.constant 6.250000e-02 : f32
    %329 = vector.broadcast %cst_138 : f32 to vector<8x1xf32>
    %330 = arith.mulf %328, %329 : vector<8x1xf32>
    %cst_139 = arith.constant 9.99999974E-6 : f32
    %331 = vector.broadcast %cst_139 : f32 to vector<8x1xf32>
    %332 = arith.addf %330, %331 : vector<8x1xf32>
    %333 = math.rsqrt %332 : vector<8x1xf32>
    %334 = vector.broadcast %333 : vector<8x1xf32> to vector<8x128xf32>
    %335 = arith.mulf %325, %334 : vector<8x128xf32>
    %336 = vector.broadcast %315 : vector<1x128xf32> to vector<8x128xf32>
    %337 = arith.mulf %335, %336 : vector<8x128xf32>
    %338 = vector.broadcast %317 : vector<1x128xf32> to vector<8x128xf32>
    %339 = arith.addf %337, %338 : vector<8x128xf32>
    %c1_140 = arith.constant 1 : index
    %c0_141 = arith.constant 0 : index
    %c0_142 = arith.constant 0 : index
    %340 = vector.load %arg5[%c1_140, %c0_141, %c0_142] : memref<2x128x384xf32, #tpu.memory_space<vmem>>, vector<1x128x384xf32>
    %341 = vector.shape_cast %340 : vector<1x128x384xf32> to vector<128x384xf32>
    %c1_143 = arith.constant 1 : index
    %c0_144 = arith.constant 0 : index
    %c0_145 = arith.constant 0 : index
    %342 = vector.load %arg6[%c1_143, %c0_144, %c0_145] : memref<2x1x384xf32, #tpu.memory_space<vmem>>, vector<1x1x384xf32>
    %343 = vector.shape_cast %342 : vector<1x1x384xf32> to vector<1x384xf32>
    %c1_146 = arith.constant 1 : index
    %c0_147 = arith.constant 0 : index
    %c0_148 = arith.constant 0 : index
    %344 = vector.load %arg7[%c1_146, %c0_147, %c0_148] : memref<2x128x128xf32, #tpu.memory_space<vmem>>, vector<1x128x128xf32>
    %345 = vector.shape_cast %344 : vector<1x128x128xf32> to vector<128x128xf32>
    %c1_149 = arith.constant 1 : index
    %c0_150 = arith.constant 0 : index
    %c0_151 = arith.constant 0 : index
    %346 = vector.load %arg8[%c1_149, %c0_150, %c0_151] : memref<2x1x128xf32, #tpu.memory_space<vmem>>, vector<1x1x128xf32>
    %347 = vector.shape_cast %346 : vector<1x1x128xf32> to vector<1x128xf32>
    %cst_152 = arith.constant dense<0.000000e+00> : vector<8x384xf32>
    %348 = tpu.matmul %339, %341, %cst_152 {dimension_numbers = #tpu.dot_dimension_numbers<[1], [0], [0], [1], [0, 0, 1, 1], [], []>} : vector<8x128xf32>, vector<128x384xf32>, vector<8x384xf32> -> vector<8x384xf32>
    %349 = vector.broadcast %343 : vector<1x384xf32> to vector<8x384xf32>
    %350 = arith.addf %348, %349 : vector<8x384xf32>
    %cst_153 = arith.constant dense<0.000000e+00> : vector<8x384xf32>
    %351 = tpu.matmul %339, %341, %cst_153 {dimension_numbers = #tpu.dot_dimension_numbers<[1], [0], [0], [1], [0, 0, 1, 1], [], []>} : vector<8x128xf32>, vector<128x384xf32>, vector<8x384xf32> -> vector<8x384xf32>
    %352 = vector.broadcast %343 : vector<1x384xf32> to vector<8x384xf32>
    %353 = arith.addf %351, %352 : vector<8x384xf32>
    %354 = vector.extract_strided_slice %350 {offsets = [0, 0], sizes = [8, 128], strides = [1, 1]} : vector<8x384xf32> to vector<8x128xf32>
    %355 = vector.extract_strided_slice %353 {offsets = [0, 128], sizes = [8, 128], strides = [1, 1]} : vector<8x384xf32> to vector<8x128xf32>
    %356 = vector.extract_strided_slice %353 {offsets = [0, 256], sizes = [8, 128], strides = [1, 1]} : vector<8x384xf32> to vector<8x128xf32>
    %cst_154 = arith.constant 0.000000e+00 : f32
    %357 = vector.broadcast %cst_154 : f32 to vector<8x128xf32>
    %358 = vector.broadcast %19 : vector<1x128xf32> to vector<8x128xf32>
    %359 = arith.mulf %354, %358 : vector<8x128xf32>
    %cst_155 = arith.constant dense<0.000000e+00> : vector<8x8xf32>
    %360 = tpu.matmul %359, %355, %cst_155 {dimension_numbers = #tpu.dot_dimension_numbers<[1], [1], [0], [0], [0, 0, 1, 0], [], []>} : vector<8x128xf32>, vector<8x128xf32>, vector<8x8xf32> -> vector<8x8xf32>
    %cst_156 = arith.constant 0.000000e+00 : f32
    %361 = vector.broadcast %cst_156 : f32 to vector<8x8xf32>
    %362 = arith.cmpf oeq, %5, %361 : vector<8x8xf32>
    %cst_157 = arith.constant -1.000000e+10 : f32
    %363 = vector.broadcast %cst_157 : f32 to vector<8x8xf32>
    %364 = arith.select %362, %363, %360 : vector<8x8xi1>, vector<8x8xf32>
    %cst_158 = arith.constant dense<0xFF800000> : vector<8xf32>
    %365 = vector.multi_reduction <maximumf>, %364, %cst_158 [1] : vector<8x8xf32> to vector<8xf32>
    %366 = vector.shape_cast %365 : vector<8xf32> to vector<8x1xf32>
    %367 = vector.broadcast %366 : vector<8x1xf32> to vector<8x8xf32>
    %368 = arith.subf %364, %367 : vector<8x8xf32>
    %369 = math.exp %368 : vector<8x8xf32>
    %cst_159 = arith.constant dense<0.000000e+00> : vector<8xf32>
    %370 = vector.multi_reduction <add>, %369, %cst_159 [1] : vector<8x8xf32> to vector<8xf32>
    %371 = vector.shape_cast %370 : vector<8xf32> to vector<8x1xf32>
    %372 = vector.broadcast %371 : vector<8x1xf32> to vector<8x8xf32>
    %373 = arith.divf %369, %372 : vector<8x8xf32>
    %cst_160 = arith.constant dense<0.000000e+00> : vector<8x128xf32>
    %374 = tpu.matmul %373, %356, %cst_160 {dimension_numbers = #tpu.dot_dimension_numbers<[1], [0], [0], [1], [0, 0, 1, 1], [], []>} : vector<8x8xf32>, vector<8x128xf32>, vector<8x128xf32> -> vector<8x128xf32>
    %375 = vector.broadcast %19 : vector<1x128xf32> to vector<8x128xf32>
    %376 = arith.mulf %375, %374 : vector<8x128xf32>
    %377 = arith.addf %357, %376 : vector<8x128xf32>
    %378 = vector.broadcast %26 : vector<1x128xf32> to vector<8x128xf32>
    %379 = arith.mulf %354, %378 : vector<8x128xf32>
    %cst_161 = arith.constant dense<0.000000e+00> : vector<8x8xf32>
    %380 = tpu.matmul %379, %355, %cst_161 {dimension_numbers = #tpu.dot_dimension_numbers<[1], [1], [0], [0], [0, 0, 1, 0], [], []>} : vector<8x128xf32>, vector<8x128xf32>, vector<8x8xf32> -> vector<8x8xf32>
    %cst_162 = arith.constant 0.000000e+00 : f32
    %381 = vector.broadcast %cst_162 : f32 to vector<8x8xf32>
    %382 = arith.cmpf oeq, %5, %381 : vector<8x8xf32>
    %cst_163 = arith.constant -1.000000e+10 : f32
    %383 = vector.broadcast %cst_163 : f32 to vector<8x8xf32>
    %384 = arith.select %382, %383, %380 : vector<8x8xi1>, vector<8x8xf32>
    %cst_164 = arith.constant dense<0xFF800000> : vector<8xf32>
    %385 = vector.multi_reduction <maximumf>, %384, %cst_164 [1] : vector<8x8xf32> to vector<8xf32>
    %386 = vector.shape_cast %385 : vector<8xf32> to vector<8x1xf32>
    %387 = vector.broadcast %386 : vector<8x1xf32> to vector<8x8xf32>
    %388 = arith.subf %384, %387 : vector<8x8xf32>
    %389 = math.exp %388 : vector<8x8xf32>
    %cst_165 = arith.constant dense<0.000000e+00> : vector<8xf32>
    %390 = vector.multi_reduction <add>, %389, %cst_165 [1] : vector<8x8xf32> to vector<8xf32>
    %391 = vector.shape_cast %390 : vector<8xf32> to vector<8x1xf32>
    %392 = vector.broadcast %391 : vector<8x1xf32> to vector<8x8xf32>
    %393 = arith.divf %389, %392 : vector<8x8xf32>
    %cst_166 = arith.constant dense<0.000000e+00> : vector<8x128xf32>
    %394 = tpu.matmul %393, %356, %cst_166 {dimension_numbers = #tpu.dot_dimension_numbers<[1], [0], [0], [1], [0, 0, 1, 1], [], []>} : vector<8x8xf32>, vector<8x128xf32>, vector<8x128xf32> -> vector<8x128xf32>
    %395 = vector.broadcast %26 : vector<1x128xf32> to vector<8x128xf32>
    %396 = arith.mulf %395, %394 : vector<8x128xf32>
    %397 = arith.addf %377, %396 : vector<8x128xf32>
    %398 = vector.broadcast %33 : vector<1x128xf32> to vector<8x128xf32>
    %399 = arith.mulf %354, %398 : vector<8x128xf32>
    %cst_167 = arith.constant dense<0.000000e+00> : vector<8x8xf32>
    %400 = tpu.matmul %399, %355, %cst_167 {dimension_numbers = #tpu.dot_dimension_numbers<[1], [1], [0], [0], [0, 0, 1, 0], [], []>} : vector<8x128xf32>, vector<8x128xf32>, vector<8x8xf32> -> vector<8x8xf32>
    %cst_168 = arith.constant 0.000000e+00 : f32
    %401 = vector.broadcast %cst_168 : f32 to vector<8x8xf32>
    %402 = arith.cmpf oeq, %5, %401 : vector<8x8xf32>
    %cst_169 = arith.constant -1.000000e+10 : f32
    %403 = vector.broadcast %cst_169 : f32 to vector<8x8xf32>
    %404 = arith.select %402, %403, %400 : vector<8x8xi1>, vector<8x8xf32>
    %cst_170 = arith.constant dense<0xFF800000> : vector<8xf32>
    %405 = vector.multi_reduction <maximumf>, %404, %cst_170 [1] : vector<8x8xf32> to vector<8xf32>
    %406 = vector.shape_cast %405 : vector<8xf32> to vector<8x1xf32>
    %407 = vector.broadcast %406 : vector<8x1xf32> to vector<8x8xf32>
    %408 = arith.subf %404, %407 : vector<8x8xf32>
    %409 = math.exp %408 : vector<8x8xf32>
    %cst_171 = arith.constant dense<0.000000e+00> : vector<8xf32>
    %410 = vector.multi_reduction <add>, %409, %cst_171 [1] : vector<8x8xf32> to vector<8xf32>
    %411 = vector.shape_cast %410 : vector<8xf32> to vector<8x1xf32>
    %412 = vector.broadcast %411 : vector<8x1xf32> to vector<8x8xf32>
    %413 = arith.divf %409, %412 : vector<8x8xf32>
    %cst_172 = arith.constant dense<0.000000e+00> : vector<8x128xf32>
    %414 = tpu.matmul %413, %356, %cst_172 {dimension_numbers = #tpu.dot_dimension_numbers<[1], [0], [0], [1], [0, 0, 1, 1], [], []>} : vector<8x8xf32>, vector<8x128xf32>, vector<8x128xf32> -> vector<8x128xf32>
    %415 = vector.broadcast %33 : vector<1x128xf32> to vector<8x128xf32>
    %416 = arith.mulf %415, %414 : vector<8x128xf32>
    %417 = arith.addf %397, %416 : vector<8x128xf32>
    %418 = vector.broadcast %40 : vector<1x128xf32> to vector<8x128xf32>
    %419 = arith.mulf %354, %418 : vector<8x128xf32>
    %cst_173 = arith.constant dense<0.000000e+00> : vector<8x8xf32>
    %420 = tpu.matmul %419, %355, %cst_173 {dimension_numbers = #tpu.dot_dimension_numbers<[1], [1], [0], [0], [0, 0, 1, 0], [], []>} : vector<8x128xf32>, vector<8x128xf32>, vector<8x8xf32> -> vector<8x8xf32>
    %cst_174 = arith.constant 0.000000e+00 : f32
    %421 = vector.broadcast %cst_174 : f32 to vector<8x8xf32>
    %422 = arith.cmpf oeq, %5, %421 : vector<8x8xf32>
    %cst_175 = arith.constant -1.000000e+10 : f32
    %423 = vector.broadcast %cst_175 : f32 to vector<8x8xf32>
    %424 = arith.select %422, %423, %420 : vector<8x8xi1>, vector<8x8xf32>
    %cst_176 = arith.constant dense<0xFF800000> : vector<8xf32>
    %425 = vector.multi_reduction <maximumf>, %424, %cst_176 [1] : vector<8x8xf32> to vector<8xf32>
    %426 = vector.shape_cast %425 : vector<8xf32> to vector<8x1xf32>
    %427 = vector.broadcast %426 : vector<8x1xf32> to vector<8x8xf32>
    %428 = arith.subf %424, %427 : vector<8x8xf32>
    %429 = math.exp %428 : vector<8x8xf32>
    %cst_177 = arith.constant dense<0.000000e+00> : vector<8xf32>
    %430 = vector.multi_reduction <add>, %429, %cst_177 [1] : vector<8x8xf32> to vector<8xf32>
    %431 = vector.shape_cast %430 : vector<8xf32> to vector<8x1xf32>
    %432 = vector.broadcast %431 : vector<8x1xf32> to vector<8x8xf32>
    %433 = arith.divf %429, %432 : vector<8x8xf32>
    %cst_178 = arith.constant dense<0.000000e+00> : vector<8x128xf32>
    %434 = tpu.matmul %433, %356, %cst_178 {dimension_numbers = #tpu.dot_dimension_numbers<[1], [0], [0], [1], [0, 0, 1, 1], [], []>} : vector<8x8xf32>, vector<8x128xf32>, vector<8x128xf32> -> vector<8x128xf32>
    %435 = vector.broadcast %40 : vector<1x128xf32> to vector<8x128xf32>
    %436 = arith.mulf %435, %434 : vector<8x128xf32>
    %437 = arith.addf %417, %436 : vector<8x128xf32>
    %cst_179 = arith.constant dense<0.000000e+00> : vector<8x128xf32>
    %438 = tpu.matmul %437, %345, %cst_179 {dimension_numbers = #tpu.dot_dimension_numbers<[1], [0], [0], [1], [0, 0, 1, 1], [], []>} : vector<8x128xf32>, vector<128x128xf32>, vector<8x128xf32> -> vector<8x128xf32>
    %439 = vector.broadcast %347 : vector<1x128xf32> to vector<8x128xf32>
    %440 = arith.addf %438, %439 : vector<8x128xf32>
    %441 = arith.addf %339, %440 : vector<8x128xf32>
    %c3 = arith.constant 3 : index
    %c0_180 = arith.constant 0 : index
    %c0_181 = arith.constant 0 : index
    %442 = vector.load %arg17[%c3, %c0_180, %c0_181] : memref<6x1x128xf32, #tpu.memory_space<vmem>>, vector<1x1x128xf32>
    %443 = vector.shape_cast %442 : vector<1x1x128xf32> to vector<1x128xf32>
    %c3_182 = arith.constant 3 : index
    %c0_183 = arith.constant 0 : index
    %c0_184 = arith.constant 0 : index
    %444 = vector.load %arg18[%c3_182, %c0_183, %c0_184] : memref<6x1x128xf32, #tpu.memory_space<vmem>>, vector<1x1x128xf32>
    %445 = vector.shape_cast %444 : vector<1x1x128xf32> to vector<1x128xf32>
    %cst_185 = arith.constant dense<0.000000e+00> : vector<8xf32>
    %446 = vector.multi_reduction <add>, %441, %cst_185 [1] : vector<8x128xf32> to vector<8xf32>
    %447 = vector.shape_cast %446 : vector<8xf32> to vector<8x1xf32>
    %cst_186 = arith.constant 6.250000e-02 : f32
    %448 = vector.broadcast %cst_186 : f32 to vector<8x1xf32>
    %449 = arith.mulf %447, %448 : vector<8x1xf32>
    %450 = vector.broadcast %449 : vector<8x1xf32> to vector<8x128xf32>
    %451 = arith.subf %441, %450 : vector<8x128xf32>
    %452 = vector.broadcast %12 : vector<1x128xf32> to vector<8x128xf32>
    %453 = arith.mulf %451, %452 : vector<8x128xf32>
    %454 = arith.mulf %453, %453 : vector<8x128xf32>
    %cst_187 = arith.constant dense<0.000000e+00> : vector<8xf32>
    %455 = vector.multi_reduction <add>, %454, %cst_187 [1] : vector<8x128xf32> to vector<8xf32>
    %456 = vector.shape_cast %455 : vector<8xf32> to vector<8x1xf32>
    %cst_188 = arith.constant 6.250000e-02 : f32
    %457 = vector.broadcast %cst_188 : f32 to vector<8x1xf32>
    %458 = arith.mulf %456, %457 : vector<8x1xf32>
    %cst_189 = arith.constant 9.99999974E-6 : f32
    %459 = vector.broadcast %cst_189 : f32 to vector<8x1xf32>
    %460 = arith.addf %458, %459 : vector<8x1xf32>
    %461 = math.rsqrt %460 : vector<8x1xf32>
    %462 = vector.broadcast %461 : vector<8x1xf32> to vector<8x128xf32>
    %463 = arith.mulf %453, %462 : vector<8x128xf32>
    %464 = vector.broadcast %443 : vector<1x128xf32> to vector<8x128xf32>
    %465 = arith.mulf %463, %464 : vector<8x128xf32>
    %466 = vector.broadcast %445 : vector<1x128xf32> to vector<8x128xf32>
    %467 = arith.addf %465, %466 : vector<8x128xf32>
    %c1_190 = arith.constant 1 : index
    %c0_191 = arith.constant 0 : index
    %c0_192 = arith.constant 0 : index
    %468 = vector.load %arg9[%c1_190, %c0_191, %c0_192] : memref<2x128x384xf32, #tpu.memory_space<vmem>>, vector<1x128x384xf32>
    %469 = vector.shape_cast %468 : vector<1x128x384xf32> to vector<128x384xf32>
    %c1_193 = arith.constant 1 : index
    %c0_194 = arith.constant 0 : index
    %c0_195 = arith.constant 0 : index
    %470 = vector.load %arg10[%c1_193, %c0_194, %c0_195] : memref<2x1x384xf32, #tpu.memory_space<vmem>>, vector<1x1x384xf32>
    %471 = vector.shape_cast %470 : vector<1x1x384xf32> to vector<1x384xf32>
    %c1_196 = arith.constant 1 : index
    %c0_197 = arith.constant 0 : index
    %c0_198 = arith.constant 0 : index
    %472 = vector.load %arg11[%c1_196, %c0_197, %c0_198] : memref<2x128x128xf32, #tpu.memory_space<vmem>>, vector<1x128x128xf32>
    %473 = vector.shape_cast %472 : vector<1x128x128xf32> to vector<128x128xf32>
    %c1_199 = arith.constant 1 : index
    %c0_200 = arith.constant 0 : index
    %c0_201 = arith.constant 0 : index
    %474 = vector.load %arg12[%c1_199, %c0_200, %c0_201] : memref<2x1x128xf32, #tpu.memory_space<vmem>>, vector<1x1x128xf32>
    %475 = vector.shape_cast %474 : vector<1x1x128xf32> to vector<1x128xf32>
    %cst_202 = arith.constant dense<0.000000e+00> : vector<8x384xf32>
    %476 = tpu.matmul %467, %469, %cst_202 {dimension_numbers = #tpu.dot_dimension_numbers<[1], [0], [0], [1], [0, 0, 1, 1], [], []>} : vector<8x128xf32>, vector<128x384xf32>, vector<8x384xf32> -> vector<8x384xf32>
    %477 = vector.broadcast %471 : vector<1x384xf32> to vector<8x384xf32>
    %478 = arith.addf %476, %477 : vector<8x384xf32>
    %cst_203 = arith.constant dense<0.000000e+00> : vector<8x384xf32>
    %479 = tpu.matmul %3, %469, %cst_203 {dimension_numbers = #tpu.dot_dimension_numbers<[1], [0], [0], [1], [0, 0, 1, 1], [], []>} : vector<8x128xf32>, vector<128x384xf32>, vector<8x384xf32> -> vector<8x384xf32>
    %480 = vector.broadcast %471 : vector<1x384xf32> to vector<8x384xf32>
    %481 = arith.addf %479, %480 : vector<8x384xf32>
    %482 = vector.extract_strided_slice %478 {offsets = [0, 0], sizes = [8, 128], strides = [1, 1]} : vector<8x384xf32> to vector<8x128xf32>
    %483 = vector.extract_strided_slice %481 {offsets = [0, 128], sizes = [8, 128], strides = [1, 1]} : vector<8x384xf32> to vector<8x128xf32>
    %484 = vector.extract_strided_slice %481 {offsets = [0, 256], sizes = [8, 128], strides = [1, 1]} : vector<8x384xf32> to vector<8x128xf32>
    %cst_204 = arith.constant 0.000000e+00 : f32
    %485 = vector.broadcast %cst_204 : f32 to vector<8x128xf32>
    %486 = vector.broadcast %19 : vector<1x128xf32> to vector<8x128xf32>
    %487 = arith.mulf %482, %486 : vector<8x128xf32>
    %cst_205 = arith.constant dense<0.000000e+00> : vector<8x8xf32>
    %488 = tpu.matmul %487, %483, %cst_205 {dimension_numbers = #tpu.dot_dimension_numbers<[1], [1], [0], [0], [0, 0, 1, 0], [], []>} : vector<8x128xf32>, vector<8x128xf32>, vector<8x8xf32> -> vector<8x8xf32>
    %cst_206 = arith.constant 0.000000e+00 : f32
    %489 = vector.broadcast %cst_206 : f32 to vector<8x8xf32>
    %490 = arith.cmpf oeq, %7, %489 : vector<8x8xf32>
    %cst_207 = arith.constant -1.000000e+10 : f32
    %491 = vector.broadcast %cst_207 : f32 to vector<8x8xf32>
    %492 = arith.select %490, %491, %488 : vector<8x8xi1>, vector<8x8xf32>
    %cst_208 = arith.constant dense<0xFF800000> : vector<8xf32>
    %493 = vector.multi_reduction <maximumf>, %492, %cst_208 [1] : vector<8x8xf32> to vector<8xf32>
    %494 = vector.shape_cast %493 : vector<8xf32> to vector<8x1xf32>
    %495 = vector.broadcast %494 : vector<8x1xf32> to vector<8x8xf32>
    %496 = arith.subf %492, %495 : vector<8x8xf32>
    %497 = math.exp %496 : vector<8x8xf32>
    %cst_209 = arith.constant dense<0.000000e+00> : vector<8xf32>
    %498 = vector.multi_reduction <add>, %497, %cst_209 [1] : vector<8x8xf32> to vector<8xf32>
    %499 = vector.shape_cast %498 : vector<8xf32> to vector<8x1xf32>
    %500 = vector.broadcast %499 : vector<8x1xf32> to vector<8x8xf32>
    %501 = arith.divf %497, %500 : vector<8x8xf32>
    %cst_210 = arith.constant dense<0.000000e+00> : vector<8x128xf32>
    %502 = tpu.matmul %501, %484, %cst_210 {dimension_numbers = #tpu.dot_dimension_numbers<[1], [0], [0], [1], [0, 0, 1, 1], [], []>} : vector<8x8xf32>, vector<8x128xf32>, vector<8x128xf32> -> vector<8x128xf32>
    %503 = vector.broadcast %19 : vector<1x128xf32> to vector<8x128xf32>
    %504 = arith.mulf %503, %502 : vector<8x128xf32>
    %505 = arith.addf %485, %504 : vector<8x128xf32>
    %506 = vector.broadcast %26 : vector<1x128xf32> to vector<8x128xf32>
    %507 = arith.mulf %482, %506 : vector<8x128xf32>
    %cst_211 = arith.constant dense<0.000000e+00> : vector<8x8xf32>
    %508 = tpu.matmul %507, %483, %cst_211 {dimension_numbers = #tpu.dot_dimension_numbers<[1], [1], [0], [0], [0, 0, 1, 0], [], []>} : vector<8x128xf32>, vector<8x128xf32>, vector<8x8xf32> -> vector<8x8xf32>
    %cst_212 = arith.constant 0.000000e+00 : f32
    %509 = vector.broadcast %cst_212 : f32 to vector<8x8xf32>
    %510 = arith.cmpf oeq, %7, %509 : vector<8x8xf32>
    %cst_213 = arith.constant -1.000000e+10 : f32
    %511 = vector.broadcast %cst_213 : f32 to vector<8x8xf32>
    %512 = arith.select %510, %511, %508 : vector<8x8xi1>, vector<8x8xf32>
    %cst_214 = arith.constant dense<0xFF800000> : vector<8xf32>
    %513 = vector.multi_reduction <maximumf>, %512, %cst_214 [1] : vector<8x8xf32> to vector<8xf32>
    %514 = vector.shape_cast %513 : vector<8xf32> to vector<8x1xf32>
    %515 = vector.broadcast %514 : vector<8x1xf32> to vector<8x8xf32>
    %516 = arith.subf %512, %515 : vector<8x8xf32>
    %517 = math.exp %516 : vector<8x8xf32>
    %cst_215 = arith.constant dense<0.000000e+00> : vector<8xf32>
    %518 = vector.multi_reduction <add>, %517, %cst_215 [1] : vector<8x8xf32> to vector<8xf32>
    %519 = vector.shape_cast %518 : vector<8xf32> to vector<8x1xf32>
    %520 = vector.broadcast %519 : vector<8x1xf32> to vector<8x8xf32>
    %521 = arith.divf %517, %520 : vector<8x8xf32>
    %cst_216 = arith.constant dense<0.000000e+00> : vector<8x128xf32>
    %522 = tpu.matmul %521, %484, %cst_216 {dimension_numbers = #tpu.dot_dimension_numbers<[1], [0], [0], [1], [0, 0, 1, 1], [], []>} : vector<8x8xf32>, vector<8x128xf32>, vector<8x128xf32> -> vector<8x128xf32>
    %523 = vector.broadcast %26 : vector<1x128xf32> to vector<8x128xf32>
    %524 = arith.mulf %523, %522 : vector<8x128xf32>
    %525 = arith.addf %505, %524 : vector<8x128xf32>
    %526 = vector.broadcast %33 : vector<1x128xf32> to vector<8x128xf32>
    %527 = arith.mulf %482, %526 : vector<8x128xf32>
    %cst_217 = arith.constant dense<0.000000e+00> : vector<8x8xf32>
    %528 = tpu.matmul %527, %483, %cst_217 {dimension_numbers = #tpu.dot_dimension_numbers<[1], [1], [0], [0], [0, 0, 1, 0], [], []>} : vector<8x128xf32>, vector<8x128xf32>, vector<8x8xf32> -> vector<8x8xf32>
    %cst_218 = arith.constant 0.000000e+00 : f32
    %529 = vector.broadcast %cst_218 : f32 to vector<8x8xf32>
    %530 = arith.cmpf oeq, %7, %529 : vector<8x8xf32>
    %cst_219 = arith.constant -1.000000e+10 : f32
    %531 = vector.broadcast %cst_219 : f32 to vector<8x8xf32>
    %532 = arith.select %530, %531, %528 : vector<8x8xi1>, vector<8x8xf32>
    %cst_220 = arith.constant dense<0xFF800000> : vector<8xf32>
    %533 = vector.multi_reduction <maximumf>, %532, %cst_220 [1] : vector<8x8xf32> to vector<8xf32>
    %534 = vector.shape_cast %533 : vector<8xf32> to vector<8x1xf32>
    %535 = vector.broadcast %534 : vector<8x1xf32> to vector<8x8xf32>
    %536 = arith.subf %532, %535 : vector<8x8xf32>
    %537 = math.exp %536 : vector<8x8xf32>
    %cst_221 = arith.constant dense<0.000000e+00> : vector<8xf32>
    %538 = vector.multi_reduction <add>, %537, %cst_221 [1] : vector<8x8xf32> to vector<8xf32>
    %539 = vector.shape_cast %538 : vector<8xf32> to vector<8x1xf32>
    %540 = vector.broadcast %539 : vector<8x1xf32> to vector<8x8xf32>
    %541 = arith.divf %537, %540 : vector<8x8xf32>
    %cst_222 = arith.constant dense<0.000000e+00> : vector<8x128xf32>
    %542 = tpu.matmul %541, %484, %cst_222 {dimension_numbers = #tpu.dot_dimension_numbers<[1], [0], [0], [1], [0, 0, 1, 1], [], []>} : vector<8x8xf32>, vector<8x128xf32>, vector<8x128xf32> -> vector<8x128xf32>
    %543 = vector.broadcast %33 : vector<1x128xf32> to vector<8x128xf32>
    %544 = arith.mulf %543, %542 : vector<8x128xf32>
    %545 = arith.addf %525, %544 : vector<8x128xf32>
    %546 = vector.broadcast %40 : vector<1x128xf32> to vector<8x128xf32>
    %547 = arith.mulf %482, %546 : vector<8x128xf32>
    %cst_223 = arith.constant dense<0.000000e+00> : vector<8x8xf32>
    %548 = tpu.matmul %547, %483, %cst_223 {dimension_numbers = #tpu.dot_dimension_numbers<[1], [1], [0], [0], [0, 0, 1, 0], [], []>} : vector<8x128xf32>, vector<8x128xf32>, vector<8x8xf32> -> vector<8x8xf32>
    %cst_224 = arith.constant 0.000000e+00 : f32
    %549 = vector.broadcast %cst_224 : f32 to vector<8x8xf32>
    %550 = arith.cmpf oeq, %7, %549 : vector<8x8xf32>
    %cst_225 = arith.constant -1.000000e+10 : f32
    %551 = vector.broadcast %cst_225 : f32 to vector<8x8xf32>
    %552 = arith.select %550, %551, %548 : vector<8x8xi1>, vector<8x8xf32>
    %cst_226 = arith.constant dense<0xFF800000> : vector<8xf32>
    %553 = vector.multi_reduction <maximumf>, %552, %cst_226 [1] : vector<8x8xf32> to vector<8xf32>
    %554 = vector.shape_cast %553 : vector<8xf32> to vector<8x1xf32>
    %555 = vector.broadcast %554 : vector<8x1xf32> to vector<8x8xf32>
    %556 = arith.subf %552, %555 : vector<8x8xf32>
    %557 = math.exp %556 : vector<8x8xf32>
    %cst_227 = arith.constant dense<0.000000e+00> : vector<8xf32>
    %558 = vector.multi_reduction <add>, %557, %cst_227 [1] : vector<8x8xf32> to vector<8xf32>
    %559 = vector.shape_cast %558 : vector<8xf32> to vector<8x1xf32>
    %560 = vector.broadcast %559 : vector<8x1xf32> to vector<8x8xf32>
    %561 = arith.divf %557, %560 : vector<8x8xf32>
    %cst_228 = arith.constant dense<0.000000e+00> : vector<8x128xf32>
    %562 = tpu.matmul %561, %484, %cst_228 {dimension_numbers = #tpu.dot_dimension_numbers<[1], [0], [0], [1], [0, 0, 1, 1], [], []>} : vector<8x8xf32>, vector<8x128xf32>, vector<8x128xf32> -> vector<8x128xf32>
    %563 = vector.broadcast %40 : vector<1x128xf32> to vector<8x128xf32>
    %564 = arith.mulf %563, %562 : vector<8x128xf32>
    %565 = arith.addf %545, %564 : vector<8x128xf32>
    %cst_229 = arith.constant dense<0.000000e+00> : vector<8x128xf32>
    %566 = tpu.matmul %565, %473, %cst_229 {dimension_numbers = #tpu.dot_dimension_numbers<[1], [0], [0], [1], [0, 0, 1, 1], [], []>} : vector<8x128xf32>, vector<128x128xf32>, vector<8x128xf32> -> vector<8x128xf32>
    %567 = vector.broadcast %475 : vector<1x128xf32> to vector<8x128xf32>
    %568 = arith.addf %566, %567 : vector<8x128xf32>
    %c0_230 = arith.constant 0 : index
    %c0_231 = arith.constant 0 : index
    %c0_232 = arith.constant 0 : index
    %c0_233 = arith.constant 0 : index
    %569 = vector.load %arg22[%c0_230, %c0_231, %c0_232, %c0_233] : memref<1x4x8x8xf32, #tpu.memory_space<vmem>>, vector<1x1x8x8xf32>
    %570 = vector.shape_cast %569 : vector<1x1x8x8xf32> to vector<8x8xf32>
    %571 = vector.shape_cast %501 : vector<8x8xf32> to vector<1x1x8x8xf32>
    tpu.vector_store %arg22[%c0_230, %c0_231, %c0_232, %c0_233], %571 {strides = array<i32>} : memref<1x4x8x8xf32, #tpu.memory_space<vmem>>, vector<1x1x8x8xf32>,
    %c0_234 = arith.constant 0 : index
    %c1_235 = arith.constant 1 : index
    %c0_236 = arith.constant 0 : index
    %c0_237 = arith.constant 0 : index
    %572 = vector.load %arg22[%c0_234, %c1_235, %c0_236, %c0_237] : memref<1x4x8x8xf32, #tpu.memory_space<vmem>>, vector<1x1x8x8xf32>
    %573 = vector.shape_cast %572 : vector<1x1x8x8xf32> to vector<8x8xf32>
    %574 = vector.shape_cast %521 : vector<8x8xf32> to vector<1x1x8x8xf32>
    tpu.vector_store %arg22[%c0_234, %c1_235, %c0_236, %c0_237], %574 {strides = array<i32>} : memref<1x4x8x8xf32, #tpu.memory_space<vmem>>, vector<1x1x8x8xf32>,
    %c0_238 = arith.constant 0 : index
    %c2_239 = arith.constant 2 : index
    %c0_240 = arith.constant 0 : index
    %c0_241 = arith.constant 0 : index
    %575 = vector.load %arg22[%c0_238, %c2_239, %c0_240, %c0_241] : memref<1x4x8x8xf32, #tpu.memory_space<vmem>>, vector<1x1x8x8xf32>
    %576 = vector.shape_cast %575 : vector<1x1x8x8xf32> to vector<8x8xf32>
    %577 = vector.shape_cast %541 : vector<8x8xf32> to vector<1x1x8x8xf32>
    tpu.vector_store %arg22[%c0_238, %c2_239, %c0_240, %c0_241], %577 {strides = array<i32>} : memref<1x4x8x8xf32, #tpu.memory_space<vmem>>, vector<1x1x8x8xf32>,
    %c0_242 = arith.constant 0 : index
    %c3_243 = arith.constant 3 : index
    %c0_244 = arith.constant 0 : index
    %c0_245 = arith.constant 0 : index
    %578 = vector.load %arg22[%c0_242, %c3_243, %c0_244, %c0_245] : memref<1x4x8x8xf32, #tpu.memory_space<vmem>>, vector<1x1x8x8xf32>
    %579 = vector.shape_cast %578 : vector<1x1x8x8xf32> to vector<8x8xf32>
    %580 = vector.shape_cast %561 : vector<8x8xf32> to vector<1x1x8x8xf32>
    tpu.vector_store %arg22[%c0_242, %c3_243, %c0_244, %c0_245], %580 {strides = array<i32>} : memref<1x4x8x8xf32, #tpu.memory_space<vmem>>, vector<1x1x8x8xf32>,
    %581 = arith.addf %467, %568 : vector<8x128xf32>
    %c4 = arith.constant 4 : index
    %c0_246 = arith.constant 0 : index
    %c0_247 = arith.constant 0 : index
    %582 = vector.load %arg17[%c4, %c0_246, %c0_247] : memref<6x1x128xf32, #tpu.memory_space<vmem>>, vector<1x1x128xf32>
    %583 = vector.shape_cast %582 : vector<1x1x128xf32> to vector<1x128xf32>
    %c4_248 = arith.constant 4 : index
    %c0_249 = arith.constant 0 : index
    %c0_250 = arith.constant 0 : index
    %584 = vector.load %arg18[%c4_248, %c0_249, %c0_250] : memref<6x1x128xf32, #tpu.memory_space<vmem>>, vector<1x1x128xf32>
    %585 = vector.shape_cast %584 : vector<1x1x128xf32> to vector<1x128xf32>
    %cst_251 = arith.constant dense<0.000000e+00> : vector<8xf32>
    %586 = vector.multi_reduction <add>, %581, %cst_251 [1] : vector<8x128xf32> to vector<8xf32>
    %587 = vector.shape_cast %586 : vector<8xf32> to vector<8x1xf32>
    %cst_252 = arith.constant 6.250000e-02 : f32
    %588 = vector.broadcast %cst_252 : f32 to vector<8x1xf32>
    %589 = arith.mulf %587, %588 : vector<8x1xf32>
    %590 = vector.broadcast %589 : vector<8x1xf32> to vector<8x128xf32>
    %591 = arith.subf %581, %590 : vector<8x128xf32>
    %592 = vector.broadcast %12 : vector<1x128xf32> to vector<8x128xf32>
    %593 = arith.mulf %591, %592 : vector<8x128xf32>
    %594 = arith.mulf %593, %593 : vector<8x128xf32>
    %cst_253 = arith.constant dense<0.000000e+00> : vector<8xf32>
    %595 = vector.multi_reduction <add>, %594, %cst_253 [1] : vector<8x128xf32> to vector<8xf32>
    %596 = vector.shape_cast %595 : vector<8xf32> to vector<8x1xf32>
    %cst_254 = arith.constant 6.250000e-02 : f32
    %597 = vector.broadcast %cst_254 : f32 to vector<8x1xf32>
    %598 = arith.mulf %596, %597 : vector<8x1xf32>
    %cst_255 = arith.constant 9.99999974E-6 : f32
    %599 = vector.broadcast %cst_255 : f32 to vector<8x1xf32>
    %600 = arith.addf %598, %599 : vector<8x1xf32>
    %601 = math.rsqrt %600 : vector<8x1xf32>
    %602 = vector.broadcast %601 : vector<8x1xf32> to vector<8x128xf32>
    %603 = arith.mulf %593, %602 : vector<8x128xf32>
    %604 = vector.broadcast %583 : vector<1x128xf32> to vector<8x128xf32>
    %605 = arith.mulf %603, %604 : vector<8x128xf32>
    %606 = vector.broadcast %585 : vector<1x128xf32> to vector<8x128xf32>
    %607 = arith.addf %605, %606 : vector<8x128xf32>
    %c1_256 = arith.constant 1 : index
    %c0_257 = arith.constant 0 : index
    %c0_258 = arith.constant 0 : index
    %608 = vector.load %arg13[%c1_256, %c0_257, %c0_258] : memref<2x128x128xf32, #tpu.memory_space<vmem>>, vector<1x128x128xf32>
    %609 = vector.shape_cast %608 : vector<1x128x128xf32> to vector<128x128xf32>
    %cst_259 = arith.constant dense<0.000000e+00> : vector<8x128xf32>
    %610 = tpu.matmul %607, %609, %cst_259 {dimension_numbers = #tpu.dot_dimension_numbers<[1], [0], [0], [1], [0, 0, 1, 1], [], []>} : vector<8x128xf32>, vector<128x128xf32>, vector<8x128xf32> -> vector<8x128xf32>
    %c1_260 = arith.constant 1 : index
    %c0_261 = arith.constant 0 : index
    %c0_262 = arith.constant 0 : index
    %611 = vector.load %arg14[%c1_260, %c0_261, %c0_262] : memref<2x1x128xf32, #tpu.memory_space<vmem>>, vector<1x1x128xf32>
    %612 = vector.shape_cast %611 : vector<1x1x128xf32> to vector<1x128xf32>
    %613 = vector.broadcast %612 : vector<1x128xf32> to vector<8x128xf32>
    %614 = arith.addf %610, %613 : vector<8x128xf32>
    %cst_263 = arith.constant 0.000000e+00 : f32
    %615 = vector.broadcast %cst_263 : f32 to vector<8x128xf32>
    %616 = arith.maximumf %614, %615 : vector<8x128xf32>
    %c1_264 = arith.constant 1 : index
    %c0_265 = arith.constant 0 : index
    %c0_266 = arith.constant 0 : index
    %617 = vector.load %arg15[%c1_264, %c0_265, %c0_266] : memref<2x128x128xf32, #tpu.memory_space<vmem>>, vector<1x128x128xf32>
    %618 = vector.shape_cast %617 : vector<1x128x128xf32> to vector<128x128xf32>
    %cst_267 = arith.constant dense<0.000000e+00> : vector<8x128xf32>
    %619 = tpu.matmul %616, %618, %cst_267 {dimension_numbers = #tpu.dot_dimension_numbers<[1], [0], [0], [1], [0, 0, 1, 1], [], []>} : vector<8x128xf32>, vector<128x128xf32>, vector<8x128xf32> -> vector<8x128xf32>
    %c1_268 = arith.constant 1 : index
    %c0_269 = arith.constant 0 : index
    %c0_270 = arith.constant 0 : index
    %620 = vector.load %arg16[%c1_268, %c0_269, %c0_270] : memref<2x1x128xf32, #tpu.memory_space<vmem>>, vector<1x1x128xf32>
    %621 = vector.shape_cast %620 : vector<1x1x128xf32> to vector<1x128xf32>
    %622 = vector.broadcast %621 : vector<1x128xf32> to vector<8x128xf32>
    %623 = arith.addf %619, %622 : vector<8x128xf32>
    %624 = arith.addf %607, %623 : vector<8x128xf32>
    %c5 = arith.constant 5 : index
    %c0_271 = arith.constant 0 : index
    %c0_272 = arith.constant 0 : index
    %625 = vector.load %arg17[%c5, %c0_271, %c0_272] : memref<6x1x128xf32, #tpu.memory_space<vmem>>, vector<1x1x128xf32>
    %626 = vector.shape_cast %625 : vector<1x1x128xf32> to vector<1x128xf32>
    %c5_273 = arith.constant 5 : index
    %c0_274 = arith.constant 0 : index
    %c0_275 = arith.constant 0 : index
    %627 = vector.load %arg18[%c5_273, %c0_274, %c0_275] : memref<6x1x128xf32, #tpu.memory_space<vmem>>, vector<1x1x128xf32>
    %628 = vector.shape_cast %627 : vector<1x1x128xf32> to vector<1x128xf32>
    %cst_276 = arith.constant dense<0.000000e+00> : vector<8xf32>
    %629 = vector.multi_reduction <add>, %624, %cst_276 [1] : vector<8x128xf32> to vector<8xf32>
    %630 = vector.shape_cast %629 : vector<8xf32> to vector<8x1xf32>
    %cst_277 = arith.constant 6.250000e-02 : f32
    %631 = vector.broadcast %cst_277 : f32 to vector<8x1xf32>
    %632 = arith.mulf %630, %631 : vector<8x1xf32>
    %633 = vector.broadcast %632 : vector<8x1xf32> to vector<8x128xf32>
    %634 = arith.subf %624, %633 : vector<8x128xf32>
    %635 = vector.broadcast %12 : vector<1x128xf32> to vector<8x128xf32>
    %636 = arith.mulf %634, %635 : vector<8x128xf32>
    %637 = arith.mulf %636, %636 : vector<8x128xf32>
    %cst_278 = arith.constant dense<0.000000e+00> : vector<8xf32>
    %638 = vector.multi_reduction <add>, %637, %cst_278 [1] : vector<8x128xf32> to vector<8xf32>
    %639 = vector.shape_cast %638 : vector<8xf32> to vector<8x1xf32>
    %cst_279 = arith.constant 6.250000e-02 : f32
    %640 = vector.broadcast %cst_279 : f32 to vector<8x1xf32>
    %641 = arith.mulf %639, %640 : vector<8x1xf32>
    %cst_280 = arith.constant 9.99999974E-6 : f32
    %642 = vector.broadcast %cst_280 : f32 to vector<8x1xf32>
    %643 = arith.addf %641, %642 : vector<8x1xf32>
    %644 = math.rsqrt %643 : vector<8x1xf32>
    %645 = vector.broadcast %644 : vector<8x1xf32> to vector<8x128xf32>
    %646 = arith.mulf %636, %645 : vector<8x128xf32>
    %647 = vector.broadcast %626 : vector<1x128xf32> to vector<8x128xf32>
    %648 = arith.mulf %646, %647 : vector<8x128xf32>
    %649 = vector.broadcast %628 : vector<1x128xf32> to vector<8x128xf32>
    %650 = arith.addf %648, %649 : vector<8x128xf32>
    %c0_281 = arith.constant 0 : index
    %c0_282 = arith.constant 0 : index
    %651 = vector.load %arg19[%c0_281, %c0_282] : memref<128x128xf32, #tpu.memory_space<vmem>>, vector<128x128xf32>
    %cst_283 = arith.constant dense<0.000000e+00> : vector<8x128xf32>
    %652 = tpu.matmul %650, %651, %cst_283 {dimension_numbers = #tpu.dot_dimension_numbers<[1], [0], [0], [1], [0, 0, 1, 1], [], []>} : vector<8x128xf32>, vector<128x128xf32>, vector<8x128xf32> -> vector<8x128xf32>
    %c0_284 = arith.constant 0 : index
    %c0_285 = arith.constant 0 : index
    %653 = vector.load %arg20[%c0_284, %c0_285] : memref<1x128xf32, #tpu.memory_space<vmem>>, vector<1x128xf32>
    %654 = vector.broadcast %653 : vector<1x128xf32> to vector<8x128xf32>
    %655 = arith.addf %652, %654 : vector<8x128xf32>
    %c0_286 = arith.constant 0 : index
    %c0_287 = arith.constant 0 : index
    %c0_288 = arith.constant 0 : index
    %656 = vector.load %arg21[%c0_286, %c0_287, %c0_288] : memref<1x8x128xf32, #tpu.memory_space<vmem>>, vector<1x8x128xf32>
    %657 = vector.shape_cast %656 : vector<1x8x128xf32> to vector<8x128xf32>
    %658 = vector.shape_cast %655 : vector<8x128xf32> to vector<1x8x128xf32>
    tpu.vector_store %arg21[%c0_286, %c0_287, %c0_288], %658 {strides = array<i32>} : memref<1x8x128xf32, #tpu.memory_space<vmem>>, vector<1x8x128xf32>,
    return
  }
  func.func @transform_0(%arg0: i32) -> (i32, i32, i32) {
    %c0_i32 = arith.constant 0 : i32
    %c0_i32_0 = arith.constant 0 : i32
    %c0_i32_1 = arith.constant 0 : i32
    return %arg0, %c0_i32, %c0_i32_0 : i32, i32, i32
  }
  func.func @transform_1(%arg0: i32) -> (i32, i32, i32) {
    %c0_i32 = arith.constant 0 : i32
    %c0_i32_0 = arith.constant 0 : i32
    %c0_i32_1 = arith.constant 0 : i32
    return %arg0, %c0_i32, %c0_i32_0 : i32, i32, i32
  }
  func.func @transform_2(%arg0: i32) -> (i32, i32, i32) {
    %c0_i32 = arith.constant 0 : i32
    %c0_i32_0 = arith.constant 0 : i32
    %c0_i32_1 = arith.constant 0 : i32
    return %arg0, %c0_i32, %c0_i32_0 : i32, i32, i32
  }
  func.func @transform_3(%arg0: i32) -> (i32, i32, i32) {
    %c0_i32 = arith.constant 0 : i32
    %c0_i32_0 = arith.constant 0 : i32
    %c0_i32_1 = arith.constant 0 : i32
    return %arg0, %c0_i32, %c0_i32_0 : i32, i32, i32
  }
  func.func @transform_4(%arg0: i32) -> (i32, i32, i32) {
    %c0_i32 = arith.constant 0 : i32
    %c0_i32_0 = arith.constant 0 : i32
    %c0_i32_1 = arith.constant 0 : i32
    %c0_i32_2 = arith.constant 0 : i32
    return %c0_i32, %c0_i32_0, %c0_i32_1 : i32, i32, i32
  }
  func.func @transform_5(%arg0: i32) -> (i32, i32, i32) {
    %c0_i32 = arith.constant 0 : i32
    %c0_i32_0 = arith.constant 0 : i32
    %c0_i32_1 = arith.constant 0 : i32
    %c0_i32_2 = arith.constant 0 : i32
    return %c0_i32, %c0_i32_0, %c0_i32_1 : i32, i32, i32
  }
  func.func @transform_6(%arg0: i32) -> (i32, i32, i32) {
    %c0_i32 = arith.constant 0 : i32
    %c0_i32_0 = arith.constant 0 : i32
    %c0_i32_1 = arith.constant 0 : i32
    %c0_i32_2 = arith.constant 0 : i32
    return %c0_i32, %c0_i32_0, %c0_i32_1 : i32, i32, i32
  }
  func.func @transform_7(%arg0: i32) -> (i32, i32, i32) {
    %c0_i32 = arith.constant 0 : i32
    %c0_i32_0 = arith.constant 0 : i32
    %c0_i32_1 = arith.constant 0 : i32
    %c0_i32_2 = arith.constant 0 : i32
    return %c0_i32, %c0_i32_0, %c0_i32_1 : i32, i32, i32
  }
  func.func @transform_8(%arg0: i32) -> (i32, i32, i32) {
    %c0_i32 = arith.constant 0 : i32
    %c0_i32_0 = arith.constant 0 : i32
    %c0_i32_1 = arith.constant 0 : i32
    %c0_i32_2 = arith.constant 0 : i32
    return %c0_i32, %c0_i32_0, %c0_i32_1 : i32, i32, i32
  }
  func.func @transform_9(%arg0: i32) -> (i32, i32, i32) {
    %c0_i32 = arith.constant 0 : i32
    %c0_i32_0 = arith.constant 0 : i32
    %c0_i32_1 = arith.constant 0 : i32
    %c0_i32_2 = arith.constant 0 : i32
    return %c0_i32, %c0_i32_0, %c0_i32_1 : i32, i32, i32
  }
  func.func @transform_10(%arg0: i32) -> (i32, i32, i32) {
    %c0_i32 = arith.constant 0 : i32
    %c0_i32_0 = arith.constant 0 : i32
    %c0_i32_1 = arith.constant 0 : i32
    %c0_i32_2 = arith.constant 0 : i32
    return %c0_i32, %c0_i32_0, %c0_i32_1 : i32, i32, i32
  }
  func.func @transform_11(%arg0: i32) -> (i32, i32, i32) {
    %c0_i32 = arith.constant 0 : i32
    %c0_i32_0 = arith.constant 0 : i32
    %c0_i32_1 = arith.constant 0 : i32
    %c0_i32_2 = arith.constant 0 : i32
    return %c0_i32, %c0_i32_0, %c0_i32_1 : i32, i32, i32
  }
  func.func @transform_12(%arg0: i32) -> (i32, i32, i32) {
    %c0_i32 = arith.constant 0 : i32
    %c0_i32_0 = arith.constant 0 : i32
    %c0_i32_1 = arith.constant 0 : i32
    %c0_i32_2 = arith.constant 0 : i32
    return %c0_i32, %c0_i32_0, %c0_i32_1 : i32, i32, i32
  }
  func.func @transform_13(%arg0: i32) -> (i32, i32, i32) {
    %c0_i32 = arith.constant 0 : i32
    %c0_i32_0 = arith.constant 0 : i32
    %c0_i32_1 = arith.constant 0 : i32
    %c0_i32_2 = arith.constant 0 : i32
    return %c0_i32, %c0_i32_0, %c0_i32_1 : i32, i32, i32
  }
  func.func @transform_14(%arg0: i32) -> (i32, i32, i32) {
    %c0_i32 = arith.constant 0 : i32
    %c0_i32_0 = arith.constant 0 : i32
    %c0_i32_1 = arith.constant 0 : i32
    %c0_i32_2 = arith.constant 0 : i32
    return %c0_i32, %c0_i32_0, %c0_i32_1 : i32, i32, i32
  }
  func.func @transform_15(%arg0: i32) -> (i32, i32, i32) {
    %c0_i32 = arith.constant 0 : i32
    %c0_i32_0 = arith.constant 0 : i32
    %c0_i32_1 = arith.constant 0 : i32
    %c0_i32_2 = arith.constant 0 : i32
    return %c0_i32, %c0_i32_0, %c0_i32_1 : i32, i32, i32
  }
  func.func @transform_16(%arg0: i32) -> (i32, i32, i32) {
    %c0_i32 = arith.constant 0 : i32
    %c0_i32_0 = arith.constant 0 : i32
    %c0_i32_1 = arith.constant 0 : i32
    %c0_i32_2 = arith.constant 0 : i32
    return %c0_i32, %c0_i32_0, %c0_i32_1 : i32, i32, i32
  }
  func.func @transform_17(%arg0: i32) -> (i32, i32, i32) {
    %c0_i32 = arith.constant 0 : i32
    %c0_i32_0 = arith.constant 0 : i32
    %c0_i32_1 = arith.constant 0 : i32
    %c0_i32_2 = arith.constant 0 : i32
    return %c0_i32, %c0_i32_0, %c0_i32_1 : i32, i32, i32
  }
  func.func @transform_18(%arg0: i32) -> (i32, i32) {
    %c0_i32 = arith.constant 0 : i32
    %c0_i32_0 = arith.constant 0 : i32
    %c0_i32_1 = arith.constant 0 : i32
    return %c0_i32, %c0_i32_0 : i32, i32
  }
  func.func @transform_19(%arg0: i32) -> (i32, i32) {
    %c0_i32 = arith.constant 0 : i32
    %c0_i32_0 = arith.constant 0 : i32
    %c0_i32_1 = arith.constant 0 : i32
    return %c0_i32, %c0_i32_0 : i32, i32
  }
  func.func @transform_20(%arg0: i32) -> (i32, i32, i32) {
    %c0_i32 = arith.constant 0 : i32
    %c0_i32_0 = arith.constant 0 : i32
    %c0_i32_1 = arith.constant 0 : i32
    return %arg0, %c0_i32, %c0_i32_0 : i32, i32, i32
  }
  func.func @transform_21(%arg0: i32) -> (i32, i32, i32, i32) {
    %c0_i32 = arith.constant 0 : i32
    %c0_i32_0 = arith.constant 0 : i32
    %c0_i32_1 = arith.constant 0 : i32
    %c0_i32_2 = arith.constant 0 : i32
    return %arg0, %c0_i32, %c0_i32_0, %c0_i32_1 : i32, i32, i32, i32
  }
}

</mosaic_0001>

<bundles_post_ra>
// kernel: decoder_forward.1
= control target key start
LH: loop header
LB: loop body
LE: loop exit
PB: predicated region body
PF: predicated region fallthrough
CT: control target
= control target key end

     0   :  { %s4613_s0 = inlined_call_operand.vmem [shape: f32[6,8,128], index: 0, kind: input, shape index: {}]   ;;  %s4614_s1 = inlined_call_operand.vmem [shape: f32[6,8,128], index: 1, kind: input, shape index: {}]   ;;  %s4615_s2 = inlined_call_operand.vmem [shape: f32[6,8,8], index: 2, kind: input, shape index: {}]   ;;  %s4616_s3 = inlined_call_operand.vmem [shape: f32[6,8,8], index: 3, kind: input, shape index: {}]   ;;  %s4617_s4 = inlined_call_operand.hbm [shape: f32[2,128,384], index: 4, kind: input, shape index: {}]   ;;  %s4618_s5 = inlined_call_operand.vmem [shape: f32[2,1,384], index: 5, kind: input, shape index: {}]   ;;  %s4619_s6 = inlined_call_operand.vmem [shape: f32[2,128,128], index: 6, kind: input, shape index: {}]   ;;  %s4620_s7 = inlined_call_operand.vmem [shape: f32[2,1,128], index: 7, kind: input, shape index: {}]   ;;  %s4621_s8 = inlined_call_operand.hbm [shape: f32[2,128,384], index: 8, kind: input, shape index: {}]   ;;  %s4622_s9 = inlined_call_operand.vmem [shape: f32[2,1,384], index: 9, kind: input, shape index: {}]   ;;  %s4623_s10 = inlined_call_operand.vmem [shape: f32[2,128,128], index: 10, kind: input, shape index: {}]   ;;  %s4624_s11 = inlined_call_operand.vmem [shape: f32[2,1,128], index: 11, kind: input, shape index: {}]   ;;  %s4625_s12 = inlined_call_operand.hbm [shape: f32[2,128,128], index: 12, kind: input, shape index: {}]   ;;  %s4626_s13 = inlined_call_operand.vmem [shape: f32[2,1,128], index: 13, kind: input, shape index: {}]   ;;  %s4627_s14 = inlined_call_operand.hbm [shape: f32[2,128,128], index: 14, kind: input, shape index: {}]   ;;  %s4628_s15 = inlined_call_operand.vmem [shape: f32[2,1,128], index: 15, kind: input, shape index: {}]   ;;  %s4629_s16 = inlined_call_operand.vmem [shape: f32[6,1,128], index: 16, kind: input, shape index: {}]   ;;  %s4630_s17 = inlined_call_operand.vmem [shape: f32[6,1,128], index: 17, kind: input, shape index: {}]   ;;  %s4631_s18 = inlined_call_operand.vmem [shape: f32[128,128], index: 18, kind: input, shape index: {}]   ;;  %s4632_s19 = inlined_call_operand.vmem [shape: f32[1,128], index: 19, kind: input, shape index: {}]   ;;  %s4633_s20 = inlined_call_operand.hbm [shape: f32[6,8,128], index: 20, kind: output, shape index: {0}]   ;;  %s4634_s21 = inlined_call_operand.hbm [shape: f32[6,4,8,8], index: 21, kind: output, shape index: {1}]  }
   0x1   :  { %4647 = sst [smem:[#allocation25_spill]] %s4613_s0 }
   0x2   :  { %4648 = sst [smem:[#allocation26_spill]] %s4614_s1 }
   0x3   :  { %4649 = sst [smem:[#allocation27_spill]] %s4615_s2 }
   0x4   :  { %4650 = sst [smem:[#allocation28_spill]] %s4616_s3 }
   0x5   :  { %4651 = sst [smem:[#allocation29_spill]] %s4617_s4 }
   0x6   :  { %4652 = sst [smem:[#allocation30_spill]] %s4618_s5 }
   0x7   :  { %4653 = sst [smem:[#allocation31_spill]] %s4619_s6 }
   0x8   :  { %4654 = sst [smem:[#allocation32_spill]] %s4620_s7 }
   0x9   :  { %4655 = sst [smem:[#allocation33_spill]] %s4621_s8 }
   0xa   :  { %4656 = sst [smem:[#allocation34_spill]] %s4622_s9 }
   0xb   :  { %4657 = sst [smem:[#allocation35_spill]] %s4623_s10 }
   0xc   :  { %4658 = sst [smem:[#allocation36_spill]] %s4631_s18 }
   0xd   :  { %4659 = sst [smem:[#allocation37_spill]] %s4632_s19 }
   0xe   :  { %4660 = sst [smem:[#allocation38_spill]] %s4633_s20 }
   0xf   :  { %4661 = sst [smem:[#allocation39_spill]] %s4634_s21 }
  0x10   :  { %27 = vsyncpa [#allocation3], 0 }
  0x11   :  { %28 = vsyncpa [#allocation6], 0 }
  0x12   :  { %29 = vsyncpa [#allocation9], 0 }
  0x13   :  { %30 = vsyncpa [#allocation4], 0 }
  0x14   :  { %32 = vsyncpa [#allocation4 + $0x1], 0 }
  0x15   :  { %33 = vsyncpa [#allocation12], 0 }
  0x16   :  { %35 = vsyncpa [#allocation12 + $0x1], 0  ;;  %s3840_s2 = smov 0   ;;  %s3842_s25 = smov 0  }
  0x17   :  { %s3844_s26 = smov 0   ;;  %s3846_s27 = smov 0  }
  0x18 LB: > { %4662 = sst [smem:[#allocation18_spill]] %s3705_s2  ;;  %s3861_s3 = sadd.s32 4294967295, %s3717_s27   ;;  %s3717_s27 = sphi %s3846_s27, %s4692_s27   ;;  %s3713_s26 = sphi %s3844_s26, %s4694_s26   ;;  %s3709_s25 = sphi %s3842_s25, %s4696_s25   ;;  %s3705_s2 = sphi %s3840_s2, %s4695_s2  }
  0x19   : > { %4663 = sst [smem:[#allocation19_spill]] %s3713_s26  ;;  %s3203_s28 = sadd.s32 4294967294, %s3717_s27  }
  0x1a   : > { %4664 = sst [smem:[#allocation20_spill]] %s3717_s27  ;;  %s3865_s29 = sadd.s32 1, %s3717_s27  }
  0x1b   : > { %4665 = sst [smem:[#allocation21_spill]] %s3865_s29  ;;  %s488_s0 = sadd.s32 1, %s3713_s26 }
  0x1c   : > { %s485_s4 = ssub.s32 %s3717_s27, %s3865_s29  ;;  %p498_p0 = scmp.ne.s32.totalorder %s3713_s26, %s3709_s25 }
  0x1d   : > { %p486_p1 = scmp.eq.s32.totalorder %s485_s4, 0  ;;  %p499_p2 = scmp.eq.s32.totalorder %s3861_s3, 5 }
  0x1e   : > { %p504_p3 = scmp.ne.s32.totalorder %s3709_s25, %s3705_s2  ;;  %p505_p4 = scmp.eq.s32.totalorder %s3203_s28, 5 }
  0x1f   : > { %s3876_s30 = scalar_select %p486_p1, %s3713_s26, %s488_s0  }
  0x20   : > { %p3878_p5 = por %p499_p2, %p498_p0  ;;  %p3882_p6 = por %p505_p4, %p504_p3 }
  0x21   : > { %4666 = sst [smem:[#allocation22_spill]] %s3876_s30  ;;  %p3204_p7 = scmp.ge.s32.totalorder %s3717_s27, 1 }
  0x22   : > { %s4667_s5 = scalar_select %p3878_p5, 1, 0 }
  0x23   : > { %s4669_s22 = scalar_select %p3882_p6, 1, 0 }
  0x24   : > { %4668 = sst [smem:[#allocation23_spill]] %s4667_s5  ;;  %p538_p8 = scmp.lt.s32.totalorder %s3717_s27, 7 }
  0x25   : > { %4670 = sst [smem:[#allocation24_spill]] %s4669_s22  ;;  %p3341_p9 = scmp.eq.s32.totalorder %s3861_s3, 0 }
  0x26   : > { %p3889_p10 = pnand %p3204_p7, %p538_p8  ;;  %s4672_s8 = sld [smem:[#allocation33_spill]] }
  0x27   : > { %s4673_s30 = sld [smem:[#allocation29_spill]]  ;;  %s3719_s22 = smov [#allocation5]  }
  0x28   : > { %p3321_p11 = pneg %p3889_p10  ;;  %s574_s2 = sshll.u32 %s3719_s22, 4  ;;  %s575_s2 = int_to_ptr.vmem [resolvable:$true] %s574_s2 }
  0x29   : > { %s3720_s1 = smov 384   ;;  %s3721_s24 = smov 24  }
  0x2a   : > { %p3903_p12 = pnand %p3341_p9, %p3321_p11  ;;  %s595_s4 = sshll.u32 %s4625_s12, 4  ;;  %s596_s4 = int_to_ptr.hbm [resolvable:$true] %s595_s4 }
  0x2b   : > { %s3723_s19 = smov [#allocation7]   ;;  %s612_s5 = sshll.u32 %s4627_s14, 4  ;;  %s613_s5 = int_to_ptr.hbm [resolvable:$true] %s612_s5 }
  0x2c   : > { %s572_s28 = sshll.u32 %s4672_s8, 4  ;;  %s3722_s8 = smov [#allocation2]   ;;  %s573_s28 = int_to_ptr.hbm [resolvable:$true] %s572_s28 }
  0x2d   : > { %s549_s26 = sshll.u32 %s4673_s30, 4  ;;  %s551_s27 = sshll.u32 %s3722_s8, 4  ;;  %s550_s26 = int_to_ptr.hbm [resolvable:$true] %s549_s26  ;;  %s552_s27 = int_to_ptr.vmem [resolvable:$true] %s551_s27 }
  0x2e   : > { %3327 = dma.hbm_to_vmem [thread:$0]  (!%p3903_p12), %s573_s28, 12288, %s575_s2, [#allocation6], %s3720_s1, %s3720_s1, %s3721_s24  }
  0x2f   : > { %3324 = dma.hbm_to_vmem [thread:$0]  (!%p3903_p12), %s550_s26, 12288, %s552_s27, [#allocation3], %s3720_s1, %s3720_s1, %s3721_s24  }
  0x30   : > { %s597_s22 = sshll.u32 %s3723_s19, 4  ;;  %s3724_s18 = smov 128   ;;  %s598_s22 = int_to_ptr.vmem [resolvable:$true] %s597_s22 }
  0x31   : > { %s3725_s2 = smov 8   ;;  %s3726_s8 = smov [#allocation8]  }
  0x32   : > { %3330 = dma.hbm_to_vmem [thread:$0]  (!%p3903_p12), %s596_s4, 4096, %s598_s22, [#allocation6], %s3724_s18, %s3724_s18, %s3725_s2  }
  0x33   : > { %s614_s28 = sshll.u32 %s3726_s8, 4  ;;  %673 = sbr.rel (%p3889_p10) target bundleno = 6394 (0x18fa), region = 100  ;;  %s615_s28 = int_to_ptr.vmem [resolvable:$true] %s614_s28 }
  0x34   : > { %3333 = dma.hbm_to_vmem [thread:$0]  (!%p3903_p12), %s613_s5, 4096, %s615_s28, [#allocation9], %s3724_s18, %s3724_s18, %s3725_s2  }
  0x38   : > { %3684 = dma.done.wait (%p3341_p9), [#allocation3], 12288  }
  0x39   : > { %3686 = vsyncadd (%p3341_p9), [#allocation3], 4294955008 }
  0x3a   : > { %3688 = dma.done.wait (%p3341_p9), [#allocation6], 16384  }
  0x3b   : > { %3690 = vsyncadd (%p3341_p9), [#allocation6], 4294950912 }
  0x3c   : > { %3692 = dma.done.wait (%p3341_p9), [#allocation9], 4096  }
  0x3d   : > { %3694 = vsyncadd (%p3341_p9), [#allocation9], 4294963200  ;;  %v855_v0 = vld [vmem:[#allocation2 + $0x170] sm:$0xff]  ;;  %v856_v1 = vld [vmem:[#allocation2 + $0x178] sm:$0xff]  ;;  %p765_p13 = scmp.lt.s32.totalorder %s3861_s3, 5  ;;  %s4675_s26 = sld [smem:[#allocation25_spill]]  ;;  %v785_v49 = vlaneseq }
  0x3e   : > { %v854_v2 = vld [vmem:[#allocation2 + $0x168] sm:$0xff]  ;;  %902 = vmatpush.msra.mxu1 %v855_v0  ;;  %922 = vmatpush.msra.mxu2 %v856_v1  ;;  %v852_v3 = vld [vmem:[#allocation2 + $0x158] sm:$0xff]  ;;  %v853_v4 = vld [vmem:[#allocation2 + $0x160] sm:$0xff]  ;;  %s4676_s23 = sld [smem:[#allocation30_spill]]  ;;  %v3727_v57 = vmov 0.0   ;;  %vm965_vm5 = vcmask 64512  }
  0x3f   : > { %v851_v5 = vld [vmem:[#allocation2 + $0x150] sm:$0xff]  ;;  %882 = vmatpush.msra.mxu0 %v854_v2  ;;  %v849_v6 = vld [vmem:[#allocation2 + $0x140] sm:$0xff]  ;;  %v850_v7 = vld [vmem:[#allocation2 + $0x148] sm:$0xff]  ;;  %s766_s18 = scalar_select %p765_p13, %s3861_s3, 5  ;;  %v3948_v50 = vand.u32 127, %v785_v49 }
  0x40   : > { %903 = vmatpush.msra.mxu1 %v852_v3  ;;  %923 = vmatpush.msra.mxu2 %v853_v4  ;;  %v848_v8 = vld [vmem:[#allocation2 + $0x138] sm:$0xff]  ;;  %v846_v9 = vld [vmem:[#allocation2 + $0x128] sm:$0xff]  ;;  %v847_v10 = vld [vmem:[#allocation2 + $0x130] sm:$0xff]  ;;  %s4677_s0 = sld [smem:[#allocation27_spill]]  ;;  %s4429_s2 = sand.u32 1, %s3709_s25  }
  0x41   : > { %883 = vmatpush.msra.mxu0 %v851_v5  ;;  %v845_v11 = vld [vmem:[#allocation2 + $0x120] sm:$0xff]  ;;  %v843_v12 = vld [vmem:[#allocation2 + $0x110] sm:$0xff]  ;;  %v844_v13 = vld [vmem:[#allocation2 + $0x118] sm:$0xff]  ;;  %s3937_s19 = sshll.u32 %s766_s18, 3  ;;  %vm787_vm0 = vcmp.lt.s32.totalorder %v3948_v50, 16  ;;  %vm805_vm1 = vcmp.ge.s32.totalorder %v3948_v50, 12 }
  0x42   : > { %904 = vmatpush.msra.mxu1 %v849_v6  ;;  %924 = vmatpush.msra.mxu2 %v850_v7  ;;  %v842_v14 = vld [vmem:[#allocation2 + $0x108] sm:$0xff]  ;;  %v840_v15 = vld [vmem:[#allocation2 + $0xf8] sm:$0xff]  ;;  %v841_v16 = vld [vmem:[#allocation2 + $0x100] sm:$0xff]  ;;  %vm791_vm2 = vcmp.lt.s32.totalorder %v3948_v50, 4  ;;  %vm795_vm10 = vcmp.ge.s32.totalorder %v3948_v50, 4  ;;  %vm796_vm11 = vcmp.lt.s32.totalorder %v3948_v50, 8 }
  0x43   : > { %884 = vmatpush.msra.mxu0 %v848_v8  ;;  %v839_v17 = vld [vmem:[#allocation2 + $0xf0] sm:$0xff]  ;;  %v837_v18 = vld [vmem:[#allocation2 + $0xe0] sm:$0xff]  ;;  %v838_v19 = vld [vmem:[#allocation2 + $0xe8] sm:$0xff]  ;;  %s768_s27 = scalar_lea.vmem %s4675_s26, %s3937_s19  ;;  %v3961_v58 = vsel %vm791_vm2, 1.0, %v3727_v57  ;;  %s4678_s6 = sld [smem:[#allocation31_spill]] }
  0x44   : > { %905 = vmatpush.msra.mxu1 %v846_v9  ;;  %925 = vmatpush.msra.mxu2 %v847_v10  ;;  %v836_v20 = vld [vmem:[#allocation2 + $0xd8] sm:$0xff]  ;;  %v834_v21 = vld [vmem:[#allocation2 + $0xc8] sm:$0xff]  ;;  %v835_v22 = vld [vmem:[#allocation2 + $0xd0] sm:$0xff]  ;;  %s4679_s7 = sld [smem:[#allocation32_spill]]  ;;  %s3216_s21 = sshll.u32 %s4429_s2, 5 }
  0x45   : > { %885 = vmatpush.msra.mxu0 %v845_v11  ;;  %v833_v23 = vld [vmem:[#allocation2 + $0xc0] sm:$0xff]  ;;  %v831_v24 = vld [vmem:[#allocation2 + $0xb0] sm:$0xff]  ;;  %v832_v25 = vld [vmem:[#allocation2 + $0xb8] sm:$0xff]  ;;  %s4680_s28 = sld [smem:[#allocation26_spill]]  ;;  %s4440_s26 = scalar_lea.vmem [#allocation11], %s3216_s21 }
  0x46   : > { %906 = vmatpush.msra.mxu1 %v843_v12  ;;  %926 = vmatpush.msra.mxu2 %v844_v13  ;;  %v830_v26 = vld [vmem:[#allocation2 + $0xa8] sm:$0xff]  ;;  %v828_v27 = vld [vmem:[#allocation2 + $0x98] sm:$0xff]  ;;  %v829_v28 = vld [vmem:[#allocation2 + $0xa0] sm:$0xff]  ;;  %s776_s30 = scalar_lea.vmem %s4677_s0, %s3937_s19  ;;  %s4681_s9 = sld [smem:[#allocation34_spill]] }
  0x47   : > { %886 = vmatpush.msra.mxu0 %v842_v14  ;;  %v827_v29 = vld [vmem:[#allocation2 + $0x90] sm:$0xff]  ;;  %v825_v30 = vld [vmem:[#allocation2 + $0x80] sm:$0xff]  ;;  %v826_v31 = vld [vmem:[#allocation2 + $0x88] sm:$0xff]  ;;  %s4682_s0 = sld [smem:[#allocation28_spill]]  ;;  %s3002_s21 = scalar_lea.sflag [#allocation12], %s4429_s2 }
  0x48   : > { %907 = vmatpush.msra.mxu1 %v840_v15  ;;  %927 = vmatpush.msra.mxu2 %v841_v16  ;;  %v824_v32 = vld [vmem:[#allocation2 + $0x78] sm:$0xff]  ;;  %v822_v33 = vld [vmem:[#allocation2 + $0x68] sm:$0xff]  ;;  %v823_v34 = vld [vmem:[#allocation2 + $0x70] sm:$0xff]  ;;  %s4683_s10 = sld [smem:[#allocation35_spill]] }
  0x49   : > { %887 = vmatpush.msra.mxu0 %v839_v17  ;;  %v821_v35 = vld [vmem:[#allocation2 + $0x60] sm:$0xff]  ;;  %v819_v36 = vld [vmem:[#allocation2 + $0x50] sm:$0xff]  ;;  %v820_v37 = vld [vmem:[#allocation2 + $0x58] sm:$0xff]  ;;  %s4684_s20 = sld [smem:[#allocation36_spill]] }
  0x4a   : > { %908 = vmatpush.msra.mxu1 %v837_v18  ;;  %928 = vmatpush.msra.mxu2 %v838_v19  ;;  %v818_v38 = vld [vmem:[#allocation2 + $0x48] sm:$0xff]  ;;  %v816_v39 = vld [vmem:[#allocation2 + $0x38] sm:$0xff]  ;;  %v817_v40 = vld [vmem:[#allocation2 + $0x40] sm:$0xff] }
  0x4b   : > { %888 = vmatpush.msra.mxu0 %v836_v20  ;;  %v815_v41 = vld [vmem:[#allocation2 + $0x30] sm:$0xff]  ;;  %v813_v42 = vld [vmem:[#allocation2 + $0x20] sm:$0xff]  ;;  %v814_v43 = vld [vmem:[#allocation2 + $0x28] sm:$0xff]  ;;  %s4090_s18 = scalar_lea.vmem %s4680_s28, %s3937_s19 }
  0x4c   : > { %909 = vmatpush.msra.mxu1 %v834_v21  ;;  %929 = vmatpush.msra.mxu2 %v835_v22  ;;  %v812_v44 = vld [vmem:[#allocation2 + $0x18] sm:$0xff]  ;;  %v810_v45 = vld [vmem:[#allocation2 + $0x8] sm:$0xff]  ;;  %v811_v46 = vld [vmem:[#allocation2 + $0x10] sm:$0xff] }
  0x4d   : > { %889 = vmatpush.msra.mxu0 %v833_v23  ;;  %v809_v47 = vld [vmem:[#allocation2] sm:$0xff]  ;;  %vm806_vm3 = vmand %vm805_vm1, %vm787_vm0 }
  0x4e   : > { %910 = vmatpush.msra.mxu1 %v831_v24  ;;  %930 = vmatpush.msra.mxu2 %v832_v25  ;;  %v3943_v48 = vld [vmem:[%s768_s27] sm:$0xff]  ;;  %v3964_v59 = vsel %vm806_vm3, 1.0, %v3727_v57  ;;  %vm797_vm13 = vmand %vm795_vm10, %vm796_vm11 }
  0x4f   : > { %890 = vmatpush.msra.mxu0 %v830_v26  ;;  %v857_v51 = vld [vmem:[%s4676_s23] sm:$0x7] }
  0x50   : > { %911 = vmatpush.msra.mxu1 %v828_v27  ;;  %931 = vmatpush.msra.mxu2 %v829_v28  ;;  %v877_v52 = vperm.slane %v857_v51, 1  ;;  %v876_v53 = vperm.slane %v857_v51, 0  ;;  %v878_v61 = vperm.slane %v857_v51, 2  ;;  %v3979_v2 = vld [vmem:[%s776_s30] sm:$0xff]  ;;  %s780_s30 = scalar_lea.vmem %s4682_s0, %s3937_s19  ;;  %s3028_s19 = sshll.u32 %s4440_s26, 4  ;;  %s3029_s19 = int_to_ptr.vmem [resolvable:$true] %s3028_s19 }
  0x51   : > { %891 = vmatpush.msra.mxu0 %v827_v29  ;;  %vm963_vm4 = vcmp.eq.f32.partialorder %v3979_v2, 0.0 }
  0x52   : > { %912 = vmatpush.msra.mxu1 %v825_v30  ;;  %932 = vmatpush.msra.mxu2 %v826_v31 }
  0x53   : > { %892 = vmatpush.msra.mxu0 %v824_v32 }
  0x54   : > { %913 = vmatpush.msra.mxu1 %v822_v33  ;;  %933 = vmatpush.msra.mxu2 %v823_v34 }
  0x55   : > { %893 = vmatpush.msra.mxu0 %v821_v35 }
  0x56   : > { %914 = vmatpush.msra.mxu1 %v819_v36  ;;  %934 = vmatpush.msra.mxu2 %v820_v37 }
  0x57   : > { %894 = vmatpush.msra.mxu0 %v818_v38 }
  0x58   : > { %915 = vmatpush.msra.mxu1 %v816_v39  ;;  %935 = vmatpush.msra.mxu2 %v817_v40  ;;  %v3994_v40 = vsel %vm797_vm13, 1.0, %v3727_v57 }
  0x59   : > { %895 = vmatpush.msra.mxu0 %v815_v41 }
  0x5a   : > { %916 = vmatpush.msra.mxu1 %v813_v42  ;;  %936 = vmatpush.msra.mxu2 %v814_v43 }
  0x5b   : > { %896 = vmatpush.msra.mxu0 %v812_v44 }
  0x5c   : > { %917 = vmatpush.msra.mxu1 %v810_v45  ;;  %937 = vmatpush.msra.mxu2 %v811_v46 }
  0x5d   : > { %897 = vmatpush.msra.mxu0 %v809_v47  ;;  %918 = vmatmul.f32.vlgmr.msra.gmra.mxu1 %v3943_v48 }
  0x5e   : > { %938 = vmatmul.f32.vlgmr.msra.gmra.mxu2 %v3943_v48  ;;  %898 = vmatmul.f32.vlgmr.msra.gmra.mxu0 %v3943_v48 }
  0xda   : > { %v919_v54 = vpop.f32.mrf.mxu1 }
  0xdb   : > { %v3958_v55 = vadd.f32 %v919_v54, %v877_v52  ;;  %v899_v56 = vpop.f32.mrf.mxu0 }
  0xdc   : > { %v3966_v60 = vadd.f32 %v899_v56, %v876_v53 }
  0xdd   : > { %958 = vmatpush.xpose.msra.mxu3 %v3958_v55  ;;  %1173 = vmatpush.xpose.msrb.mxu1 %v3958_v55 }
  0xde   : > { %v942_v62 = vmul.f32 %v3961_v58, %v3966_v60  ;;  %v1157_v63 = vmul.f32 %v3964_v59, %v3966_v60  ;;  %v1015_v43 = vmul.f32 %v3994_v40, %v3966_v60 }
  0xe0   : > { %959 = vmatmul.f32.vlgmr.msra.gmra.mxu3 %v942_v62  ;;  %1174 = vmatmul.f32.vlgmr.msrb.gmra.mxu1 %v1157_v63 }
  0xe1   : > { %v939_v0 = vpop.f32.mrf.mxu2 }
  0xe2   : > { %v940_v1 = vadd.f32 %v939_v0, %v878_v61 }
  0xe4   : > { %1008 = vmatpush.msrb.mxu3 %v940_v1  ;;  %1150 = vmatpush.msrb.mxu0 %v940_v1 }
  0xe5   : > { %1221 = vmatpush.msrb.mxu2 %v940_v1 }
  0xe6   : > { %1031 = vmatpush.xpose.msra.mxu3 %v3958_v55 }
 0x15d   : > { %v1175_v3 = vpop.f32.mrf.mxu1 }
 0x15e   : > { %v1178_v4 = vsel %vm963_vm4, -1e+10, %v1175_v3 }
 0x15f   : > { %v1179_v5 = vsel %vm965_vm5, %v1178_v4, -inf }
 0x160   : > { %1180 = vmax.xlane.f32.xlu2 %v1179_v5 }
 0x163   : > { %v960_v6 = vpop.f32.mrf.mxu3 }
 0x164   : > { %v964_v7 = vsel %vm963_vm4, -1e+10, %v960_v6 }
 0x165   : > { %v966_v8 = vsel %vm965_vm5, %v964_v7, -inf }
 0x166   : > { %967 = vmax.xlane.f32.xlu0 %v966_v8 }
 0x1d3   : > { %v1181_v9 = vpop.xlane.xlu2 %1180 }
 0x1d4   : > { %v1182_v12 = vsub.f32 %v1178_v4, %v1181_v9 }
 0x1d6   : > { %v1183_v14 = vmul.f32 1.442695, %v1182_v12 }
 0x1d9   : > { %v968_v10 = vpop.xlane.xlu0 %967 }
 0x1da   : > { %v969_v11 = vsub.f32 %v964_v7, %v968_v10 }
 0x1dc   : > { %v970_v13 = vmul.f32 1.442695, %v969_v11 }
 0x1de   : > { %3414 = vpow2.f32 %v970_v13 }
 0x1df   : > { %3416 = vpow2.f32 %v1183_v14 }
 0x1e4   : > { %v3415_v15 = vpop.eup %3414 }
 0x1e5   : > { %v972_v16 = vsel %vm965_vm5, %v3415_v15, 0.0  ;;  %v3417_v17 = vpop.eup %3416 }
 0x1e6   : > { %973 = vadd.xlane.f32.xlu0 %v972_v16  ;;  %v1185_v18 = vsel %vm965_vm5, %v3417_v17, 0.0 }
 0x1ee   : > { %1186 = vadd.xlane.f32.xlu0 %v1185_v18 }
 0x259   : > { %v974_v19 = vpop.xlane.xlu0 %973 }
 0x25a   : > { %3418 = vrcp.f32 %v974_v19  ;;  %v986_v24 = vand.u32 2147483648, %v974_v19  ;;  %v984_v26 = vand.u32 2147483647, %v974_v19  ;;  %vm980_vm7 = vweird.f32 %v974_v19 }
 0x25c   : > { %v987_v29 = vor.u32 1.1754944e-38, %v986_v24  ;;  %vm985_vm9 = vcmp.eq.f32.partialorder %v984_v26, 8.507059e+37  ;;  %v871_v24 = vld [vmem:[%s4678_s6 + $0x68] sm:$0xff]  ;;  %v869_v26 = vld [vmem:[%s4678_s6 + $0x58] sm:$0xff] }
 0x260   : > { %v3419_v20 = vpop.eup %3418 }
 0x261   : > { %v976_v21 = vmul.f32 %v3419_v20, %v974_v19  ;;  %v1187_v22 = vpop.xlane.xlu0 %1186  ;;  %vm981_vm6 = vweird.f32 %v3419_v20 }
 0x262   : > { %3420 = vrcp.f32 %v1187_v22  ;;  %vm982_vm8 = vmor %vm980_vm7, %vm981_vm6  ;;  %v1199_v35 = vand.u32 2147483648, %v1187_v22  ;;  %v1197_v37 = vand.u32 2147483647, %v1187_v22  ;;  %vm1193_vm14 = vweird.f32 %v1187_v22 }
 0x263   : > { %v977_v23 = vsub.f32 1.0, %v976_v21 }
 0x264   : > { %v1200_v39 = vor.u32 1.1754944e-38, %v1199_v35  ;;  %vm1198_vm1 = vcmp.eq.f32.partialorder %v1197_v37, 8.507059e+37 }
 0x265   : > { %v978_v25 = vmul.f32 %v3419_v20, %v977_v23  ;;  %v872_v23 = vld [vmem:[%s4678_s6 + $0x70] sm:$0xff] }
 0x267   : > { %v979_v27 = vadd.f32 %v3419_v20, %v978_v25  ;;  %v870_v25 = vld [vmem:[%s4678_s6 + $0x60] sm:$0xff] }
 0x268   : > { %v3421_v28 = vpop.eup %3420 }
 0x269   : > { %v1189_v30 = vmul.f32 %v3421_v28, %v1187_v22  ;;  %v983_v31 = vsel %vm982_vm8, %v3419_v20, %v979_v27  ;;  %vm1194_vm12 = vweird.f32 %v3421_v28  ;;  %vm800_vm8 = vcmp.ge.s32.totalorder %v3948_v50, 8  ;;  %v873_v22 = vld [vmem:[%s4678_s6 + $0x78] sm:$0xff]  ;;  %v868_v27 = vld [vmem:[%s4678_s6 + $0x50] sm:$0xff] }
 0x26a   : > { %v988_v32 = vsel %vm985_vm9, %v987_v29, %v983_v31  ;;  %vm1195_vm15 = vmor %vm1193_vm14, %vm1194_vm12  ;;  %vm801_vm9 = vcmp.lt.s32.totalorder %v3948_v50, 12  ;;  %v865_v31 = vld [vmem:[%s4678_s6 + $0x38] sm:$0xff] }
 0x26b   : > { %v1190_v33 = vsub.f32 1.0, %v1189_v30  ;;  %v989_v34 = vmul.f32 %v3415_v15, %v988_v32  ;;  %vm802_vm10 = vmand %vm800_vm8, %vm801_vm9  ;;  %v866_v30 = vld [vmem:[%s4678_s6 + $0x40] sm:$0xff]  ;;  %v864_v32 = vld [vmem:[%s4678_s6 + $0x30] sm:$0xff] }
 0x26c   : > { %v4008_v9 = vsel %vm802_vm10, 1.0, %v3727_v57  ;;  %v1314_v50 = vld [vmem:[#allocation5 + $0xf8] sm:$0xff] }
 0x26d   : > { %v1191_v36 = vmul.f32 %v3421_v28, %v1190_v33  ;;  %3226 = vmatmul.msk.f32.vlgmr.msrb.gmra.mxu3 %vm965_vm5, %v989_v34  ;;  %v1086_v10 = vmul.f32 %v4008_v9, %v3966_v60  ;;  %v863_v33 = vld [vmem:[%s4678_s6 + $0x28] sm:$0xff] }
 0x26e   : > { %1079 = vmatpush.msrb.mxu3 %v940_v1 }
 0x26f   : > { %v1192_v38 = vadd.f32 %v3421_v28, %v1191_v36  ;;  %v862_v36 = vld [vmem:[%s4678_s6 + $0x20] sm:$0xff] }
 0x271   : > { %v1196_v41 = vsel %vm1195_vm15, %v3421_v28, %v1192_v38  ;;  %v867_v28 = vld [vmem:[%s4678_s6 + $0x48] sm:$0xff] }
 0x272   : > { %v1201_v42 = vsel %vm1198_vm1, %v1200_v39, %v1196_v41 }
 0x273   : > { %v1202_v44 = vmul.f32 %v3417_v17, %v1201_v42 }
 0x275   : > { %1032 = vmatmul.f32.vlgmr.msra.gmra.mxu3 %v1015_v43  ;;  %3229 = vmatmul.msk.f32.vlgmr.msrb.gmra.mxu2 %vm965_vm5, %v1202_v44 }
 0x276   : > { %1102 = vmatpush.xpose.msra.mxu3 %v3958_v55 }
 0x2f0   : > { %v1010_v45 = vpop.f32.mrf.mxu3 }
 0x2f1   : > { %v1013_v12 = vmul.f32 %v3961_v58, %v1010_v45 }
 0x2f8   : > { %v1033_v46 = vpop.f32.mrf.mxu3 }
 0x2f9   : > { %v1036_v47 = vsel %vm963_vm4, -1e+10, %v1033_v46 }
 0x2fa   : > { %v1037_v49 = vsel %vm965_vm5, %v1036_v47, -inf }
 0x2fb   : > { %1038 = vmax.xlane.f32.xlu1 %v1037_v49  ;;  %v860_v49 = vld [vmem:[%s4678_s6 + $0x10] sm:$0xff] }
 0x36e   : > { %v1039_v51 = vpop.xlane.xlu1 %1038 }
 0x36f   : > { %v1040_v52 = vsub.f32 %v1036_v47, %v1039_v51  ;;  %v861_v47 = vld [vmem:[%s4678_s6 + $0x18] sm:$0xff]  ;;  %v859_v51 = vld [vmem:[%s4678_s6 + $0x8] sm:$0xff] }
 0x371   : > { %v1041_v53 = vmul.f32 1.442695, %v1040_v52  ;;  %v858_v52 = vld [vmem:[%s4678_s6] sm:$0xff] }
 0x373   : > { %3422 = vpow2.f32 %v1041_v53  ;;  %v1223_v53 = vpop.f32.mrf.mxu2 }
 0x379   : > { %v3423_v54 = vpop.eup %3422 }
 0x37a   : > { %v1043_v56 = vsel %vm965_vm5, %v3423_v54, 0.0 }
 0x37b   : > { %1044 = vadd.xlane.f32.xlu1 %v1043_v56 }
 0x3ee   : > { %v1045_v61 = vpop.xlane.xlu1 %1044 }
 0x3ef   : > { %3424 = vrcp.f32 %v1045_v61  ;;  %v1057_v0 = vand.u32 2147483648, %v1045_v61  ;;  %v1055_v3 = vand.u32 2147483647, %v1045_v61  ;;  %vm1051_vm3 = vweird.f32 %v1045_v61 }
 0x3f1   : > { %v1058_v5 = vor.u32 1.1754944e-38, %v1057_v0  ;;  %vm1056_vm7 = vcmp.eq.f32.partialorder %v1055_v3, 8.507059e+37 }
 0x3f5   : > { %v3425_v62 = vpop.eup %3424 }
 0x3f6   : > { %v1047_v55 = vmul.f32 %v3425_v62, %v1045_v61  ;;  %vm1052_vm2 = vweird.f32 %v3425_v62  ;;  %v1226_v61 = vmul.f32 %v3964_v59, %v1223_v53 }
 0x3f7   : > { %vm1053_vm6 = vmor %vm1051_vm3, %vm1052_vm2 }
 0x3f8   : > { %v1048_v63 = vsub.f32 1.0, %v1047_v55 }
 0x3fa   : > { %v1049_v1 = vmul.f32 %v3425_v62, %v1048_v63  ;;  %v3393_v63 = vld [vmem:[%s4679_s7] ss:$0 sm:$0xff] }
 0x3fc   : > { %v1050_v4 = vadd.f32 %v3425_v62, %v1049_v1 }
 0x3fe   : > { %v1054_v6 = vsel %vm1053_vm6, %v3425_v62, %v1050_v4  ;;  %v1329_v4 = vld [vmem:[#allocation5 + $0x170] sm:$0xff] }
 0x3ff   : > { %v1059_v7 = vsel %vm1056_vm7, %v1058_v5, %v1054_v6  ;;  %v1328_v5 = vld [vmem:[#allocation5 + $0x168] sm:$0xff]  ;;  %v1326_v6 = vld [vmem:[#allocation5 + $0x158] sm:$0xff]  ;;  %1376 = vmatpush.msra.mxu1 %v1329_v4 }
 0x400   : > { %v1060_v8 = vmul.f32 %v3423_v54, %v1059_v7  ;;  %1356 = vmatpush.msra.mxu0 %v1328_v5  ;;  %v1325_v7 = vld [vmem:[#allocation5 + $0x150] sm:$0xff] }
 0x401   : > { %1377 = vmatpush.msra.mxu1 %v1326_v6 }
 0x402   : > { %3227 = vmatmul.msk.f32.vlgmr.msrb.gmra.mxu3 %vm965_vm5, %v1060_v8  ;;  %v1323_v8 = vld [vmem:[#allocation5 + $0x140] sm:$0xff]  ;;  %1357 = vmatpush.msra.mxu0 %v1325_v7 }
 0x403   : > { %1231 = vmatpush.msrb.mxu3 %v873_v22  ;;  %1378 = vmatpush.msra.mxu1 %v1323_v8  ;;  %v1307_v22 = vld [vmem:[#allocation5 + $0xc0] sm:$0xff] }
 0x405   : > { %1232 = vmatpush.msrb.mxu3 %v872_v23  ;;  %v1305_v23 = vld [vmem:[#allocation5 + $0xb0] sm:$0xff] }
 0x407   : > { %1233 = vmatpush.msrb.mxu3 %v871_v24  ;;  %v1304_v24 = vld [vmem:[#allocation5 + $0xa8] sm:$0xff] }
 0x409   : > { %1234 = vmatpush.msrb.mxu3 %v870_v25  ;;  %v1302_v25 = vld [vmem:[#allocation5 + $0x98] sm:$0xff] }
 0x40a   : > { %1103 = vmatmul.f32.vlgmr.msra.gmra.mxu3 %v1086_v10 }
 0x40b   : > { %1235 = vmatpush.msrb.mxu3 %v869_v26  ;;  %v1301_v26 = vld [vmem:[#allocation5 + $0x90] sm:$0xff] }
 0x40d   : > { %1236 = vmatpush.msrb.mxu3 %v868_v27  ;;  %v1299_v27 = vld [vmem:[#allocation5 + $0x80] sm:$0xff] }
 0x40f   : > { %1237 = vmatpush.msrb.mxu3 %v867_v28  ;;  %v1298_v28 = vld [vmem:[#allocation5 + $0x78] sm:$0xff] }
 0x411   : > { %1238 = vmatpush.msrb.mxu3 %v866_v30  ;;  %v1295_v30 = vld [vmem:[#allocation5 + $0x60] sm:$0xff] }
 0x413   : > { %1239 = vmatpush.msrb.mxu3 %v865_v31  ;;  %v1293_v31 = vld [vmem:[#allocation5 + $0x50] sm:$0xff] }
 0x415   : > { %1240 = vmatpush.msrb.mxu3 %v864_v32  ;;  %v1292_v32 = vld [vmem:[#allocation5 + $0x48] sm:$0xff] }
 0x417   : > { %1241 = vmatpush.msrb.mxu3 %v863_v33  ;;  %v1290_v33 = vld [vmem:[#allocation5 + $0x38] sm:$0xff] }
 0x419   : > { %1242 = vmatpush.msrb.mxu3 %v862_v36  ;;  %v1286_v36 = vld [vmem:[#allocation5 + $0x18] sm:$0xff] }
 0x41b   : > { %1243 = vmatpush.msrb.mxu3 %v861_v47 }
 0x41d   : > { %1244 = vmatpush.msrb.mxu3 %v860_v49 }
 0x41f   : > { %1245 = vmatpush.msrb.mxu3 %v859_v51 }
 0x421   : > { %1246 = vmatpush.msrb.mxu3 %v858_v52  ;;  %v3394_v52 = vld [vmem:[%s4629_s16] ss:$0 sm:$0xff] }
 0x485   : > { %v1081_v11 = vpop.f32.mrf.mxu3 }
 0x486   : > { %v1084_v13 = vmul.f32 %v3994_v40, %v1081_v11 }
 0x488   : > { %v4014_v14 = vadd.f32 %v1084_v13, %v1013_v12  ;;  %v4079_v12 = vsel %vm787_vm0, 1.0, %v3727_v57  ;;  %v1313_v57 = vld [vmem:[#allocation5 + $0xf0] sm:$0xff] }
 0x48d   : > { %v1104_v15 = vpop.f32.mrf.mxu3 }
 0x48e   : > { %v1107_v16 = vsel %vm963_vm4, -1e+10, %v1104_v15  ;;  %v1322_v15 = vld [vmem:[#allocation5 + $0x138] sm:$0xff] }
 0x48f   : > { %v1108_v17 = vsel %vm965_vm5, %v1107_v16, -inf  ;;  %1358 = vmatpush.msra.mxu0 %v1322_v15  ;;  %v1318_v15 = vld [vmem:[#allocation5 + $0x118] sm:$0xff] }
 0x490   : > { %1109 = vmax.xlane.f32.xlu2 %v1108_v17  ;;  %v1319_v17 = vld [vmem:[#allocation5 + $0x120] sm:$0xff] }
 0x491   : > { %1359 = vmatpush.msra.mxu0 %v1319_v17  ;;  %v4121_v17 = vld [vmem:[%s780_s30] sm:$0xff]  ;;  %s3300_s30 = sshll.u32 %s3861_s3, 5 }
 0x492   : > { %vm1437_vm2 = vcmp.eq.f32.partialorder %v4121_v17, 0.0 }
 0x503   : > { %v1110_v18 = vpop.xlane.xlu2 %1109 }
 0x504   : > { %v1111_v19 = vsub.f32 %v1107_v16, %v1110_v18  ;;  %v1320_v16 = vld [vmem:[#allocation5 + $0x128] sm:$0xff]  ;;  %v1317_v18 = vld [vmem:[#allocation5 + $0x110] sm:$0xff] }
 0x505   : > { %1379 = vmatpush.msra.mxu1 %v1320_v16  ;;  %v1315_v16 = vld [vmem:[#allocation5 + $0x100] sm:$0xff] }
 0x506   : > { %v1112_v20 = vmul.f32 1.442695, %v1111_v19  ;;  %v1316_v19 = vld [vmem:[#allocation5 + $0x108] sm:$0xff] }
 0x507   : > { %1380 = vmatpush.msra.mxu1 %v1317_v18  ;;  %1360 = vmatpush.msra.mxu0 %v1316_v19  ;;  %v1312_v18 = vld [vmem:[#allocation5 + $0xe8] sm:$0xff]  ;;  %v1309_v19 = vld [vmem:[#allocation5 + $0xd0] sm:$0xff] }
 0x508   : > { %3426 = vpow2.f32 %v1112_v20  ;;  %v1311_v20 = vld [vmem:[#allocation5 + $0xe0] sm:$0xff] }
 0x509   : > { %1381 = vmatpush.msra.mxu1 %v1314_v50  ;;  %1361 = vmatpush.msra.mxu0 %v1313_v57  ;;  %v1306_v50 = vld [vmem:[#allocation5 + $0xb8] sm:$0xff] }
 0x50b   : > { %1382 = vmatpush.msra.mxu1 %v1311_v20 }
 0x50e   : > { %v3427_v60 = vpop.eup %3426 }
 0x50f   : > { %v1114_v21 = vsel %vm965_vm5, %v3427_v60, 0.0 }
 0x510   : > { %1115 = vadd.xlane.f32.xlu1 %v1114_v21  ;;  %v1308_v21 = vld [vmem:[#allocation5 + $0xc8] sm:$0xff] }
 0x511   : > { %1383 = vmatpush.msra.mxu1 %v1308_v21 }
 0x513   : > { %1384 = vmatpush.msra.mxu1 %v1305_v23 }
 0x515   : > { %1385 = vmatpush.msra.mxu1 %v1302_v25 }
 0x517   : > { %1386 = vmatpush.msra.mxu1 %v1299_v27 }
 0x583   : > { %v1116_v29 = vpop.xlane.xlu1 %1115 }
 0x584   : > { %3428 = vrcp.f32 %v1116_v29  ;;  %v1128_v38 = vand.u32 2147483648, %v1116_v29  ;;  %v1126_v41 = vand.u32 2147483647, %v1116_v29  ;;  %vm1122_vm12 = vweird.f32 %v1116_v29 }
 0x586   : > { %v1129_v43 = vor.u32 1.1754944e-38, %v1128_v38  ;;  %vm1127_vm14 = vcmp.eq.f32.partialorder %v1126_v41, 8.507059e+37  ;;  %v4093_v38 = vld [vmem:[%s4090_s18] sm:$0xff] }
 0x58a   : > { %v3429_v34 = vpop.eup %3428 }
 0x58b   : > { %v1118_v35 = vmul.f32 %v3429_v34, %v1116_v29  ;;  %vm1123_vm11 = vweird.f32 %v3429_v34  ;;  %v1296_v29 = vld [vmem:[#allocation5 + $0x68] sm:$0xff] }
 0x58c   : > { %vm1124_vm13 = vmor %vm1122_vm12, %vm1123_vm11  ;;  %1387 = vmatpush.msra.mxu1 %v1296_v29 }
 0x58d   : > { %v1119_v37 = vsub.f32 1.0, %v1118_v35  ;;  %v1287_v35 = vld [vmem:[#allocation5 + $0x20] sm:$0xff] }
 0x58e   : > { %1388 = vmatpush.msra.mxu1 %v1293_v31  ;;  %v1300_v31 = vld [vmem:[#allocation5 + $0x88] sm:$0xff] }
 0x58f   : > { %v1120_v39 = vmul.f32 %v3429_v34, %v1119_v37  ;;  %v1284_v37 = vld [vmem:[#allocation5 + $0x8] sm:$0xff] }
 0x590   : > { %1389 = vmatpush.msra.mxu1 %v1290_v33  ;;  %v1294_v33 = vld [vmem:[#allocation5 + $0x58] sm:$0xff] }
 0x591   : > { %v1121_v42 = vadd.f32 %v3429_v34, %v1120_v39  ;;  %v1283_v39 = vld [vmem:[#allocation5] sm:$0xff] }
 0x592   : > { %1390 = vmatpush.msra.mxu1 %v1287_v35  ;;  %v1288_v35 = vld [vmem:[#allocation5 + $0x28] sm:$0xff] }
 0x593   : > { %v1125_v44 = vsel %vm1124_vm13, %v3429_v34, %v1121_v42  ;;  %v1289_v34 = vld [vmem:[#allocation5 + $0x30] sm:$0xff] }
 0x594   : > { %v1130_v45 = vsel %vm1127_vm14, %v1129_v43, %v1125_v44  ;;  %1391 = vmatpush.msra.mxu1 %v1284_v37 }
 0x595   : > { %v1131_v46 = vmul.f32 %v3427_v60, %v1130_v45  ;;  %v1310_v60 = vld [vmem:[#allocation5 + $0xd8] sm:$0xff]  ;;  %1392 = vmatmul.f32.vlgmr.msra.gmra.mxu1 %v4093_v38 }
 0x596   : > { %1362 = vmatpush.msra.mxu0 %v1310_v60  ;;  %v1303_v60 = vld [vmem:[#allocation5 + $0xa0] sm:$0xff] }
 0x597   : > { %3228 = vmatmul.msk.f32.vlgmr.msrb.gmra.mxu0 %vm965_vm5, %v1131_v46 }
 0x598   : > { %1363 = vmatpush.msra.mxu0 %v1307_v22 }
 0x59a   : > { %1364 = vmatpush.msra.mxu0 %v1304_v24 }
 0x59c   : > { %1365 = vmatpush.msra.mxu0 %v1301_v26 }
 0x59e   : > { %1366 = vmatpush.msra.mxu0 %v1298_v28 }
 0x5a0   : > { %1367 = vmatpush.msra.mxu0 %v1295_v30 }
 0x5a2   : > { %1368 = vmatpush.msra.mxu0 %v1292_v32  ;;  %v1297_v32 = vld [vmem:[#allocation5 + $0x70] sm:$0xff] }
 0x5a4   : > { %1369 = vmatpush.msra.mxu0 %v1289_v34  ;;  %v1291_v34 = vld [vmem:[#allocation5 + $0x40] sm:$0xff] }
 0x5a6   : > { %1370 = vmatpush.msra.mxu0 %v1286_v36  ;;  %v1285_v36 = vld [vmem:[#allocation5 + $0x10] sm:$0xff] }
 0x5a8   : > { %1371 = vmatpush.msra.mxu0 %v1283_v39 }
 0x614   : > { %v1152_v54 = vpop.f32.mrf.mxu0 }
 0x615   : > { %v1155_v56 = vmul.f32 %v4008_v9, %v1152_v54 }
 0x617   : > { %v1156_v62 = vadd.f32 %v1155_v56, %v4014_v14  ;;  %v3395_v56 = vld [vmem:[%s4630_s17] ss:$0 sm:$0xff] }
 0x619   : > { %v1227_v55 = vadd.f32 %v1226_v61, %v1156_v62 }
 0x61b   : > { %1247 = vmatmul.f32.vlgmr.msrb.gmra.mxu3 %v1227_v55  ;;  %v4109_v55 = vld [vmem:[%s4681_s9] sm:$0x7] }
 0x69e   : > { %v1248_v0 = vpop.f32.mrf.mxu3 }
 0x69f   : > { %v1249_v1 = vadd.f32 %v3393_v63, %v1248_v0  ;;  %v1351_v63 = vperm.slane %v4109_v55, 1  ;;  %v1393_v0 = vpop.f32.mrf.mxu1 }
 0x6a1   : > { %v1251_v3 = vadd.f32 %v1249_v1, %v3943_v48  ;;  %v1394_v1 = vadd.f32 %v1393_v0, %v1351_v63 }
 0x6a3   : > { %1254 = vadd.xlane.f32.xlu2 %v1251_v3  ;;  %1432 = vmatpush.xpose.msra.mxu3 %v1394_v1 }
 0x6a4   : > { %1504 = vmatpush.xpose.msrb.mxu1 %v1394_v1 }
 0x6a7   : > { %1575 = vmatpush.xpose.msrb.mxu3 %v1394_v1 }
 0x6a8   : > { %1646 = vmatpush.xpose.msra.mxu1 %v1394_v1 }
 0x716   : > { %v1255_v10 = vpop.xlane.xlu2 %1254 }
 0x717   : > { %v1256_v11 = vmul.f32 0.0625, %v1255_v10 }
 0x719   : > { %v1257_v13 = vsub.f32 %v1251_v3, %v1256_v11  ;;  %v1350_v3 = vperm.slane %v4109_v55, 0  ;;  %v1330_v11 = vld [vmem:[#allocation5 + $0x178] sm:$0xff] }
 0x71a   : > { %1396 = vmatpush.msra.mxu2 %v1330_v11  ;;  %v1344_v11 = vld [vmem:[%s4683_s10 + $0x60] sm:$0xff] }
 0x71b   : > { %v4082_v48 = vmul.f32 %v4079_v12, %v1257_v13  ;;  %v1327_v13 = vld [vmem:[#allocation5 + $0x160] sm:$0xff] }
 0x71c   : > { %1397 = vmatpush.msra.mxu2 %v1327_v13 }
 0x71d   : > { %v1259_v14 = vmul.f32 %v4082_v48, %v4082_v48 }
 0x71f   : > { %1260 = vadd.xlane.f32.xlu0 %v1259_v14  ;;  %v1321_v14 = vld [vmem:[#allocation5 + $0x130] sm:$0xff] }
 0x792   : > { %v1261_v41 = vpop.xlane.xlu0 %1260 }
 0x793   : > { %v1262_v42 = vmul.f32 0.0625, %v1261_v41 }
 0x795   : > { %v1263_v43 = vadd.f32 1e-05, %v1262_v42 }
 0x797   : > { %3430 = vrsqrt.f32 %v1263_v43  ;;  %vm1270_vm15 = vweird.f32 %v1263_v43 }
 0x79d   : > { %v3431_v44 = vpop.eup %3430 }
 0x79e   : > { %v1265_v45 = vmul.f32 %v3431_v44, %v1263_v43  ;;  %vm1271_vm0 = vweird.f32 %v3431_v44 }
 0x79f   : > { %vm1272_vm1 = vmor %vm1270_vm15, %vm1271_vm0 }
 0x7a0   : > { %v1266_v46 = vmul.f32 %v3431_v44, %v1265_v45 }
 0x7a2   : > { %v1267_v47 = vmul.f32 0.5, %v1266_v46 }
 0x7a4   : > { %v1268_v49 = vsub.f32 1.5, %v1267_v47 }
 0x7a6   : > { %v1269_v51 = vmul.f32 %v3431_v44, %v1268_v49 }
 0x7a8   : > { %v1273_v53 = vsel %vm1272_vm1, %v3431_v44, %v1269_v51 }
 0x7a9   : > { %v1274_v54 = vmul.f32 %v1273_v53, %v4082_v48  ;;  %v1324_v48 = vld [vmem:[#allocation5 + $0x148] sm:$0xff] }
 0x7aa   : > { %1398 = vmatpush.msra.mxu2 %v1324_v48 }
 0x7ab   : > { %v1278_v61 = vmul.f32 %v3394_v52, %v1274_v54 }
 0x7ac   : > { %1399 = vmatpush.msra.mxu2 %v1321_v14 }
 0x7ad   : > { %v4103_v62 = vadd.f32 %v3395_v56, %v1278_v61 }
 0x7ae   : > { %1400 = vmatpush.msra.mxu2 %v1318_v15  ;;  %v1343_v15 = vld [vmem:[%s4683_s10 + $0x58] sm:$0xff] }
 0x7af   : > { %1372 = vmatmul.f32.vlgmr.msra.gmra.mxu0 %v4103_v62 }
 0x7b0   : > { %1401 = vmatpush.msra.mxu2 %v1315_v16 }
 0x7b2   : > { %1402 = vmatpush.msra.mxu2 %v1312_v18  ;;  %v1342_v18 = vld [vmem:[%s4683_s10 + $0x50] sm:$0xff] }
 0x7b4   : > { %1403 = vmatpush.msra.mxu2 %v1309_v19 }
 0x7b6   : > { %1404 = vmatpush.msra.mxu2 %v1306_v50 }
 0x7b8   : > { %1405 = vmatpush.msra.mxu2 %v1303_v60 }
 0x7ba   : > { %1406 = vmatpush.msra.mxu2 %v1300_v31 }
 0x7bc   : > { %1407 = vmatpush.msra.mxu2 %v1297_v32 }
 0x7be   : > { %1408 = vmatpush.msra.mxu2 %v1294_v33 }
 0x7c0   : > { %1409 = vmatpush.msra.mxu2 %v1291_v34 }
 0x7c2   : > { %1410 = vmatpush.msra.mxu2 %v1288_v35 }
 0x7c4   : > { %1411 = vmatpush.msra.mxu2 %v1285_v36 }
 0x7c5   : > { %1412 = vmatmul.f32.vlgmr.msra.gmra.mxu2 %v4093_v38 }
 0x82c   : > { %v1373_v4 = vpop.f32.mrf.mxu0 }
 0x82d   : > { %v1374_v5 = vadd.f32 %v1373_v4, %v1350_v3  ;;  %v1352_v3 = vperm.slane %v4109_v55, 2  ;;  %v1345_v55 = vld [vmem:[%s4683_s10 + $0x68] sm:$0xff] }
 0x82f   : > { %v1416_v6 = vmul.f32 %v3961_v58, %v1374_v5  ;;  %v1488_v7 = vmul.f32 %v3994_v40, %v1374_v5  ;;  %v1559_v8 = vmul.f32 %v4008_v9, %v1374_v5  ;;  %v1630_v10 = vmul.f32 %v3964_v59, %v1374_v5 }
 0x831   : > { %1433 = vmatmul.f32.vlgmr.msra.gmra.mxu3 %v1416_v6  ;;  %1505 = vmatmul.f32.vlgmr.msrb.gmra.mxu1 %v1488_v7  ;;  %v1347_v7 = vld [vmem:[%s4683_s10 + $0x78] sm:$0xff] }
 0x832   : > { %1704 = vmatpush.msra.mxu3 %v1347_v7 }
 0x839   : > { %1576 = vmatmul.f32.vlgmr.msrb.gmra.mxu3 %v1559_v8  ;;  %1647 = vmatmul.f32.vlgmr.msra.gmra.mxu1 %v1630_v10  ;;  %v1346_v8 = vld [vmem:[%s4683_s10 + $0x70] sm:$0xff] }
 0x83a   : > { %1705 = vmatpush.msra.mxu3 %v1346_v8  ;;  %v1339_v8 = vld [vmem:[%s4683_s10 + $0x38] sm:$0xff] }
 0x83c   : > { %1706 = vmatpush.msra.mxu3 %v1345_v55  ;;  %v1337_v55 = vld [vmem:[%s4683_s10 + $0x28] sm:$0xff] }
 0x83e   : > { %1707 = vmatpush.msra.mxu3 %v1344_v11  ;;  %v1334_v11 = vld [vmem:[%s4683_s10 + $0x10] sm:$0xff] }
 0x840   : > { %1708 = vmatpush.msra.mxu3 %v1343_v15 }
 0x842   : > { %1709 = vmatpush.msra.mxu3 %v1342_v18 }
 0x848   : > { %v1413_v4 = vpop.f32.mrf.mxu2 }
 0x849   : > { %v1414_v5 = vadd.f32 %v1413_v4, %v1352_v3 }
 0x84b   : > { %1481 = vmatpush.msrb.mxu0 %v1414_v5  ;;  %1552 = vmatpush.msrb.mxu2 %v1414_v5 }
 0x84d   : > { %1623 = vmatpush.msra.mxu0 %v1414_v5  ;;  %1694 = vmatpush.msra.mxu2 %v1414_v5 }
 0x8ae   : > { %v1506_v57 = vpop.f32.mrf.mxu1 }
 0x8af   : > { %v1509_v20 = vsel %vm1437_vm2, -1e+10, %v1506_v57 }
 0x8b0   : > { %v1510_v21 = vsel %vm965_vm5, %v1509_v20, -inf }
 0x8b1   : > { %1511 = vmax.xlane.f32.xlu1 %v1510_v21 }
 0x8b4   : > { %v1434_v22 = vpop.f32.mrf.mxu3 }
 0x8b5   : > { %v1438_v23 = vsel %vm1437_vm2, -1e+10, %v1434_v22 }
 0x8b6   : > { %v1648_v24 = vpop.f32.mrf.mxu1  ;;  %v1439_v25 = vsel %vm965_vm5, %v1438_v23, -inf }
 0x8b7   : > { %v1651_v26 = vsel %vm1437_vm2, -1e+10, %v1648_v24  ;;  %1440 = vmax.xlane.f32.xlu2 %v1439_v25  ;;  %v1340_v24 = vld [vmem:[%s4683_s10 + $0x40] sm:$0xff] }
 0x8b8   : > { %v1652_v27 = vsel %vm965_vm5, %v1651_v26, -inf }
 0x8b9   : > { %1653 = vmax.xlane.f32.xlu0 %v1652_v27 }
 0x8bc   : > { %v1577_v28 = vpop.f32.mrf.mxu3 }
 0x8bd   : > { %v1580_v29 = vsel %vm1437_vm2, -1e+10, %v1577_v28 }
 0x8be   : > { %v1581_v30 = vsel %vm965_vm5, %v1580_v29, -inf }
 0x8bf   : > { %1582 = vmax.xlane.f32.xlu1 %v1581_v30 }
 0x924   : > { %v1512_v37 = vpop.xlane.xlu1 %1511 }
 0x925   : > { %v1513_v39 = vsub.f32 %v1509_v20, %v1512_v37  ;;  %v1341_v20 = vld [vmem:[%s4683_s10 + $0x48] sm:$0xff] }
 0x926   : > { %1710 = vmatpush.msra.mxu3 %v1341_v20 }
 0x927   : > { %v1514_v41 = vmul.f32 1.442695, %v1513_v39 }
 0x928   : > { %1711 = vmatpush.msra.mxu3 %v1340_v24 }
 0x929   : > { %3432 = vpow2.f32 %v1514_v41 }
 0x92a   : > { %v1441_v42 = vpop.xlane.xlu2 %1440  ;;  %1712 = vmatpush.msra.mxu3 %v1339_v8 }
 0x92b   : > { %v1442_v43 = vsub.f32 %v1438_v23, %v1441_v42 }
 0x92c   : > { %v1654_v44 = vpop.xlane.xlu0 %1653 }
 0x92d   : > { %v1443_v45 = vmul.f32 1.442695, %v1442_v43  ;;  %v1655_v46 = vsub.f32 %v1651_v26, %v1654_v44 }
 0x92f   : > { %v4137_v47 = vpop.eup %3432  ;;  %3434 = vpow2.f32 %v1443_v45  ;;  %v1656_v49 = vmul.f32 1.442695, %v1655_v46 }
 0x930   : > { %v1516_v51 = vsel %vm965_vm5, %v4137_v47, 0.0 }
 0x931   : > { %3436 = vpow2.f32 %v1656_v49  ;;  %1517 = vadd.xlane.f32.xlu2 %v1516_v51 }
 0x932   : > { %v1583_v52 = vpop.xlane.xlu1 %1582 }
 0x933   : > { %v1584_v38 = vsub.f32 %v1580_v29, %v1583_v52 }
 0x935   : > { %v4141_v53 = vpop.eup %3434  ;;  %v1585_v54 = vmul.f32 1.442695, %v1584_v38 }
 0x936   : > { %v1445_v56 = vsel %vm965_vm5, %v4141_v53, 0.0 }
 0x937   : > { %v4145_v61 = vpop.eup %3436  ;;  %3438 = vpow2.f32 %v1585_v54  ;;  %1446 = vadd.xlane.f32.xlu0 %v1445_v56 }
 0x938   : > { %v1658_v63 = vsel %vm965_vm5, %v4145_v61, 0.0 }
 0x939   : > { %1659 = vadd.xlane.f32.xlu1 %v1658_v63 }
 0x93d   : > { %v4149_v0 = vpop.eup %3438 }
 0x93e   : > { %v1587_v1 = vsel %vm965_vm5, %v4149_v0, 0.0 }
 0x93f   : > { %1588 = vadd.xlane.f32.xlu2 %v1587_v1 }
 0x9a4   : > { %v1518_v6 = vpop.xlane.xlu2 %1517 }
 0x9a5   : > { %3440 = vrcp.f32 %v1518_v6  ;;  %v1530_v19 = vand.u32 2147483648, %v1518_v6  ;;  %v1528_v57 = vand.u32 2147483647, %v1518_v6  ;;  %vm1524_vm6 = vweird.f32 %v1518_v6 }
 0x9a7   : > { %v1531_v26 = vor.u32 1.1754944e-38, %v1530_v19  ;;  %vm1529_vm8 = vcmp.eq.f32.partialorder %v1528_v57, 8.507059e+37 }
 0x9aa   : > { %v1447_v10 = vpop.xlane.xlu0 %1446 }
 0x9ab   : > { %v3441_v13 = vpop.eup %3440  ;;  %3442 = vrcp.f32 %v1447_v10  ;;  %v1457_v31 = vand.u32 2147483647, %v1447_v10  ;;  %v1459_v32 = vand.u32 2147483648, %v1447_v10  ;;  %vm1453_vm10 = vweird.f32 %v1447_v10 }
 0x9ac   : > { %v1520_v48 = vmul.f32 %v3441_v13, %v1518_v6  ;;  %v1660_v14 = vpop.xlane.xlu1 %1659  ;;  %vm1525_vm3 = vweird.f32 %v3441_v13 }
 0x9ad   : > { %3444 = vrcp.f32 %v1660_v14  ;;  %vm1526_vm7 = vmor %vm1524_vm6, %vm1525_vm3  ;;  %v1672_v36 = vand.u32 2147483648, %v1660_v14  ;;  %v1670_v41 = vand.u32 2147483647, %v1660_v14  ;;  %vm1458_vm13 = vcmp.eq.f32.partialorder %v1457_v31, 8.507059e+37 }
 0x9ae   : > { %v1521_v16 = vsub.f32 1.0, %v1520_v48  ;;  %v1460_v43 = vor.u32 1.1754944e-38, %v1459_v32  ;;  %vm1666_vm14 = vweird.f32 %v1660_v14  ;;  %v1332_v48 = vld [vmem:[%s4683_s10] sm:$0xff] }
 0x9af   : > { %v1673_v51 = vor.u32 1.1754944e-38, %v1672_v36  ;;  %vm1671_vm15 = vcmp.eq.f32.partialorder %v1670_v41, 8.507059e+37  ;;  %v1768_v36 = vld [vmem:[#allocation7 + $0x50] sm:$0xff]  ;;  %v1765_v41 = vld [vmem:[#allocation7 + $0x38] sm:$0xff] }
 0x9b0   : > { %v1522_v50 = vmul.f32 %v3441_v13, %v1521_v16 }
 0x9b1   : > { %v3443_v60 = vpop.eup %3442 }
 0x9b2   : > { %v1523_v21 = vadd.f32 %v3441_v13, %v1522_v50  ;;  %v1449_v22 = vmul.f32 %v3443_v60, %v1447_v10  ;;  %v1589_v23 = vpop.xlane.xlu2 %1588  ;;  %vm1454_vm9 = vweird.f32 %v3443_v60  ;;  %v1335_v10 = vld [vmem:[%s4683_s10 + $0x18] sm:$0xff] }
 0x9b3   : > { %v3445_v25 = vpop.eup %3444  ;;  %3446 = vrcp.f32 %v1589_v23  ;;  %vm1455_vm12 = vmor %vm1453_vm10, %vm1454_vm9  ;;  %v1601_v56 = vand.u32 2147483648, %v1589_v23  ;;  %v1599_v1 = vand.u32 2147483647, %v1589_v23  ;;  %vm1595_vm3 = vweird.f32 %v1589_v23 }
 0x9b4   : > { %v1527_v27 = vsel %vm1526_vm7, %v3441_v13, %v1523_v21  ;;  %v1450_v28 = vsub.f32 1.0, %v1449_v22  ;;  %v1662_v29 = vmul.f32 %v3445_v25, %v1660_v14  ;;  %vm1667_vm11 = vweird.f32 %v3445_v25  ;;  %v1333_v13 = vld [vmem:[%s4683_s10 + $0x8] sm:$0xff] }
 0x9b5   : > { %v1532_v30 = vsel %vm1529_vm8, %v1531_v26, %v1527_v27  ;;  %vm1668_vm0 = vmor %vm1666_vm14, %vm1667_vm11  ;;  %v1602_v5 = vor.u32 1.1754944e-38, %v1601_v56  ;;  %vm1600_vm7 = vcmp.eq.f32.partialorder %v1599_v1, 8.507059e+37  ;;  %v1773_v27 = vld [vmem:[#allocation7 + $0x78] sm:$0xff] }
 0x9b6   : > { %v1451_v33 = vmul.f32 %v3443_v60, %v1450_v28  ;;  %v1663_v34 = vsub.f32 1.0, %v1662_v29  ;;  %v1533_v35 = vmul.f32 %v4137_v47, %v1532_v30  ;;  %v1772_v28 = vld [vmem:[#allocation7 + $0x70] sm:$0xff] }
 0x9b8   : > { %v1452_v37 = vadd.f32 %v3443_v60, %v1451_v33  ;;  %v1664_v39 = vmul.f32 %v3445_v25, %v1663_v34  ;;  %3231 = vmatmul.msk.f32.vlgmr.msrb.gmra.mxu2 %vm965_vm5, %v1533_v35  ;;  %v1771_v34 = vld [vmem:[#allocation7 + $0x68] sm:$0xff]  ;;  %v1770_v35 = vld [vmem:[#allocation7 + $0x60] sm:$0xff] }
 0x9b9   : > { %v3447_v42 = vpop.eup %3446 }
 0x9ba   : > { %v1456_v44 = vsel %vm1455_vm12, %v3443_v60, %v1452_v37  ;;  %v1665_v45 = vadd.f32 %v3445_v25, %v1664_v39  ;;  %v1591_v46 = vmul.f32 %v3447_v42, %v1589_v23  ;;  %vm1596_vm1 = vweird.f32 %v3447_v42  ;;  %v3396_v23 = vld [vmem:[%s4624_s11] ss:$0 sm:$0xff]  ;;  %v1767_v37 = vld [vmem:[#allocation7 + $0x48] sm:$0xff] }
 0x9bb   : > { %v1461_v49 = vsel %vm1458_vm13, %v1460_v43, %v1456_v44  ;;  %vm1597_vm6 = vmor %vm1595_vm3, %vm1596_vm1  ;;  %v1766_v39 = vld [vmem:[#allocation7 + $0x40] sm:$0xff]  ;;  %v1763_v43 = vld [vmem:[#allocation7 + $0x28] sm:$0xff] }
 0x9bc   : > { %v1669_v47 = vsel %vm1668_vm0, %v3445_v25, %v1665_v45  ;;  %v1592_v52 = vsub.f32 1.0, %v1591_v46  ;;  %v1462_v38 = vmul.f32 %v4141_v53, %v1461_v49  ;;  %v1762_v44 = vld [vmem:[#allocation7 + $0x20] sm:$0xff]  ;;  %v1761_v45 = vld [vmem:[#allocation7 + $0x18] sm:$0xff]  ;;  %v1760_v46 = vld [vmem:[#allocation7 + $0x10] sm:$0xff] }
 0x9bd   : > { %v1674_v54 = vsel %vm1671_vm15, %v1673_v51, %v1669_v47  ;;  %v1759_v49 = vld [vmem:[#allocation7 + $0x8] sm:$0xff]  ;;  %v1758_v51 = vld [vmem:[#allocation7] sm:$0xff]  ;;  %v1814_v47 = vld [vmem:[#allocation8 + $0x78] sm:$0xff] }
 0x9be   : > { %v1593_v63 = vmul.f32 %v3447_v42, %v1592_v52  ;;  %3230 = vmatmul.msk.f32.vlgmr.msrb.gmra.mxu0 %vm965_vm5, %v1462_v38  ;;  %v1675_v3 = vmul.f32 %v4145_v61, %v1674_v54  ;;  %v1338_v61 = vld [vmem:[%s4683_s10 + $0x30] sm:$0xff]  ;;  %1819 = vmatpush.msrb.mxu1 %v1814_v47  ;;  %v1812_v38 = vld [vmem:[#allocation8 + $0x68] sm:$0xff] }
 0x9bf   : > { %1713 = vmatpush.msra.mxu3 %v1338_v61  ;;  %1778 = vmatpush.msrb.mxu0 %v1773_v27  ;;  %v1813_v52 = vld [vmem:[#allocation8 + $0x70] sm:$0xff] }
 0x9c0   : > { %v1594_v4 = vadd.f32 %v3447_v42, %v1593_v63  ;;  %3233 = vmatmul.msk.f32.vlgmr.msra.gmra.mxu2 %vm965_vm5, %v1675_v3  ;;  %1820 = vmatpush.msrb.mxu1 %v1813_v52  ;;  %v1811_v63 = vld [vmem:[#allocation8 + $0x60] sm:$0xff]  ;;  %v1810_v3 = vld [vmem:[#allocation8 + $0x58] sm:$0xff]  ;;  %v1805_v61 = vld [vmem:[#allocation8 + $0x30] sm:$0xff] }
 0x9c1   : > { %1714 = vmatpush.msra.mxu3 %v1337_v55  ;;  %1779 = vmatpush.msrb.mxu0 %v1772_v28  ;;  %v1908_v47 = vld [vmem:[#allocation2 + $0x290] sm:$0xff]  ;;  %v1909_v52 = vld [vmem:[#allocation2 + $0x298] sm:$0xff] }
 0x9c2   : > { %v1598_v6 = vsel %vm1597_vm6, %v3447_v42, %v1594_v4  ;;  %v1764_v42 = vld [vmem:[#allocation7 + $0x30] sm:$0xff]  ;;  %1821 = vmatpush.msrb.mxu1 %v1812_v38 }
 0x9c3   : > { %v1603_v7 = vsel %vm1600_vm7, %v1602_v5, %v1598_v6  ;;  %1780 = vmatpush.msrb.mxu0 %v1771_v34  ;;  %v1809_v4 = vld [vmem:[#allocation8 + $0x50] sm:$0xff]  ;;  %v1808_v5 = vld [vmem:[#allocation8 + $0x48] sm:$0xff]  ;;  %v1807_v6 = vld [vmem:[#allocation8 + $0x40] sm:$0xff] }
 0x9c4   : > { %v1604_v53 = vmul.f32 %v4149_v0, %v1603_v7  ;;  %v1336_v0 = vld [vmem:[%s4683_s10 + $0x20] sm:$0xff]  ;;  %1822 = vmatpush.msrb.mxu1 %v1811_v63  ;;  %v1917_v34 = vld [vmem:[#allocation2 + $0x2d8] sm:$0xff]  ;;  %v1904_v38 = vld [vmem:[#allocation2 + $0x270] sm:$0xff] }
 0x9c5   : > { %1715 = vmatpush.msra.mxu3 %v1336_v0  ;;  %1781 = vmatpush.msrb.mxu0 %v1770_v35  ;;  %v1804_v0 = vld [vmem:[#allocation8 + $0x28] sm:$0xff]  ;;  %v1918_v35 = vld [vmem:[#allocation2 + $0x2e0] sm:$0xff]  ;;  %v1901_v63 = vld [vmem:[#allocation2 + $0x258] sm:$0xff] }
 0x9c6   : > { %3232 = vmatmul.msk.f32.vlgmr.msra.gmra.mxu0 %vm965_vm5, %v1604_v53  ;;  %1823 = vmatpush.msrb.mxu1 %v1810_v3  ;;  %v1806_v53 = vld [vmem:[#allocation8 + $0x38] sm:$0xff]  ;;  %v1903_v3 = vld [vmem:[#allocation2 + $0x268] sm:$0xff] }
 0x9c7   : > { %1716 = vmatpush.msra.mxu3 %v1335_v10 }
 0x9c8   : > { %1824 = vmatpush.msrb.mxu1 %v1809_v4  ;;  %v1898_v4 = vld [vmem:[#allocation2 + $0x240] sm:$0xff] }
 0x9c9   : > { %1717 = vmatpush.msra.mxu3 %v1334_v11  ;;  %v1803_v11 = vld [vmem:[#allocation8 + $0x20] sm:$0xff] }
 0x9ca   : > { %1825 = vmatpush.msrb.mxu1 %v1808_v5  ;;  %v1899_v5 = vld [vmem:[#allocation2 + $0x248] sm:$0xff] }
 0x9cb   : > { %1718 = vmatpush.msra.mxu3 %v1333_v13 }
 0x9cc   : > { %1826 = vmatpush.msrb.mxu1 %v1807_v6  ;;  %v1900_v6 = vld [vmem:[#allocation2 + $0x250] sm:$0xff] }
 0x9cd   : > { %1719 = vmatpush.msra.mxu3 %v1332_v48  ;;  %v1802_v48 = vld [vmem:[#allocation8 + $0x18] sm:$0xff] }
 0x9ce   : > { %1827 = vmatpush.msrb.mxu1 %v1806_v53  ;;  %v1896_v53 = vld [vmem:[#allocation2 + $0x230] sm:$0xff] }
 0x9d0   : > { %1828 = vmatpush.msrb.mxu1 %v1805_v61  ;;  %v1892_v61 = vld [vmem:[#allocation2 + $0x210] sm:$0xff] }
 0x9d2   : > { %1829 = vmatpush.msrb.mxu1 %v1804_v0  ;;  %v1894_v0 = vld [vmem:[#allocation2 + $0x220] sm:$0xff] }
 0x9d4   : > { %1830 = vmatpush.msrb.mxu1 %v1803_v11  ;;  %v1890_v11 = vld [vmem:[#allocation2 + $0x200] sm:$0xff] }
 0x9d6   : > { %1831 = vmatpush.msrb.mxu1 %v1802_v48  ;;  %v1886_v48 = vld [vmem:[#allocation2 + $0x1e0] sm:$0xff] }
 0xa3b   : > { %v1483_v14 = vpop.f32.mrf.mxu0  ;;  %v1554_v15 = vpop.f32.mrf.mxu2 }
 0xa3c   : > { %v1486_v16 = vmul.f32 %v3961_v58, %v1483_v14  ;;  %v1557_v18 = vmul.f32 %v3994_v40, %v1554_v15  ;;  %v3397_v15 = vld [vmem:[%s4629_s16 + $0x1] ss:$0 sm:$0xff] }
 0xa3e   : > { %v1558_v57 = vadd.f32 %v1557_v18, %v1486_v16 }
 0xa43   : > { %v1625_v19 = vpop.f32.mrf.mxu0  ;;  %v1696_v50 = vpop.f32.mrf.mxu2 }
 0xa44   : > { %v1628_v20 = vmul.f32 %v4008_v9, %v1625_v19  ;;  %v1699_v21 = vmul.f32 %v3964_v59, %v1696_v50  ;;  %v3398_v19 = vld [vmem:[%s4630_s17 + $0x1] ss:$0 sm:$0xff] }
 0xa46   : > { %v1629_v60 = vadd.f32 %v1628_v20, %v1558_v57  ;;  %v1801_v20 = vld [vmem:[#allocation8 + $0x10] sm:$0xff] }
 0xa47   : > { %1832 = vmatpush.msrb.mxu1 %v1801_v20  ;;  %v1882_v20 = vld [vmem:[#allocation2 + $0x1c0] sm:$0xff] }
 0xa48   : > { %v1700_v22 = vadd.f32 %v1699_v21, %v1629_v60  ;;  %v1800_v60 = vld [vmem:[#allocation8 + $0x8] sm:$0xff]  ;;  %v1799_v21 = vld [vmem:[#allocation8] sm:$0xff] }
 0xa49   : > { %1833 = vmatpush.msrb.mxu1 %v1800_v60  ;;  %v1877_v60 = vld [vmem:[#allocation2 + $0x198] sm:$0xff] }
 0xa4a   : > { %1720 = vmatmul.f32.vlgmr.msra.gmra.mxu3 %v1700_v22  ;;  %v3399_v22 = vld [vmem:[%s4626_s13] ss:$0 sm:$0xff] }
 0xa4b   : > { %1834 = vmatpush.msrb.mxu1 %v1799_v21  ;;  %v1878_v21 = vld [vmem:[#allocation2 + $0x1a0] sm:$0xff] }
 0xacd   : > { %v1721_v24 = vpop.f32.mrf.mxu3 }
 0xace   : > { %v1722_v25 = vadd.f32 %v3396_v23, %v1721_v24 }
 0xad0   : > { %v1724_v26 = vadd.f32 %v1722_v25, %v4103_v62  ;;  %v1769_v62 = vld [vmem:[#allocation7 + $0x58] sm:$0xff] }
 0xad1   : > { %1782 = vmatpush.msrb.mxu0 %v1769_v62 }
 0xad2   : > { %1729 = vadd.xlane.f32.xlu0 %v1724_v26 }
 0xad3   : > { %1783 = vmatpush.msrb.mxu0 %v1768_v36 }
 0xad5   : > { %1784 = vmatpush.msrb.mxu0 %v1767_v37 }
 0xad7   : > { %1785 = vmatpush.msrb.mxu0 %v1766_v39 }
 0xad9   : > { %1786 = vmatpush.msrb.mxu0 %v1765_v41 }
 0xadb   : > { %1787 = vmatpush.msrb.mxu0 %v1764_v42  ;;  %v1913_v42 = vld [vmem:[#allocation2 + $0x2b8] sm:$0xff] }
 0xadd   : > { %1788 = vmatpush.msrb.mxu0 %v1763_v43  ;;  %v1914_v43 = vld [vmem:[#allocation2 + $0x2c0] sm:$0xff] }
 0xadf   : > { %1789 = vmatpush.msrb.mxu0 %v1762_v44  ;;  %v1915_v44 = vld [vmem:[#allocation2 + $0x2c8] sm:$0xff] }
 0xae1   : > { %1790 = vmatpush.msrb.mxu0 %v1761_v45  ;;  %v1910_v45 = vld [vmem:[#allocation2 + $0x2a0] sm:$0xff] }
 0xae3   : > { %1791 = vmatpush.msrb.mxu0 %v1760_v46  ;;  %v1911_v46 = vld [vmem:[#allocation2 + $0x2a8] sm:$0xff] }
 0xae5   : > { %1792 = vmatpush.msrb.mxu0 %v1759_v49  ;;  %v1912_v49 = vld [vmem:[#allocation2 + $0x2b0] sm:$0xff] }
 0xae7   : > { %1793 = vmatpush.msrb.mxu0 %v1758_v51  ;;  %v1907_v51 = vld [vmem:[#allocation2 + $0x288] sm:$0xff] }
 0xb45   : > { %v1730_v29 = vpop.xlane.xlu0 %1729 }
 0xb46   : > { %v1731_v30 = vmul.f32 0.0625, %v1730_v29 }
 0xb48   : > { %v1732_v31 = vsub.f32 %v1724_v26, %v1731_v30  ;;  %v3400_v26 = vld [vmem:[%s4628_s15] ss:$0 sm:$0xff]  ;;  %v1919_v30 = vld [vmem:[#allocation2 + $0x2e8] sm:$0xff] }
 0xb49   : > { %1950 = vmatpush.msrb.mxu2 %v1919_v30 }
 0xb4a   : > { %v4219_v32 = vmul.f32 %v4079_v12, %v1732_v31  ;;  %v1920_v31 = vld [vmem:[#allocation2 + $0x2f0] sm:$0xff] }
 0xb4b   : > { %1970 = vmatpush.msrb.mxu3 %v1920_v31 }
 0xb4c   : > { %v1734_v33 = vmul.f32 %v4219_v32, %v4219_v32 }
 0xb4d   : > { %1971 = vmatpush.msrb.mxu3 %v1917_v34 }
 0xb4e   : > { %1735 = vadd.xlane.f32.xlu1 %v1734_v33  ;;  %v1916_v33 = vld [vmem:[#allocation2 + $0x2d0] sm:$0xff] }
 0xb4f   : > { %1951 = vmatpush.msrb.mxu2 %v1916_v33  ;;  %1972 = vmatpush.msrb.mxu3 %v1914_v43  ;;  %v3238_v43 = vld [vmem:[%s4676_s23 + $0x3] sm:$0x7] }
 0xb51   : > { %1952 = vmatpush.msrb.mxu2 %v1913_v42  ;;  %1973 = vmatpush.msrb.mxu3 %v1911_v46  ;;  %v1944_v46 = vperm.slane %v3238_v43, 0 }
 0xb53   : > { %1953 = vmatpush.msrb.mxu2 %v1910_v45  ;;  %1974 = vmatpush.msrb.mxu3 %v1908_v47 }
 0xb55   : > { %1954 = vmatpush.msrb.mxu2 %v1907_v51 }
 0xb57   : > { %1955 = vmatpush.msrb.mxu2 %v1904_v38 }
 0xb59   : > { %1956 = vmatpush.msrb.mxu2 %v1901_v63 }
 0xb5b   : > { %1957 = vmatpush.msrb.mxu2 %v1898_v4 }
 0xbc1   : > { %v1736_v54 = vpop.xlane.xlu1 %1735 }
 0xbc2   : > { %v1737_v56 = vmul.f32 0.0625, %v1736_v54  ;;  %v1905_v54 = vld [vmem:[#allocation2 + $0x278] sm:$0xff] }
 0xbc3   : > { %1975 = vmatpush.msrb.mxu3 %v1905_v54 }
 0xbc4   : > { %v1738_v1 = vadd.f32 1e-05, %v1737_v56  ;;  %v1906_v56 = vld [vmem:[#allocation2 + $0x280] sm:$0xff] }
 0xbc6   : > { %3448 = vrsqrt.f32 %v1738_v1  ;;  %vm1745_vm9 = vweird.f32 %v1738_v1 }
 0xbcc   : > { %v3449_v7 = vpop.eup %3448 }
 0xbcd   : > { %v1740_v8 = vmul.f32 %v3449_v7, %v1738_v1  ;;  %vm1746_vm8 = vweird.f32 %v3449_v7  ;;  %v1902_v1 = vld [vmem:[#allocation2 + $0x260] sm:$0xff] }
 0xbce   : > { %vm1747_vm10 = vmor %vm1745_vm9, %vm1746_vm8  ;;  %1976 = vmatpush.msrb.mxu3 %v1902_v1 }
 0xbcf   : > { %v1741_v55 = vmul.f32 %v3449_v7, %v1740_v8  ;;  %v1897_v8 = vld [vmem:[#allocation2 + $0x238] sm:$0xff] }
 0xbd0   : > { %1977 = vmatpush.msrb.mxu3 %v1899_v5 }
 0xbd1   : > { %v1742_v10 = vmul.f32 0.5, %v1741_v55  ;;  %v1893_v55 = vld [vmem:[#allocation2 + $0x218] sm:$0xff] }
 0xbd2   : > { %1978 = vmatpush.msrb.mxu3 %v1896_v53 }
 0xbd3   : > { %v1743_v13 = vsub.f32 1.5, %v1742_v10  ;;  %v1889_v10 = vld [vmem:[#allocation2 + $0x1f8] sm:$0xff] }
 0xbd4   : > { %1979 = vmatpush.msrb.mxu3 %v1893_v55 }
 0xbd5   : > { %v1744_v14 = vmul.f32 %v3449_v7, %v1743_v13  ;;  %v1891_v13 = vld [vmem:[#allocation2 + $0x208] sm:$0xff] }
 0xbd6   : > { %1980 = vmatpush.msrb.mxu3 %v1890_v11 }
 0xbd7   : > { %v1748_v16 = vsel %vm1747_vm10, %v3449_v7, %v1744_v14  ;;  %v1895_v7 = vld [vmem:[#allocation2 + $0x228] sm:$0xff] }
 0xbd8   : > { %v1749_v18 = vmul.f32 %v1748_v16, %v4219_v32  ;;  %v1921_v32 = vld [vmem:[#allocation2 + $0x2f8] sm:$0xff]  ;;  %1958 = vmatpush.msrb.mxu2 %v1895_v7  ;;  %v1887_v14 = vld [vmem:[#allocation2 + $0x1e8] sm:$0xff] }
 0xbd9   : > { %1990 = vmatpush.msra.mxu0 %v1921_v32  ;;  %1981 = vmatpush.msrb.mxu3 %v1887_v14  ;;  %v1883_v16 = vld [vmem:[#allocation2 + $0x1c8] sm:$0xff] }
 0xbda   : > { %v1753_v50 = vmul.f32 %v3397_v15, %v1749_v18  ;;  %1959 = vmatpush.msrb.mxu2 %v1892_v61  ;;  %v1888_v15 = vld [vmem:[#allocation2 + $0x1f0] sm:$0xff] }
 0xbdb   : > { %1991 = vmatpush.msra.mxu0 %v1918_v35  ;;  %v1884_v18 = vld [vmem:[#allocation2 + $0x1d0] sm:$0xff]  ;;  %v3401_v35 = vld [vmem:[%s4629_s16 + $0x2] ss:$0 sm:$0xff] }
 0xbdc   : > { %v1757_v57 = vadd.f32 %v3398_v19, %v1753_v50  ;;  %1960 = vmatpush.msrb.mxu2 %v1889_v10  ;;  %v1885_v19 = vld [vmem:[#allocation2 + $0x1d8] sm:$0xff]  ;;  %1982 = vmatpush.msrb.mxu3 %v1884_v18  ;;  %v1880_v50 = vld [vmem:[#allocation2 + $0x1b0] sm:$0xff] }
 0xbdd   : > { %1992 = vmatpush.msra.mxu0 %v1915_v44  ;;  %v1946_v44 = vperm.slane %v3238_v43, 2 }
 0xbde   : > { %1794 = vmatmul.f32.vlgmr.msrb.gmra.mxu0 %v1757_v57  ;;  %1961 = vmatpush.msrb.mxu2 %v1886_v48 }
 0xbdf   : > { %1993 = vmatpush.msra.mxu0 %v1912_v49  ;;  %v1945_v49 = vperm.slane %v3238_v43, 1 }
 0xbe0   : > { %1962 = vmatpush.msrb.mxu2 %v1883_v16 }
 0xbe1   : > { %1994 = vmatpush.msra.mxu0 %v1909_v52 }
 0xbe2   : > { %1963 = vmatpush.msrb.mxu2 %v1880_v50 }
 0xbe3   : > { %1995 = vmatpush.msra.mxu0 %v1906_v56 }
 0xbe4   : > { %1964 = vmatpush.msrb.mxu2 %v1877_v60 }
 0xbe5   : > { %1996 = vmatpush.msra.mxu0 %v1903_v3 }
 0xbe7   : > { %1997 = vmatpush.msra.mxu0 %v1900_v6 }
 0xbe9   : > { %1998 = vmatpush.msra.mxu0 %v1897_v8 }
 0xbeb   : > { %1999 = vmatpush.msra.mxu0 %v1894_v0 }
 0xbed   : > { %2000 = vmatpush.msra.mxu0 %v1891_v13 }
 0xbef   : > { %2001 = vmatpush.msra.mxu0 %v1888_v15 }
 0xbf1   : > { %2002 = vmatpush.msra.mxu0 %v1885_v19 }
 0xbf3   : > { %2003 = vmatpush.msra.mxu0 %v1882_v20 }
 0xc5b   : > { %v1795_v23 = vpop.f32.mrf.mxu0 }
 0xc5c   : > { %v1796_v24 = vadd.f32 %v3399_v22, %v1795_v23  ;;  %v1879_v22 = vld [vmem:[#allocation2 + $0x1a8] sm:$0xff]  ;;  %v1874_v23 = vld [vmem:[#allocation2 + $0x180] sm:$0xff] }
 0xc5d   : > { %2004 = vmatpush.msra.mxu0 %v1879_v22  ;;  %1965 = vmatpush.msrb.mxu2 %v1874_v23 }
 0xc5e   : > { %v1798_v25 = vmax.f32 %v1796_v24, 0.0  ;;  %v1875_v24 = vld [vmem:[#allocation2 + $0x188] sm:$0xff] }
 0xc60   : > { %1835 = vmatmul.f32.vlgmr.msrb.gmra.mxu1 %v1798_v25  ;;  %v1876_v25 = vld [vmem:[#allocation2 + $0x190] sm:$0xff] }
 0xc61   : > { %2005 = vmatpush.msra.mxu0 %v1876_v25 }
 0xcdd   : > { %v1836_v27 = vpop.f32.mrf.mxu1 }
 0xcde   : > { %v1837_v28 = vadd.f32 %v3400_v26, %v1836_v27 }
 0xce0   : > { %v1839_v29 = vadd.f32 %v1837_v28, %v1757_v57  ;;  %v1881_v57 = vld [vmem:[#allocation2 + $0x1b8] sm:$0xff] }
 0xce1   : > { %1983 = vmatpush.msrb.mxu3 %v1881_v57 }
 0xce2   : > { %1844 = vadd.xlane.f32.xlu2 %v1839_v29 }
 0xce3   : > { %1984 = vmatpush.msrb.mxu3 %v1878_v21 }
 0xce5   : > { %1985 = vmatpush.msrb.mxu3 %v1875_v24 }
 0xd55   : > { %v1845_v62 = vpop.xlane.xlu2 %1844 }
 0xd56   : > { %v1846_v36 = vmul.f32 0.0625, %v1845_v62 }
 0xd58   : > { %v1847_v37 = vsub.f32 %v1839_v29, %v1846_v36 }
 0xd5a   : > { %v4237_v39 = vmul.f32 %v4079_v12, %v1847_v37  ;;  %v3402_v37 = vld [vmem:[%s4630_s17 + $0x2] ss:$0 sm:$0xff] }
 0xd5c   : > { %v1849_v41 = vmul.f32 %v4237_v39, %v4237_v39 }
 0xd5e   : > { %1850 = vadd.xlane.f32.xlu0 %v1849_v41 }
 0xdd1   : > { %v1851_v26 = vpop.xlane.xlu0 %1850 }
 0xdd2   : > { %v1852_v27 = vmul.f32 0.0625, %v1851_v26 }
 0xdd4   : > { %v1853_v28 = vadd.f32 1e-05, %v1852_v27 }
 0xdd6   : > { %3450 = vrsqrt.f32 %v1853_v28  ;;  %vm1860_vm12 = vweird.f32 %v1853_v28 }
 0xddc   : > { %v3451_v29 = vpop.eup %3450 }
 0xddd   : > { %v1855_v30 = vmul.f32 %v3451_v29, %v1853_v28  ;;  %vm1861_vm11 = vweird.f32 %v3451_v29 }
 0xdde   : > { %vm1862_vm13 = vmor %vm1860_vm12, %vm1861_vm11 }
 0xddf   : > { %v1856_v31 = vmul.f32 %v3451_v29, %v1855_v30 }
 0xde1   : > { %v1857_v32 = vmul.f32 0.5, %v1856_v31 }
 0xde3   : > { %v1858_v33 = vsub.f32 1.5, %v1857_v32 }
 0xde5   : > { %v1859_v34 = vmul.f32 %v3451_v29, %v1858_v33 }
 0xde7   : > { %v1863_v62 = vsel %vm1862_vm13, %v3451_v29, %v1859_v34 }
 0xde8   : > { %v1864_v36 = vmul.f32 %v1863_v62, %v4237_v39 }
 0xdea   : > { %v1868_v41 = vmul.f32 %v3401_v35, %v1864_v36  ;;  %v3254_v36 = vld [vmem:[%s4678_s6 + $0xf8] sm:$0xff] }
 0xdeb   : > { %2297 = vmatpush.msra.mxu3 %v3254_v36 }
 0xdec   : > { %v4248_v42 = vadd.f32 %v3402_v37, %v1868_v41 }
 0xdee   : > { %1966 = vmatmul.f32.vlgmr.msrb.gmra.mxu2 %v4248_v42  ;;  %1986 = vmatmul.f32.vlgmr.msrb.gmra.mxu3 %v4248_v42 }
 0xdef   : > { %2006 = vmatmul.f32.vlgmr.msra.gmra.mxu0 %v4248_v42 }
 0xe6c   : > { %v2007_v45 = vpop.f32.mrf.mxu0 }
 0xe6d   : > { %v4256_v39 = vadd.f32 %v2007_v45, %v1946_v44 }
 0xe6f   : > { %2074 = vmatpush.msra.mxu2 %v4256_v39 }
 0xe71   : > { %2145 = vmatpush.msrb.mxu2 %v4256_v39  ;;  %v1967_v51 = vpop.f32.mrf.mxu2  ;;  %v1987_v47 = vpop.f32.mrf.mxu3 }
 0xe72   : > { %v1968_v52 = vadd.f32 %v1967_v51, %v1944_v46  ;;  %v1988_v38 = vadd.f32 %v1987_v47, %v1945_v49 }
 0xe74   : > { %2026 = vmatpush.xpose.msra.mxu1 %v1988_v38  ;;  %v2010_v54 = vmul.f32 %v3961_v58, %v1968_v52  ;;  %v2081_v56 = vmul.f32 %v3994_v40, %v1968_v52  ;;  %v2152_v63 = vmul.f32 %v4008_v9, %v1968_v52  ;;  %v2223_v1 = vmul.f32 %v3964_v59, %v1968_v52 }
 0xe77   : > { %2027 = vmatmul.f32.vlgmr.msra.gmra.mxu1 %v2010_v54 }
 0xe78   : > { %2097 = vmatpush.xpose.msrb.mxu1 %v1988_v38 }
 0xe7c   : > { %2168 = vmatpush.xpose.msra.mxu1 %v1988_v38 }
 0xe7f   : > { %2098 = vmatmul.f32.vlgmr.msrb.gmra.mxu1 %v2081_v56 }
 0xe80   : > { %2239 = vmatpush.xpose.msrb.mxu1 %v1988_v38 }
 0xe87   : > { %2169 = vmatmul.f32.vlgmr.msra.gmra.mxu1 %v2152_v63 }
 0xe8f   : > { %2240 = vmatmul.f32.vlgmr.msrb.gmra.mxu1 %v2223_v1 }
 0xef4   : > { %v2028_v3 = vpop.f32.mrf.mxu1 }
 0xef5   : > { %v2031_v4 = vsel %vm963_vm4, -1e+10, %v2028_v3 }
 0xef6   : > { %v2032_v5 = vsel %vm965_vm5, %v2031_v4, -inf }
 0xef7   : > { %2033 = vmax.xlane.f32.xlu1 %v2032_v5 }
 0xefc   : > { %v2099_v6 = vpop.f32.mrf.mxu1 }
 0xefd   : > { %v2102_v7 = vsel %vm963_vm4, -1e+10, %v2099_v6 }
 0xefe   : > { %v2103_v53 = vsel %vm965_vm5, %v2102_v7, -inf }
 0xeff   : > { %2104 = vmax.xlane.f32.xlu2 %v2103_v53 }
 0xf04   : > { %v2170_v8 = vpop.f32.mrf.mxu1 }
 0xf05   : > { %v2173_v61 = vsel %vm963_vm4, -1e+10, %v2170_v8 }
 0xf06   : > { %v2174_v55 = vsel %vm965_vm5, %v2173_v61, -inf }
 0xf07   : > { %2175 = vmax.xlane.f32.xlu0 %v2174_v55 }
 0xf0c   : > { %v2241_v0 = vpop.f32.mrf.mxu1 }
 0xf0d   : > { %v2244_v10 = vsel %vm963_vm4, -1e+10, %v2241_v0 }
 0xf0e   : > { %v2245_v11 = vsel %vm965_vm5, %v2244_v10, -inf }
 0xf0f   : > { %2246 = vmax.xlane.f32.xlu1 %v2245_v11 }
 0xf6a   : > { %v2034_v13 = vpop.xlane.xlu1 %2033 }
 0xf6b   : > { %v2035_v48 = vsub.f32 %v2031_v4, %v2034_v13 }
 0xf6d   : > { %v2036_v14 = vmul.f32 1.442695, %v2035_v48 }
 0xf6f   : > { %3452 = vpow2.f32 %v2036_v14 }
 0xf72   : > { %v2105_v15 = vpop.xlane.xlu2 %2104 }
 0xf73   : > { %v2106_v16 = vsub.f32 %v2102_v7, %v2105_v15 }
 0xf75   : > { %v3453_v18 = vpop.eup %3452  ;;  %v2107_v19 = vmul.f32 1.442695, %v2106_v16 }
 0xf76   : > { %v2038_v50 = vsel %vm965_vm5, %v3453_v18, 0.0 }
 0xf77   : > { %3454 = vpow2.f32 %v2107_v19  ;;  %2039 = vadd.xlane.f32.xlu2 %v2038_v50 }
 0xf7a   : > { %v2176_v57 = vpop.xlane.xlu0 %2175 }
 0xf7b   : > { %v2177_v20 = vsub.f32 %v2173_v61, %v2176_v57 }
 0xf7d   : > { %v3455_v60 = vpop.eup %3454  ;;  %v2178_v2 = vmul.f32 1.442695, %v2177_v20 }
 0xf7e   : > { %v2109_v21 = vsel %vm965_vm5, %v3455_v60, 0.0 }
 0xf7f   : > { %3456 = vpow2.f32 %v2178_v2  ;;  %2110 = vadd.xlane.f32.xlu0 %v2109_v21  ;;  %v3253_v21 = vld [vmem:[%s4678_s6 + $0xf0] sm:$0xff] }
 0xf80   : > { %2298 = vmatpush.msra.mxu3 %v3253_v21  ;;  %v2364_v21 = vld [vmem:[#allocation5 + $0x1e0] sm:$0xff] }
 0xf82   : > { %v2247_v22 = vpop.xlane.xlu1 %2246 }
 0xf83   : > { %v2248_v23 = vsub.f32 %v2244_v10, %v2247_v22  ;;  %v3252_v22 = vld [vmem:[%s4678_s6 + $0xe8] sm:$0xff] }
 0xf84   : > { %2299 = vmatpush.msra.mxu3 %v3252_v22  ;;  %v2362_v22 = vld [vmem:[#allocation5 + $0x1d0] sm:$0xff] }
 0xf85   : > { %v4278_v24 = vpop.eup %3456  ;;  %v2249_v25 = vmul.f32 1.442695, %v2248_v23  ;;  %v3251_v23 = vld [vmem:[%s4678_s6 + $0xe0] sm:$0xff] }
 0xf86   : > { %v2180_v26 = vsel %vm965_vm5, %v4278_v24, 0.0  ;;  %2300 = vmatpush.msra.mxu3 %v3251_v23  ;;  %v2361_v23 = vld [vmem:[#allocation5 + $0x1c8] sm:$0xff] }
 0xf87   : > { %3458 = vpow2.f32 %v2249_v25  ;;  %2181 = vadd.xlane.f32.xlu1 %v2180_v26  ;;  %v3249_v25 = vld [vmem:[%s4678_s6 + $0xd0] sm:$0xff]  ;;  %v3248_v26 = vld [vmem:[%s4678_s6 + $0xc8] sm:$0xff] }
 0xf8d   : > { %v4282_v27 = vpop.eup %3458 }
 0xf8e   : > { %v2251_v28 = vsel %vm965_vm5, %v4282_v27, 0.0 }
 0xf8f   : > { %2252 = vadd.xlane.f32.xlu2 %v2251_v28  ;;  %v3246_v28 = vld [vmem:[%s4678_s6 + $0xb8] sm:$0xff] }
 0xfea   : > { %v2040_v29 = vpop.xlane.xlu2 %2039 }
 0xfeb   : > { %3460 = vrcp.f32 %v2040_v29  ;;  %v2052_v34 = vand.u32 2147483648, %v2040_v29  ;;  %v2050_v62 = vand.u32 2147483647, %v2040_v29  ;;  %vm2046_vm14 = vweird.f32 %v2040_v29 }
 0xfed   : > { %v2053_v43 = vor.u32 1.1754944e-38, %v2052_v34  ;;  %vm2051_vm15 = vcmp.eq.f32.partialorder %v2050_v62, 8.507059e+37  ;;  %v3240_v34 = vld [vmem:[%s4678_s6 + $0x88] sm:$0xff] }
 0xff1   : > { %v3461_v30 = vpop.eup %3460 }
 0xff2   : > { %v2042_v31 = vmul.f32 %v3461_v30, %v2040_v29  ;;  %v2111_v32 = vpop.xlane.xlu0 %2110  ;;  %vm2047_vm4 = vweird.f32 %v3461_v30  ;;  %v3245_v29 = vld [vmem:[%s4678_s6 + $0xb0] sm:$0xff] }
 0xff3   : > { %3462 = vrcp.f32 %v2111_v32  ;;  %vm2048_vm0 = vmor %vm2046_vm14, %vm2047_vm4  ;;  %v2123_v52 = vand.u32 2147483648, %v2111_v32  ;;  %v2121_v54 = vand.u32 2147483647, %v2111_v32  ;;  %vm2117_vm3 = vweird.f32 %v2111_v32 }
 0xff4   : > { %v2043_v33 = vsub.f32 1.0, %v2042_v31  ;;  %v3243_v31 = vld [vmem:[%s4678_s6 + $0xa0] sm:$0xff] }
 0xff5   : > { %v2124_v1 = vor.u32 1.1754944e-38, %v2123_v52  ;;  %vm2122_vm7 = vcmp.eq.f32.partialorder %v2121_v54, 8.507059e+37  ;;  %v3403_v52 = vld [vmem:[%s4679_s7 + $0x1] ss:$0 sm:$0xff] }
 0xff6   : > { %v2044_v35 = vmul.f32 %v3461_v30, %v2043_v33  ;;  %v3241_v33 = vld [vmem:[%s4678_s6 + $0x90] sm:$0xff] }
 0xff8   : > { %v2045_v37 = vadd.f32 %v3461_v30, %v2044_v35  ;;  %v3239_v35 = vld [vmem:[%s4678_s6 + $0x80] sm:$0xff] }
 0xff9   : > { %v3463_v41 = vpop.eup %3462 }
 0xffa   : > { %v2049_v44 = vsel %vm2048_vm0, %v3461_v30, %v2045_v37  ;;  %v2113_v45 = vmul.f32 %v3463_v41, %v2111_v32  ;;  %v2182_v46 = vpop.xlane.xlu1 %2181  ;;  %vm2118_vm1 = vweird.f32 %v3463_v41  ;;  %v3244_v30 = vld [vmem:[%s4678_s6 + $0xa8] sm:$0xff]  ;;  %v3242_v32 = vld [vmem:[%s4678_s6 + $0x98] sm:$0xff] }
 0xffb   : > { %v2054_v49 = vsel %vm2051_vm15, %v2053_v43, %v2049_v44  ;;  %3464 = vrcp.f32 %v2182_v46  ;;  %vm2119_vm6 = vmor %vm2117_vm3, %vm2118_vm1  ;;  %v2194_v8 = vand.u32 2147483648, %v2182_v46  ;;  %v2192_v55 = vand.u32 2147483647, %v2182_v46 }
 0xffc   : > { %v2114_v51 = vsub.f32 1.0, %v2113_v45  ;;  %v2055_v47 = vmul.f32 %v3453_v18, %v2054_v49  ;;  %vm2188_vm9 = vweird.f32 %v2182_v46 }
 0xffd   : > { %v2195_v11 = vor.u32 1.1754944e-38, %v2194_v8  ;;  %vm2193_vm11 = vcmp.eq.f32.partialorder %v2192_v55, 8.507059e+37  ;;  %v2389_v55 = vld [vmem:[#allocation5 + $0x2a8] sm:$0xff] }
 0xffe   : > { %v2115_v38 = vmul.f32 %v3463_v41, %v2114_v51  ;;  %3256 = vmatmul.msk.f32.vlgmr.msra.gmra.mxu2 %vm965_vm5, %v2055_v47 }
 0xfff   : > { %2216 = vmatpush.msra.mxu2 %v4256_v39 }
0x1000   : > { %v2116_v56 = vadd.f32 %v3463_v41, %v2115_v38 }
0x1001   : > { %v3465_v63 = vpop.eup %3464 }
0x1002   : > { %v2120_v3 = vsel %vm2119_vm6, %v3463_v41, %v2116_v56  ;;  %v2184_v4 = vmul.f32 %v3465_v63, %v2182_v46  ;;  %v2253_v5 = vpop.xlane.xlu2 %2252  ;;  %vm2189_vm8 = vweird.f32 %v3465_v63 }
0x1003   : > { %v2125_v6 = vsel %vm2122_vm7, %v2124_v1, %v2120_v3  ;;  %3466 = vrcp.f32 %v2253_v5  ;;  %vm2190_vm10 = vmor %vm2188_vm9, %vm2189_vm8  ;;  %v2265_v18 = vand.u32 2147483648, %v2253_v5  ;;  %v2263_v50 = vand.u32 2147483647, %v2253_v5  ;;  %v2397_v1 = vld [vmem:[#allocation5 + $0x2e8] sm:$0xff]  ;;  %v2395_v3 = vld [vmem:[#allocation5 + $0x2d8] sm:$0xff] }
0x1004   : > { %v2185_v7 = vsub.f32 1.0, %v2184_v4  ;;  %v2126_v53 = vmul.f32 %v3455_v60, %v2125_v6  ;;  %vm2259_vm13 = vweird.f32 %v2253_v5  ;;  %2428 = vmatpush.msrb.mxu0 %v2397_v1  ;;  %v2394_v4 = vld [vmem:[#allocation5 + $0x2d0] sm:$0xff] }
0x1005   : > { %vm2264_vm14 = vcmp.eq.f32.partialorder %v2263_v50, 8.507059e+37  ;;  %v2373_v50 = vld [vmem:[#allocation5 + $0x228] sm:$0xff] }
0x1006   : > { %v2186_v61 = vmul.f32 %v3465_v63, %v2185_v7  ;;  %3257 = vmatmul.msk.f32.vlgmr.msrb.gmra.mxu2 %vm965_vm5, %v2126_v53  ;;  %2429 = vmatpush.msrb.mxu0 %v2394_v4 }
0x1007   : > { %2287 = vmatpush.msrb.mxu2 %v4256_v39  ;;  %v2266_v39 = vor.u32 1.1754944e-38, %v2265_v18  ;;  %v2376_v18 = vld [vmem:[#allocation5 + $0x240] sm:$0xff] }
0x1008   : > { %v2187_v0 = vadd.f32 %v3465_v63, %v2186_v61  ;;  %v2391_v61 = vld [vmem:[#allocation5 + $0x2b8] sm:$0xff] }
0x1009   : > { %v3467_v10 = vpop.eup %3466  ;;  %2430 = vmatpush.msrb.mxu0 %v2391_v61  ;;  %v2387_v61 = vld [vmem:[#allocation5 + $0x298] sm:$0xff] }
0x100a   : > { %v2191_v13 = vsel %vm2190_vm10, %v3465_v63, %v2187_v0  ;;  %v2255_v48 = vmul.f32 %v3467_v10, %v2253_v5  ;;  %vm2260_vm12 = vweird.f32 %v3467_v10  ;;  %v2398_v63 = vld [vmem:[#allocation5 + $0x2f0] sm:$0xff]  ;;  %v2392_v5 = vld [vmem:[#allocation5 + $0x2c0] sm:$0xff] }
0x100b   : > { %v2196_v14 = vsel %vm2193_vm11, %v2195_v11, %v2191_v13  ;;  %vm2261_vm4 = vmor %vm2259_vm13, %vm2260_vm12  ;;  %2448 = vmatpush.msra.mxu1 %v2398_v63  ;;  %v2388_v0 = vld [vmem:[#allocation5 + $0x2a0] sm:$0xff]  ;;  %v2385_v11 = vld [vmem:[#allocation5 + $0x288] sm:$0xff] }
0x100c   : > { %v2256_v15 = vsub.f32 1.0, %v2255_v48  ;;  %v2197_v16 = vmul.f32 %v4278_v24, %v2196_v14  ;;  %v3250_v24 = vld [vmem:[%s4678_s6 + $0xd8] sm:$0xff]  ;;  %2431 = vmatpush.msrb.mxu0 %v2388_v0  ;;  %v2382_v48 = vld [vmem:[#allocation5 + $0x270] sm:$0xff]  ;;  %v2380_v14 = vld [vmem:[#allocation5 + $0x260] sm:$0xff] }
0x100d   : > { %2301 = vmatpush.msra.mxu3 %v3250_v24  ;;  %2449 = vmatpush.msra.mxu1 %v2395_v3  ;;  %v2383_v13 = vld [vmem:[#allocation5 + $0x278] sm:$0xff]  ;;  %v2381_v0 = vld [vmem:[#allocation5 + $0x268] sm:$0xff] }
0x100e   : > { %v2257_v19 = vmul.f32 %v3467_v10, %v2256_v15  ;;  %3258 = vmatmul.msk.f32.vlgmr.msra.gmra.mxu2 %vm965_vm5, %v2197_v16  ;;  %2432 = vmatpush.msrb.mxu0 %v2385_v11  ;;  %v2379_v15 = vld [vmem:[#allocation5 + $0x258] sm:$0xff]  ;;  %v2377_v16 = vld [vmem:[#allocation5 + $0x248] sm:$0xff] }
0x100f   : > { %2302 = vmatpush.msra.mxu3 %v3249_v25  ;;  %2450 = vmatpush.msra.mxu1 %v2392_v5  ;;  %v2359_v24 = vld [vmem:[#allocation5 + $0x1b8] sm:$0xff]  ;;  %v2358_v25 = vld [vmem:[#allocation5 + $0x1b0] sm:$0xff] }
0x1010   : > { %v2258_v57 = vadd.f32 %v3467_v10, %v2257_v19  ;;  %2433 = vmatpush.msrb.mxu0 %v2382_v48  ;;  %v2374_v19 = vld [vmem:[#allocation5 + $0x230] sm:$0xff]  ;;  %v2375_v11 = vld [vmem:[#allocation5 + $0x238] sm:$0xff] }
0x1011   : > { %2303 = vmatpush.msra.mxu3 %v3248_v26  ;;  %2451 = vmatpush.msra.mxu1 %v2389_v55  ;;  %v2356_v26 = vld [vmem:[#allocation5 + $0x1a0] sm:$0xff] }
0x1012   : > { %v2262_v20 = vsel %vm2261_vm4, %v3467_v10, %v2258_v57  ;;  %v2386_v10 = vld [vmem:[#allocation5 + $0x290] sm:$0xff]  ;;  %2434 = vmatpush.msrb.mxu0 %v2379_v15  ;;  %v2371_v57 = vld [vmem:[#allocation5 + $0x218] sm:$0xff]  ;;  %v2384_v55 = vld [vmem:[#allocation5 + $0x280] sm:$0xff] }
0x1013   : > { %v2267_v60 = vsel %vm2264_vm14, %v2266_v39, %v2262_v20  ;;  %2452 = vmatpush.msra.mxu1 %v2386_v10  ;;  %v2370_v39 = vld [vmem:[#allocation5 + $0x210] sm:$0xff]  ;;  %v2368_v20 = vld [vmem:[#allocation5 + $0x200] sm:$0xff] }
0x1014   : > { %v2268_v2 = vmul.f32 %v4282_v27, %v2267_v60  ;;  %v3247_v27 = vld [vmem:[%s4678_s6 + $0xc0] sm:$0xff]  ;;  %2435 = vmatpush.msrb.mxu0 %v2376_v18  ;;  %v2367_v60 = vld [vmem:[#allocation5 + $0x1f8] sm:$0xff]  ;;  %v2378_v10 = vld [vmem:[#allocation5 + $0x250] sm:$0xff] }
0x1015   : > { %2304 = vmatpush.msra.mxu3 %v3247_v27  ;;  %2453 = vmatpush.msra.mxu1 %v2383_v13  ;;  %v2355_v27 = vld [vmem:[#allocation5 + $0x198] sm:$0xff] }
0x1016   : > { %3259 = vmatmul.msk.f32.vlgmr.msrb.gmra.mxu2 %vm965_vm5, %v2268_v2  ;;  %2436 = vmatpush.msrb.mxu0 %v2373_v50  ;;  %v2365_v2 = vld [vmem:[#allocation5 + $0x1e8] sm:$0xff] }
0x1017   : > { %2305 = vmatpush.msra.mxu3 %v3246_v28  ;;  %2454 = vmatpush.msra.mxu1 %v2380_v14  ;;  %v2353_v28 = vld [vmem:[#allocation5 + $0x188] sm:$0xff]  ;;  %v2372_v14 = vld [vmem:[#allocation5 + $0x220] sm:$0xff] }
0x1018   : > { %2437 = vmatpush.msrb.mxu0 %v2370_v39 }
0x1019   : > { %2306 = vmatpush.msra.mxu3 %v3245_v29  ;;  %2455 = vmatpush.msra.mxu1 %v2377_v16  ;;  %v2352_v29 = vld [vmem:[#allocation5 + $0x180] sm:$0xff] }
0x101a   : > { %2438 = vmatpush.msrb.mxu0 %v2367_v60 }
0x101b   : > { %2307 = vmatpush.msra.mxu3 %v3244_v30  ;;  %2456 = vmatpush.msra.mxu1 %v2374_v19  ;;  %v4356_v30 = vld [vmem:[%s4090_s18] sm:$0xff]  ;;  %s4686_s18 = sld [smem:[#allocation39_spill]] }
0x101c   : > { %2439 = vmatpush.msrb.mxu0 %v2364_v21  ;;  %v2369_v21 = vld [vmem:[#allocation5 + $0x208] sm:$0xff] }
0x101d   : > { %2308 = vmatpush.msra.mxu3 %v3243_v31  ;;  %2457 = vmatpush.msra.mxu1 %v2371_v57 }
0x101e   : > { %2440 = vmatpush.msrb.mxu0 %v2361_v23  ;;  %v2363_v23 = vld [vmem:[#allocation5 + $0x1d8] sm:$0xff] }
0x101f   : > { %2309 = vmatpush.msra.mxu3 %v3242_v32  ;;  %2458 = vmatpush.msra.mxu1 %v2368_v20 }
0x1020   : > { %2441 = vmatpush.msrb.mxu0 %v2358_v25  ;;  %v2357_v25 = vld [vmem:[#allocation5 + $0x1a8] sm:$0xff] }
0x1021   : > { %2310 = vmatpush.msra.mxu3 %v3241_v33  ;;  %2459 = vmatpush.msra.mxu1 %v2365_v2  ;;  %s3027_s8 = scalar_lea.hbm %s4686_s18, %s3300_s30  ;;  %s3631_s24 = scalar_lea.hbm %s4686_s18, 192 }
0x1022   : > { %2442 = vmatpush.msrb.mxu0 %v2355_v27  ;;  %s3030_s28 = sshll.u32 %s3027_s8, 4  ;;  %s3031_s28 = int_to_ptr.hbm [resolvable:$true] %s3030_s28 }
0x1023   : > { %2311 = vmatpush.msra.mxu3 %v3240_v34  ;;  %2460 = vmatpush.msra.mxu1 %v2362_v22  ;;  %v2366_v22 = vld [vmem:[#allocation5 + $0x1f0] sm:$0xff]  ;;  %s3625_s27 = sshra.s32 %s3031_s28, 4  ;;  %s3626_s27 = int_to_ptr.hbm [resolvable:$true] %s3625_s27 }
0x1024   : > { %2443 = vmatpush.msrb.mxu0 %v2352_v29  ;;  %s3627_s29 = scalar_lea.hbm %s3626_s27, 32  ;;  %p3632_p3 = scmp.lt.s32.totalorder %s3626_s27, %s4686_s18 }
0x1025   : > { %2312 = vmatpush.msra.mxu3 %v3239_v35  ;;  %2461 = vmatpush.msra.mxu1 %v2359_v24  ;;  %v2360_v24 = vld [vmem:[#allocation5 + $0x1c0] sm:$0xff]  ;;  %p3628_p0 = scmp.ne.s32.totalorder %s3626_s27, %s3627_s29  ;;  %p3633_p4 = scmp.lt.s32.totalorder %s3631_s24, %s3627_s29 }
0x1027   : > { %2462 = vmatpush.msra.mxu1 %v2356_v26  ;;  %v2354_v26 = vld [vmem:[#allocation5 + $0x190] sm:$0xff]  ;;  %p3629_p1 = pnand %p3628_p0, %p3878_p5  ;;  %p3634_p7 = por %p3633_p4, %p3632_p3 }
0x1029   : > { %2463 = vmatpush.msra.mxu1 %v2353_v28  ;;  %p3630_p2 = pneg %p3629_p1 }
0x102a   : > { %2464 = vmatmul.f32.vlgmr.msra.gmra.mxu1 %v4356_v30 }
0x102b   : > { %p3635_p8 = pnand %p3634_p7, %p3630_p2 }
0x1081   : > { %v2076_v62 = vpop.f32.mrf.mxu2 }
0x1082   : > { %v2079_v43 = vmul.f32 %v3961_v58, %v2076_v62 }
0x1089   : > { %v2147_v36 = vpop.f32.mrf.mxu2 }
0x108a   : > { %v2150_v41 = vmul.f32 %v3994_v40, %v2147_v36 }
0x108c   : > { %v2151_v45 = vadd.f32 %v2150_v41, %v2079_v43  ;;  %v3404_v43 = vld [vmem:[%s4629_s16 + $0x3] ss:$0 sm:$0xff] }
0x1091   : > { %v2218_v37 = vpop.f32.mrf.mxu2 }
0x1092   : > { %v2221_v44 = vmul.f32 %v4008_v9, %v2218_v37 }
0x1094   : > { %v2222_v49 = vadd.f32 %v2221_v44, %v2151_v45 }
0x1099   : > { %v2289_v46 = vpop.f32.mrf.mxu2 }
0x109a   : > { %v2292_v51 = vmul.f32 %v3964_v59, %v2289_v46  ;;  %v3405_v46 = vld [vmem:[%s4630_s17 + $0x3] ss:$0 sm:$0xff] }
0x109c   : > { %v2293_v47 = vadd.f32 %v2292_v51, %v2222_v49 }
0x109e   : > { %2313 = vmatmul.f32.vlgmr.msra.gmra.mxu3 %v2293_v47  ;;  %v4372_v47 = vld [vmem:[%s4681_s9 + $0x3] sm:$0x7] }
0x1121   : > { %v2314_v38 = vpop.f32.mrf.mxu3 }
0x1122   : > { %v2315_v54 = vadd.f32 %v3403_v52, %v2314_v38  ;;  %v2423_v52 = vperm.slane %v4372_v47, 1  ;;  %v2465_v38 = vpop.f32.mrf.mxu1 }
0x1124   : > { %v2317_v56 = vadd.f32 %v2315_v54, %v4248_v42  ;;  %v2466_v54 = vadd.f32 %v2465_v38, %v2423_v52  ;;  %v2424_v38 = vperm.slane %v4372_v47, 2 }
0x1126   : > { %2322 = vadd.xlane.f32.xlu0 %v2317_v56  ;;  %2504 = vmatpush.xpose.msrb.mxu3 %v2466_v54 }
0x1127   : > { %2575 = vmatpush.xpose.msrb.mxu1 %v2466_v54 }
0x112a   : > { %2646 = vmatpush.xpose.msra.mxu3 %v2466_v54 }
0x112b   : > { %2717 = vmatpush.xpose.msra.mxu1 %v2466_v54 }
0x1199   : > { %v2323_v6 = vpop.xlane.xlu0 %2322 }
0x119a   : > { %v2324_v7 = vmul.f32 0.0625, %v2323_v6 }
0x119c   : > { %v2325_v53 = vsub.f32 %v2317_v56, %v2324_v7  ;;  %v2422_v56 = vperm.slane %v4372_v47, 0  ;;  %v2399_v7 = vld [vmem:[#allocation5 + $0x2f8] sm:$0xff]  ;;  %v3276_v47 = vld [vmem:[%s4683_s10 + $0xe8] sm:$0xff] }
0x119d   : > { %2468 = vmatpush.msra.mxu2 %v2399_v7 }
0x119e   : > { %v4351_v8 = vmul.f32 %v4079_v12, %v2325_v53  ;;  %v2396_v53 = vld [vmem:[#allocation5 + $0x2e0] sm:$0xff] }
0x119f   : > { %2469 = vmatpush.msra.mxu2 %v2396_v53 }
0x11a0   : > { %v2327_v42 = vmul.f32 %v4351_v8, %v4351_v8 }
0x11a2   : > { %2328 = vadd.xlane.f32.xlu1 %v2327_v42  ;;  %v2390_v42 = vld [vmem:[#allocation5 + $0x2b0] sm:$0xff] }
0x1215   : > { %v2329_v31 = vpop.xlane.xlu1 %2328 }
0x1216   : > { %v2330_v32 = vmul.f32 0.0625, %v2329_v31 }
0x1218   : > { %v2331_v33 = vadd.f32 1e-05, %v2330_v32 }
0x121a   : > { %3468 = vrsqrt.f32 %v2331_v33  ;;  %vm2338_vm15 = vweird.f32 %v2331_v33 }
0x1220   : > { %v3469_v34 = vpop.eup %3468 }
0x1221   : > { %v2333_v35 = vmul.f32 %v3469_v34, %v2331_v33  ;;  %vm2339_vm0 = vweird.f32 %v3469_v34 }
0x1222   : > { %vm2340_vm1 = vmor %vm2338_vm15, %vm2339_vm0 }
0x1223   : > { %v2334_v62 = vmul.f32 %v3469_v34, %v2333_v35 }
0x1225   : > { %v2335_v36 = vmul.f32 0.5, %v2334_v62 }
0x1227   : > { %v2336_v37 = vsub.f32 1.5, %v2335_v36 }
0x1229   : > { %v2337_v41 = vmul.f32 %v3469_v34, %v2336_v37 }
0x122b   : > { %v2341_v44 = vsel %vm2340_vm1, %v3469_v34, %v2337_v41 }
0x122c   : > { %v2342_v45 = vmul.f32 %v2341_v44, %v4351_v8  ;;  %v2393_v8 = vld [vmem:[#allocation5 + $0x2c8] sm:$0xff] }
0x122d   : > { %2470 = vmatpush.msra.mxu2 %v2393_v8  ;;  %v3274_v8 = vld [vmem:[%s4683_s10 + $0xd8] sm:$0xff] }
0x122e   : > { %v2346_v49 = vmul.f32 %v3404_v43, %v2342_v45 }
0x122f   : > { %2471 = vmatpush.msra.mxu2 %v2390_v42 }
0x1230   : > { %v4366_v51 = vadd.f32 %v3405_v46, %v2346_v49 }
0x1231   : > { %2472 = vmatpush.msra.mxu2 %v2387_v61  ;;  %v3273_v61 = vld [vmem:[%s4683_s10 + $0xd0] sm:$0xff] }
0x1232   : > { %2444 = vmatmul.f32.vlgmr.msrb.gmra.mxu0 %v4366_v51 }
0x1233   : > { %2473 = vmatpush.msra.mxu2 %v2384_v55 }
0x1235   : > { %2474 = vmatpush.msra.mxu2 %v2381_v0 }
0x1237   : > { %2475 = vmatpush.msra.mxu2 %v2378_v10 }
0x1239   : > { %2476 = vmatpush.msra.mxu2 %v2375_v11  ;;  %v3272_v11 = vld [vmem:[%s4683_s10 + $0xc8] sm:$0xff] }
0x123b   : > { %2477 = vmatpush.msra.mxu2 %v2372_v14 }
0x123d   : > { %2478 = vmatpush.msra.mxu2 %v2369_v21 }
0x123f   : > { %2479 = vmatpush.msra.mxu2 %v2366_v22 }
0x1241   : > { %2480 = vmatpush.msra.mxu2 %v2363_v23 }
0x1243   : > { %2481 = vmatpush.msra.mxu2 %v2360_v24 }
0x1245   : > { %2482 = vmatpush.msra.mxu2 %v2357_v25 }
0x1247   : > { %2483 = vmatpush.msra.mxu2 %v2354_v26 }
0x1248   : > { %2484 = vmatmul.f32.vlgmr.msra.gmra.mxu2 %v4356_v30 }
0x12af   : > { %v2445_v63 = vpop.f32.mrf.mxu0 }
0x12b0   : > { %v2446_v1 = vadd.f32 %v2445_v63, %v2422_v56 }
0x12b2   : > { %v2488_v3 = vmul.f32 %v3961_v58, %v2446_v1  ;;  %v2559_v4 = vmul.f32 %v3994_v40, %v2446_v1  ;;  %v2630_v5 = vmul.f32 %v4008_v9, %v2446_v1  ;;  %v2701_v6 = vmul.f32 %v3964_v59, %v2446_v1  ;;  %v3278_v1 = vld [vmem:[%s4683_s10 + $0xf8] sm:$0xff] }
0x12b4   : > { %2505 = vmatmul.f32.vlgmr.msrb.gmra.mxu3 %v2488_v3  ;;  %2576 = vmatmul.f32.vlgmr.msrb.gmra.mxu1 %v2559_v4  ;;  %v3277_v3 = vld [vmem:[%s4683_s10 + $0xf0] sm:$0xff] }
0x12b5   : > { %2775 = vmatpush.msrb.mxu3 %v3278_v1  ;;  %v3268_v1 = vld [vmem:[%s4683_s10 + $0xa8] sm:$0xff] }
0x12b7   : > { %2776 = vmatpush.msrb.mxu3 %v3277_v3  ;;  %v3266_v3 = vld [vmem:[%s4683_s10 + $0x98] sm:$0xff] }
0x12b9   : > { %2777 = vmatpush.msrb.mxu3 %v3276_v47  ;;  %v3265_v47 = vld [vmem:[%s4683_s10 + $0x90] sm:$0xff] }
0x12bc   : > { %2647 = vmatmul.f32.vlgmr.msra.gmra.mxu3 %v2630_v5  ;;  %2718 = vmatmul.f32.vlgmr.msra.gmra.mxu1 %v2701_v6  ;;  %v3275_v5 = vld [vmem:[%s4683_s10 + $0xe0] sm:$0xff] }
0x12bd   : > { %2778 = vmatpush.msrb.mxu3 %v3275_v5  ;;  %v3263_v5 = vld [vmem:[%s4683_s10 + $0x80] sm:$0xff] }
0x12bf   : > { %2779 = vmatpush.msrb.mxu3 %v3274_v8 }
0x12c1   : > { %2780 = vmatpush.msrb.mxu3 %v3273_v61 }
0x12c3   : > { %2781 = vmatpush.msrb.mxu3 %v3272_v11 }
0x12cb   : > { %v2485_v54 = vpop.f32.mrf.mxu2 }
0x12cc   : > { %v2486_v56 = vadd.f32 %v2485_v54, %v2424_v38 }
0x12ce   : > { %2552 = vmatpush.msra.mxu0 %v2486_v56  ;;  %2623 = vmatpush.msrb.mxu2 %v2486_v56 }
0x12d0   : > { %2694 = vmatpush.msrb.mxu0 %v2486_v56  ;;  %2765 = vmatpush.msra.mxu2 %v2486_v56 }
0x1331   : > { %v2577_v13 = vpop.f32.mrf.mxu1 }
0x1332   : > { %v2580_v48 = vsel %vm1437_vm2, -1e+10, %v2577_v13 }
0x1333   : > { %v2581_v15 = vsel %vm965_vm5, %v2580_v48, -inf }
0x1334   : > { %2582 = vmax.xlane.f32.xlu2 %v2581_v15 }
0x1337   : > { %v2506_v16 = vpop.f32.mrf.mxu3 }
0x1338   : > { %v2509_v18 = vsel %vm1437_vm2, -1e+10, %v2506_v16  ;;  %v3271_v16 = vld [vmem:[%s4683_s10 + $0xc0] sm:$0xff] }
0x1339   : > { %v2719_v19 = vpop.f32.mrf.mxu1  ;;  %v2510_v50 = vsel %vm965_vm5, %v2509_v18, -inf  ;;  %2782 = vmatpush.msrb.mxu3 %v3271_v16  ;;  %v2851_v16 = vld [vmem:[#allocation7 + $0xf0] sm:$0xff] }
0x133a   : > { %v2722_v57 = vsel %vm1437_vm2, -1e+10, %v2719_v19  ;;  %2511 = vmax.xlane.f32.xlu0 %v2510_v50 }
0x133b   : > { %v2723_v39 = vsel %vm965_vm5, %v2722_v57, -inf }
0x133c   : > { %2724 = vmax.xlane.f32.xlu1 %v2723_v39 }
0x133f   : > { %v2648_v20 = vpop.f32.mrf.mxu3 }
0x1340   : > { %v2651_v60 = vsel %vm1437_vm2, -1e+10, %v2648_v20 }
0x1341   : > { %v2652_v2 = vsel %vm965_vm5, %v2651_v60, -inf }
0x1342   : > { %2653 = vmax.xlane.f32.xlu2 %v2652_v2 }
0x13a7   : > { %v2583_v27 = vpop.xlane.xlu2 %2582 }
0x13a8   : > { %v2584_v17 = vsub.f32 %v2580_v48, %v2583_v27 }
0x13aa   : > { %v2585_v28 = vmul.f32 1.442695, %v2584_v17 }
0x13ac   : > { %3470 = vpow2.f32 %v2585_v28 }
0x13ad   : > { %v2512_v29 = vpop.xlane.xlu0 %2511 }
0x13ae   : > { %v2513_v31 = vsub.f32 %v2509_v18, %v2512_v29 }
0x13af   : > { %v2725_v32 = vpop.xlane.xlu1 %2724 }
0x13b0   : > { %v2514_v33 = vmul.f32 1.442695, %v2513_v31  ;;  %v2726_v34 = vsub.f32 %v2722_v57, %v2725_v32 }
0x13b2   : > { %v4393_v35 = vpop.eup %3470  ;;  %3472 = vpow2.f32 %v2514_v33  ;;  %v2727_v62 = vmul.f32 1.442695, %v2726_v34 }
0x13b3   : > { %v2587_v36 = vsel %vm965_vm5, %v4393_v35, 0.0 }
0x13b4   : > { %3474 = vpow2.f32 %v2727_v62  ;;  %2588 = vadd.xlane.f32.xlu0 %v2587_v36 }
0x13b5   : > { %v2654_v37 = vpop.xlane.xlu2 %2653 }
0x13b6   : > { %v2655_v30 = vsub.f32 %v2651_v60, %v2654_v37 }
0x13b8   : > { %v4397_v41 = vpop.eup %3472  ;;  %v2656_v43 = vmul.f32 1.442695, %v2655_v30 }
0x13b9   : > { %v2516_v44 = vsel %vm965_vm5, %v4397_v41, 0.0 }
0x13ba   : > { %v4401_v45 = vpop.eup %3474  ;;  %3476 = vpow2.f32 %v2656_v43  ;;  %2517 = vadd.xlane.f32.xlu1 %v2516_v44 }
0x13bb   : > { %v2729_v46 = vsel %vm965_vm5, %v4401_v45, 0.0 }
0x13bc   : > { %2730 = vadd.xlane.f32.xlu2 %v2729_v46 }
0x13c0   : > { %v4405_v49 = vpop.eup %3476 }
0x13c1   : > { %v2658_v52 = vsel %vm965_vm5, %v4405_v49, 0.0 }
0x13c2   : > { %2659 = vadd.xlane.f32.xlu0 %v2658_v52 }
0x1427   : > { %v2589_v63 = vpop.xlane.xlu0 %2588 }
0x1428   : > { %3478 = vrcp.f32 %v2589_v63  ;;  %v2601_v55 = vand.u32 2147483648, %v2589_v63  ;;  %v2599_v10 = vand.u32 2147483647, %v2589_v63  ;;  %vm2595_vm3 = vweird.f32 %v2589_v63 }
0x142a   : > { %v2602_v19 = vor.u32 1.1754944e-38, %v2601_v55  ;;  %vm2600_vm7 = vcmp.eq.f32.partialorder %v2599_v10, 8.507059e+37 }
0x142d   : > { %v2518_v4 = vpop.xlane.xlu1 %2517 }
0x142e   : > { %v3479_v6 = vpop.eup %3478  ;;  %3480 = vrcp.f32 %v2518_v4  ;;  %v2528_v60 = vand.u32 2147483647, %v2518_v4  ;;  %v2530_v2 = vand.u32 2147483648, %v2518_v4  ;;  %vm2524_vm9 = vweird.f32 %v2518_v4 }
0x142f   : > { %v2591_v7 = vmul.f32 %v3479_v6, %v2589_v63  ;;  %v2731_v53 = vpop.xlane.xlu2 %2730  ;;  %vm2596_vm2 = vweird.f32 %v3479_v6  ;;  %v3269_v63 = vld [vmem:[%s4683_s10 + $0xb0] sm:$0xff] }
0x1430   : > { %3482 = vrcp.f32 %v2731_v53  ;;  %vm2597_vm6 = vmor %vm2595_vm3, %vm2596_vm2  ;;  %v2743_v24 = vand.u32 2147483648, %v2731_v53  ;;  %v2741_v27 = vand.u32 2147483647, %v2731_v53  ;;  %vm2529_vm12 = vcmp.eq.f32.partialorder %v2528_v60, 8.507059e+37  ;;  %v2846_v60 = vld [vmem:[#allocation7 + $0xc8] sm:$0xff] }
0x1431   : > { %v2592_v42 = vsub.f32 1.0, %v2591_v7  ;;  %v2531_v28 = vor.u32 1.1754944e-38, %v2530_v2  ;;  %vm2737_vm13 = vweird.f32 %v2731_v53  ;;  %v2845_v2 = vld [vmem:[#allocation7 + $0xc0] sm:$0xff] }
0x1432   : > { %v2744_v34 = vor.u32 1.1754944e-38, %v2743_v24  ;;  %vm2742_vm14 = vcmp.eq.f32.partialorder %v2741_v27, 8.507059e+37  ;;  %v2841_v24 = vld [vmem:[#allocation7 + $0xa0] sm:$0xff]  ;;  %v2838_v27 = vld [vmem:[#allocation7 + $0x88] sm:$0xff] }
0x1433   : > { %v2593_v0 = vmul.f32 %v3479_v6, %v2592_v42 }
0x1434   : > { %v3481_v13 = vpop.eup %3480 }
0x1435   : > { %v2594_v48 = vadd.f32 %v3479_v6, %v2593_v0  ;;  %v2520_v14 = vmul.f32 %v3481_v13, %v2518_v4  ;;  %v2660_v15 = vpop.xlane.xlu0 %2659  ;;  %vm2525_vm8 = vweird.f32 %v3481_v13  ;;  %v3264_v4 = vld [vmem:[%s4683_s10 + $0x88] sm:$0xff] }
0x1436   : > { %v3483_v18 = vpop.eup %3482  ;;  %3484 = vrcp.f32 %v2660_v15  ;;  %vm2526_vm11 = vmor %vm2524_vm9, %vm2525_vm8  ;;  %v2672_v30 = vand.u32 2147483648, %v2660_v15  ;;  %v2670_v44 = vand.u32 2147483647, %v2660_v15  ;;  %vm2666_vm15 = vweird.f32 %v2660_v15 }
0x1437   : > { %v2598_v50 = vsel %vm2597_vm6, %v3479_v6, %v2594_v48  ;;  %v2521_v57 = vsub.f32 1.0, %v2520_v14  ;;  %v2733_v39 = vmul.f32 %v3483_v18, %v2731_v53  ;;  %vm2738_vm10 = vweird.f32 %v3483_v18  ;;  %v3406_v48 = vld [vmem:[%s4624_s11 + $0x1] ss:$0 sm:$0xff] }
0x1438   : > { %v2603_v20 = vsel %vm2600_vm7, %v2602_v19, %v2598_v50  ;;  %vm2739_vm4 = vmor %vm2737_vm13, %vm2738_vm10  ;;  %vm2671_vm2 = vcmp.eq.f32.partialorder %v2670_v44, 8.507059e+37  ;;  %v2887_v44 = vld [vmem:[#allocation8 + $0xb8] sm:$0xff] }
0x1439   : > { %v2522_v21 = vmul.f32 %v3481_v13, %v2521_v57  ;;  %v2734_v22 = vsub.f32 1.0, %v2733_v39  ;;  %v2604_v23 = vmul.f32 %v4393_v35, %v2603_v20  ;;  %v2850_v57 = vld [vmem:[#allocation7 + $0xe8] sm:$0xff]  ;;  %v2849_v39 = vld [vmem:[#allocation7 + $0xe0] sm:$0xff]  ;;  %v2847_v20 = vld [vmem:[#allocation7 + $0xd0] sm:$0xff] }
0x143b   : > { %v2523_v25 = vadd.f32 %v3481_v13, %v2522_v21  ;;  %v2735_v26 = vmul.f32 %v3483_v18, %v2734_v22  ;;  %3281 = vmatmul.msk.f32.vlgmr.msrb.gmra.mxu2 %vm965_vm5, %v2604_v23  ;;  %3284 = vst.msk [vmem:[%s4440_s26 + $0x8] sm:$0xff] %vm965_vm5, %v2604_v23  ;;  %v2844_v21 = vld [vmem:[#allocation7 + $0xb8] sm:$0xff]  ;;  %v2843_v22 = vld [vmem:[#allocation7 + $0xb0] sm:$0xff]  ;;  %v2842_v23 = vld [vmem:[#allocation7 + $0xa8] sm:$0xff] }
0x143c   : > { %v3485_v17 = vpop.eup %3484 }
0x143d   : > { %v2527_v29 = vsel %vm2526_vm11, %v3481_v13, %v2523_v25  ;;  %v2736_v31 = vadd.f32 %v3483_v18, %v2735_v26  ;;  %v2662_v32 = vmul.f32 %v3485_v17, %v2660_v15  ;;  %vm2667_vm0 = vweird.f32 %v3485_v17  ;;  %v2840_v25 = vld [vmem:[#allocation7 + $0x98] sm:$0xff]  ;;  %v2839_v26 = vld [vmem:[#allocation7 + $0x90] sm:$0xff] }
0x143e   : > { %v2532_v33 = vsel %vm2529_vm12, %v2531_v28, %v2527_v29  ;;  %vm2668_vm1 = vmor %vm2666_vm15, %vm2667_vm0  ;;  %v2895_v28 = vld [vmem:[#allocation8 + $0xf8] sm:$0xff]  ;;  %v2894_v29 = vld [vmem:[#allocation8 + $0xf0] sm:$0xff] }
0x143f   : > { %v2740_v35 = vsel %vm2739_vm4, %v3483_v18, %v2736_v31  ;;  %v2663_v62 = vsub.f32 1.0, %v2662_v32  ;;  %v2533_v36 = vmul.f32 %v4397_v41, %v2532_v33  ;;  %v2673_v41 = vor.u32 1.1754944e-38, %v2672_v30  ;;  %2901 = vmatpush.msrb.mxu1 %v2895_v28  ;;  %v2893_v31 = vld [vmem:[#allocation8 + $0xe8] sm:$0xff]  ;;  %v2888_v30 = vld [vmem:[#allocation8 + $0xc0] sm:$0xff] }
0x1440   : > { %v2745_v37 = vsel %vm2742_vm14, %v2744_v34, %v2740_v35  ;;  %v2892_v34 = vld [vmem:[#allocation8 + $0xe0] sm:$0xff] }
0x1441   : > { %v2664_v43 = vmul.f32 %v3485_v17, %v2663_v62  ;;  %3280 = vmatmul.msk.f32.vlgmr.msra.gmra.mxu0 %vm965_vm5, %v2533_v36  ;;  %v2746_v46 = vmul.f32 %v4401_v45, %v2745_v37  ;;  %2795 = vst.msk [vmem:[%s4440_s26] sm:$0xff] %vm965_vm5, %v2533_v36  ;;  %v3270_v45 = vld [vmem:[%s4683_s10 + $0xb8] sm:$0xff]  ;;  %2902 = vmatpush.msrb.mxu1 %v2894_v29  ;;  %v2890_v36 = vld [vmem:[#allocation8 + $0xd0] sm:$0xff]  ;;  %v2889_v37 = vld [vmem:[#allocation8 + $0xc8] sm:$0xff] }
0x1442   : > { %2783 = vmatpush.msrb.mxu3 %v3270_v45  ;;  %v2891_v62 = vld [vmem:[#allocation8 + $0xd8] sm:$0xff] }
0x1443   : > { %v2665_v52 = vadd.f32 %v3485_v17, %v2664_v43  ;;  %3283 = vmatmul.msk.f32.vlgmr.msra.gmra.mxu2 %vm965_vm5, %v2746_v46  ;;  %3286 = vst.msk [vmem:[%s4440_s26 + $0x18] sm:$0xff] %vm965_vm5, %v2746_v46  ;;  %2903 = vmatpush.msrb.mxu1 %v2893_v31 }
0x1444   : > { %2784 = vmatpush.msrb.mxu3 %v3269_v63  ;;  %v2883_v63 = vld [vmem:[#allocation8 + $0x98] sm:$0xff] }
0x1445   : > { %v2669_v38 = vsel %vm2668_vm1, %v3485_v17, %v2665_v52  ;;  %v2837_v17 = vld [vmem:[#allocation7 + $0x80] sm:$0xff]  ;;  %2904 = vmatpush.msrb.mxu1 %v2892_v34  ;;  %v2886_v52 = vld [vmem:[#allocation8 + $0xb0] sm:$0xff] }
0x1446   : > { %v2674_v54 = vsel %vm2671_vm2, %v2673_v41, %v2669_v38  ;;  %2785 = vmatpush.msrb.mxu3 %v3268_v1  ;;  %v2885_v38 = vld [vmem:[#allocation8 + $0xa8] sm:$0xff]  ;;  %v3411_v34 = vld [vmem:[%s4629_s16 + $0x5] ss:$0 sm:$0xff] }
0x1447   : > { %v2675_v56 = vmul.f32 %v4405_v49, %v2674_v54  ;;  %v3267_v49 = vld [vmem:[%s4683_s10 + $0xa0] sm:$0xff]  ;;  %2905 = vmatpush.msrb.mxu1 %v2891_v62 }
0x1448   : > { %2786 = vmatpush.msrb.mxu3 %v3267_v49  ;;  %v3407_v49 = vld [vmem:[%s4629_s16 + $0x4] ss:$0 sm:$0xff] }
0x1449   : > { %3282 = vmatmul.msk.f32.vlgmr.msrb.gmra.mxu0 %vm965_vm5, %v2675_v56  ;;  %3285 = vst.msk [vmem:[%s4440_s26 + $0x10] sm:$0xff] %vm965_vm5, %v2675_v56  ;;  %2906 = vmatpush.msrb.mxu1 %v2890_v36  ;;  %v2884_v56 = vld [vmem:[#allocation8 + $0xa0] sm:$0xff] }
0x144a   : > { %2787 = vmatpush.msrb.mxu3 %v3266_v3  ;;  %v3412_v36 = vld [vmem:[%s4630_s17 + $0x5] ss:$0 sm:$0xff] }
0x144b   : > { %2907 = vmatpush.msrb.mxu1 %v2889_v37 }
0x144c   : > { %2788 = vmatpush.msrb.mxu3 %v3265_v47 }
0x144d   : > { %2908 = vmatpush.msrb.mxu1 %v2888_v30 }
0x144e   : > { %2789 = vmatpush.msrb.mxu3 %v3264_v4  ;;  %v3408_v4 = vld [vmem:[%s4630_s17 + $0x4] ss:$0 sm:$0xff] }
0x144f   : > { %2909 = vmatpush.msrb.mxu1 %v2887_v44 }
0x1450   : > { %2790 = vmatpush.msrb.mxu3 %v3263_v5 }
0x1451   : > { %2910 = vmatpush.msrb.mxu1 %v2886_v52 }
0x1453   : > { %2911 = vmatpush.msrb.mxu1 %v2885_v38 }
0x1455   : > { %2912 = vmatpush.msrb.mxu1 %v2884_v56 }
0x1457   : > { %2913 = vmatpush.msrb.mxu1 %v2883_v63 }
0x14be   : > { %v2554_v6 = vpop.f32.mrf.mxu0  ;;  %v2625_v7 = vpop.f32.mrf.mxu2 }
0x14bf   : > { %v2557_v53 = vmul.f32 %v3961_v58, %v2554_v6  ;;  %v2628_v8 = vmul.f32 %v3994_v40, %v2625_v7  ;;  %v2852_v40 = vld [vmem:[#allocation7 + $0xf8] sm:$0xff]  ;;  %v2882_v7 = vld [vmem:[#allocation8 + $0x90] sm:$0xff] }
0x14c0   : > { %2858 = vmatpush.msra.mxu0 %v2852_v40  ;;  %2914 = vmatpush.msrb.mxu1 %v2882_v7 }
0x14c1   : > { %v2629_v55 = vadd.f32 %v2628_v8, %v2557_v53  ;;  %v2881_v53 = vld [vmem:[#allocation8 + $0x88] sm:$0xff]  ;;  %v2880_v8 = vld [vmem:[#allocation8 + $0x80] sm:$0xff] }
0x14c2   : > { %2859 = vmatpush.msra.mxu0 %v2851_v16  ;;  %2915 = vmatpush.msrb.mxu1 %v2881_v53 }
0x14c4   : > { %2860 = vmatpush.msra.mxu0 %v2850_v57  ;;  %2916 = vmatpush.msrb.mxu1 %v2880_v8  ;;  %v2964_v57 = vld [vmem:[%s4684_s20 + $0x48] sm:$0xff] }
0x14c6   : > { %v2696_v42 = vpop.f32.mrf.mxu0  ;;  %v2767_v61 = vpop.f32.mrf.mxu2  ;;  %2861 = vmatpush.msra.mxu0 %v2849_v39  ;;  %v2963_v39 = vld [vmem:[%s4684_s20 + $0x40] sm:$0xff] }
0x14c7   : > { %v2699_v0 = vmul.f32 %v4008_v9, %v2696_v42  ;;  %v2770_v11 = vmul.f32 %v3964_v59, %v2767_v61  ;;  %v3409_v42 = vld [vmem:[%s4626_s13 + $0x1] ss:$0 sm:$0xff] }
0x14c9   : > { %v2700_v10 = vadd.f32 %v2699_v0, %v2629_v55 }
0x14cb   : > { %v2771_v13 = vadd.f32 %v2770_v11, %v2700_v10  ;;  %v3410_v10 = vld [vmem:[%s4628_s15 + $0x1] ss:$0 sm:$0xff] }
0x14cd   : > { %2791 = vmatmul.f32.vlgmr.msrb.gmra.mxu3 %v2771_v13 }
0x1550   : > { %v2792_v14 = vpop.f32.mrf.mxu3 }
0x1551   : > { %v2793_v15 = vadd.f32 %v3406_v48, %v2792_v14  ;;  %v2970_v14 = vld [vmem:[%s4684_s20 + $0x78] sm:$0xff] }
0x1552   : > { %2975 = vmatpush.msrb.mxu2 %v2970_v14 }
0x1553   : > { %v2802_v58 = vadd.f32 %v2793_v15, %v4366_v51  ;;  %v2848_v51 = vld [vmem:[#allocation7 + $0xd8] sm:$0xff]  ;;  %v2969_v15 = vld [vmem:[%s4684_s20 + $0x70] sm:$0xff] }
0x1554   : > { %2862 = vmatpush.msra.mxu0 %v2848_v51  ;;  %2976 = vmatpush.msrb.mxu2 %v2969_v15  ;;  %v2962_v51 = vld [vmem:[%s4684_s20 + $0x38] sm:$0xff] }
0x1555   : > { %2807 = vadd.xlane.f32.xlu1 %v2802_v58 }
0x1556   : > { %2863 = vmatpush.msra.mxu0 %v2847_v20  ;;  %v2961_v20 = vld [vmem:[%s4684_s20 + $0x30] sm:$0xff] }
0x1558   : > { %2864 = vmatpush.msra.mxu0 %v2846_v60  ;;  %v2960_v60 = vld [vmem:[%s4684_s20 + $0x28] sm:$0xff] }
0x155a   : > { %2865 = vmatpush.msra.mxu0 %v2845_v2  ;;  %v2959_v2 = vld [vmem:[%s4684_s20 + $0x20] sm:$0xff] }
0x155c   : > { %2866 = vmatpush.msra.mxu0 %v2844_v21  ;;  %v2958_v21 = vld [vmem:[%s4684_s20 + $0x18] sm:$0xff] }
0x155e   : > { %2867 = vmatpush.msra.mxu0 %v2843_v22  ;;  %v2957_v22 = vld [vmem:[%s4684_s20 + $0x10] sm:$0xff] }
0x1560   : > { %2868 = vmatpush.msra.mxu0 %v2842_v23  ;;  %v2956_v23 = vld [vmem:[%s4684_s20 + $0x8] sm:$0xff] }
0x1562   : > { %2869 = vmatpush.msra.mxu0 %v2841_v24  ;;  %v2955_v24 = vld [vmem:[%s4684_s20] sm:$0xff] }
0x1564   : > { %2870 = vmatpush.msra.mxu0 %v2840_v25 }
0x1566   : > { %2871 = vmatpush.msra.mxu0 %v2839_v26 }
0x1568   : > { %2872 = vmatpush.msra.mxu0 %v2838_v27 }
0x156a   : > { %2873 = vmatpush.msra.mxu0 %v2837_v17 }
0x15c8   : > { %v2808_v18 = vpop.xlane.xlu1 %2807 }
0x15c9   : > { %v2809_v9 = vmul.f32 0.0625, %v2808_v18 }
0x15cb   : > { %v2810_v19 = vsub.f32 %v2802_v58, %v2809_v9 }
0x15cd   : > { %v4489_v59 = vmul.f32 %v4079_v12, %v2810_v19  ;;  %v2968_v19 = vld [vmem:[%s4684_s20 + $0x68] sm:$0xff] }
0x15ce   : > { %2977 = vmatpush.msrb.mxu2 %v2968_v19 }
0x15cf   : > { %v2812_v50 = vmul.f32 %v4489_v59, %v4489_v59 }
0x15d1   : > { %2813 = vadd.xlane.f32.xlu2 %v2812_v50  ;;  %v2966_v50 = vld [vmem:[%s4684_s20 + $0x58] sm:$0xff] }
0x1644   : > { %v2814_v32 = vpop.xlane.xlu2 %2813 }
0x1645   : > { %v2815_v33 = vmul.f32 0.0625, %v2814_v32 }
0x1647   : > { %v2816_v35 = vadd.f32 1e-05, %v2815_v33 }
0x1649   : > { %3486 = vrsqrt.f32 %v2816_v35  ;;  %vm2823_vm3 = vweird.f32 %v2816_v35 }
0x164f   : > { %v3487_v43 = vpop.eup %3486 }
0x1650   : > { %v2818_v46 = vmul.f32 %v3487_v43, %v2816_v35  ;;  %vm2824_vm5 = vweird.f32 %v3487_v43 }
0x1651   : > { %vm2825_vm6 = vmor %vm2823_vm3, %vm2824_vm5 }
0x1652   : > { %v2819_v41 = vmul.f32 %v3487_v43, %v2818_v46 }
0x1654   : > { %v2820_v54 = vmul.f32 0.5, %v2819_v41 }
0x1656   : > { %v2821_v45 = vsub.f32 1.5, %v2820_v54 }
0x1658   : > { %v2822_v1 = vmul.f32 %v3487_v43, %v2821_v45 }
0x165a   : > { %v2826_v3 = vsel %vm2825_vm6, %v3487_v43, %v2822_v1 }
0x165b   : > { %v2827_v47 = vmul.f32 %v2826_v3, %v4489_v59  ;;  %v2967_v59 = vld [vmem:[%s4684_s20 + $0x60] sm:$0xff] }
0x165c   : > { %2978 = vmatpush.msrb.mxu2 %v2967_v59 }
0x165d   : > { %v2831_v5 = vmul.f32 %v3407_v49, %v2827_v47 }
0x165e   : > { %2979 = vmatpush.msrb.mxu2 %v2966_v50 }
0x165f   : > { %v2835_v6 = vadd.f32 %v3408_v4, %v2831_v5 }
0x1661   : > { %2874 = vmatmul.f32.vlgmr.msra.gmra.mxu0 %v2835_v6 }
0x16de   : > { %v2875_v61 = vpop.f32.mrf.mxu0 }
0x16df   : > { %v2876_v55 = vadd.f32 %v3409_v42, %v2875_v61 }
0x16e1   : > { %v2878_v0 = vmax.f32 %v2876_v55, 0.0 }
0x16e3   : > { %2917 = vmatmul.f32.vlgmr.msrb.gmra.mxu1 %v2878_v0 }
0x1760   : > { %v2918_v11 = vpop.f32.mrf.mxu1 }
0x1761   : > { %v2919_v13 = vadd.f32 %v3410_v10, %v2918_v11 }
0x1763   : > { %v2921_v48 = vadd.f32 %v2919_v13, %v2835_v6 }
0x1765   : > { %2926 = vadd.xlane.f32.xlu0 %v2921_v48 }
0x17d8   : > { %v2927_v58 = vpop.xlane.xlu0 %2926 }
0x17d9   : > { %v2928_v40 = vmul.f32 0.0625, %v2927_v58 }
0x17db   : > { %v2929_v16 = vsub.f32 %v2921_v48, %v2928_v40 }
0x17dd   : > { %v2930_v18 = vmul.f32 %v4079_v12, %v2929_v16  ;;  %v2965_v12 = vld [vmem:[%s4684_s20 + $0x50] sm:$0xff] }
0x17de   : > { %2980 = vmatpush.msrb.mxu2 %v2965_v12 }
0x17df   : > { %v2931_v9 = vmul.f32 %v2930_v18, %v2930_v18 }
0x17e0   : > { %2981 = vmatpush.msrb.mxu2 %v2964_v57 }
0x17e1   : > { %2932 = vadd.xlane.f32.xlu1 %v2931_v9 }
0x17e2   : > { %2982 = vmatpush.msrb.mxu2 %v2963_v39 }
0x17e4   : > { %2983 = vmatpush.msrb.mxu2 %v2962_v51 }
0x17e6   : > { %2984 = vmatpush.msrb.mxu2 %v2961_v20 }
0x17e8   : > { %2985 = vmatpush.msrb.mxu2 %v2960_v60 }
0x17ea   : > { %2986 = vmatpush.msrb.mxu2 %v2959_v2 }
0x17ec   : > { %2987 = vmatpush.msrb.mxu2 %v2958_v21 }
0x17ee   : > { %2988 = vmatpush.msrb.mxu2 %v2957_v22 }
0x17f0   : > { %2989 = vmatpush.msrb.mxu2 %v2956_v23 }
0x17f2   : > { %2990 = vmatpush.msrb.mxu2 %v2955_v24 }
0x1854   : > { %v2933_v25 = vpop.xlane.xlu1 %2932 }
0x1855   : > { %v2934_v26 = vmul.f32 0.0625, %v2933_v25 }
0x1857   : > { %v2935_v27 = vadd.f32 1e-05, %v2934_v26 }
0x1859   : > { %3488 = vrsqrt.f32 %v2935_v27  ;;  %vm2942_vm8 = vweird.f32 %v2935_v27 }
0x185f   : > { %v3489_v17 = vpop.eup %3488 }
0x1860   : > { %v2937_v28 = vmul.f32 %v3489_v17, %v2935_v27  ;;  %vm2943_vm7 = vweird.f32 %v3489_v17 }
0x1861   : > { %vm2944_vm9 = vmor %vm2942_vm8, %vm2943_vm7 }
0x1862   : > { %v2938_v29 = vmul.f32 %v3489_v17, %v2937_v28 }
0x1864   : > { %v2939_v31 = vmul.f32 0.5, %v2938_v29 }
0x1866   : > { %v2940_v32 = vsub.f32 1.5, %v2939_v31 }
0x1868   : > { %v2941_v33 = vmul.f32 %v3489_v17, %v2940_v32 }
0x186a   : > { %v2945_v35 = vsel %vm2944_vm9, %v3489_v17, %v2941_v33 }
0x186b   : > { %v2946_v62 = vmul.f32 %v2945_v35, %v2930_v18 }
0x186d   : > { %v2950_v37 = vmul.f32 %v3411_v34, %v2946_v62 }
0x186f   : > { %v2954_v30 = vadd.f32 %v3412_v36, %v2950_v37 }
0x1871   : > { %2991 = vmatmul.f32.vlgmr.msrb.gmra.mxu2 %v2954_v30 }
0x1872   : > { %3638 = shalt.err (!%p3635_p8)
}
0x1873   : > { %s3728_s30 = smov 128   ;;  %s3729_s4 = smov 8  }
0x1874   : > { %3318 = dma.vmem_to_hbm [thread:$0]  (%p3878_p5), %s3029_s19, 512, %s3031_s28, %s3002_s21, %s3728_s30, %s3728_s30, %s3729_s4  }
0x1875   : > { %s3215_s22 = sshll.u32 %s4429_s2, 3  ;;  %s3295_s8 = sshll.u32 %s3861_s3, 3 }
0x1876   : > { %s4687_s7 = sld [smem:[#allocation38_spill]]  ;;  %s757_s26 = scalar_lea.vmem [#allocation10], %s3215_s22 }
0x1877   : > { %s4688_s24 = sld [smem:[#allocation37_spill]]  ;;  %s3014_s9 = sshll.u32 %s757_s26, 4  ;;  %s3015_s9 = int_to_ptr.vmem [resolvable:$true] %s3014_s9 }
0x1878   : > { %s2997_s19 = scalar_lea.sflag [#allocation4], %s4429_s2 }
0x187c   : > { %s3012_s6 = scalar_lea.hbm %s4687_s7, %s3295_s8  ;;  %s3659_s4 = scalar_lea.hbm %s4687_s7, 48 }
0x187d   : > { %v3413_v43 = vld [vmem:[%s4688_s24] ss:$0 sm:$0xff]  ;;  %s3016_s10 = sshll.u32 %s3012_s6, 4  ;;  %s3017_s10 = int_to_ptr.hbm [resolvable:$true] %s3016_s10 }
0x187e   : > { %s3653_s28 = sshra.s32 %s3017_s10, 4  ;;  %s3654_s28 = int_to_ptr.hbm [resolvable:$true] %s3653_s28 }
0x187f   : > { %s3655_s3 = scalar_lea.hbm %s3654_s28, 8  ;;  %p3660_p12 = scmp.lt.s32.totalorder %s3654_s28, %s4687_s7 }
0x1880   : > { %p3656_p9 = scmp.ne.s32.totalorder %s3654_s28, %s3655_s3  ;;  %p3661_p13 = scmp.lt.s32.totalorder %s3659_s4, %s3655_s3 }
0x1882   : > { %p3657_p10 = pnand %p3656_p9, %p3878_p5  ;;  %p3662_p0 = por %p3661_p13, %p3660_p12 }
0x1884   : > { %p3658_p11 = pneg %p3657_p10 }
0x1886   : > { %p3663_p1 = pnand %p3662_p0, %p3658_p11 }
0x18f4   : > { %v2992_v44 = vpop.f32.mrf.mxu2 }
0x18f5   : > { %v2993_v46 = vadd.f32 %v3413_v43, %v2992_v44 }
0x18f7   : > { %2995 = vst [vmem:[%s757_s26] sm:$0xff] %v2993_v46 }
0x18f8   : > { %3666 = shalt.err (!%p3663_p1)
}
0x18f9   : > { %3317 = dma.vmem_to_hbm [thread:$0]  (%p3878_p5), %s3015_s9, 128, %s3017_s10, %s2997_s19  }
0x18fa PF: > { %s4689_s2 = sld [smem:[#allocation20_spill]] }
0x18fb   : > { %s4690_s5 = sld [smem:[#allocation18_spill]] }
0x1900   : > { %p3349_p2 = scmp.ge.s32.totalorder %s4689_s2, 2 }
0x1901   : > { %s3045_s6 = sand.u32 1, %s4690_s5  }
0x1902   : > { %p3335_p3 = pnand %p3349_p2, %p3882_p6  ;;  %s3046_s27 = scalar_lea.sflag [#allocation4], %s3045_s6 }
0x1904   : > { %p3336_p4 = pneg %p3335_p3 }
0x1906   : > { %3696 = dma.done.wait (%p3336_p4), %s3046_s27, 128  }
0x1907   : > { %3698 = vsyncadd (%p3336_p4), %s3046_s27, 4294967168  ;;  %s3056_s29 = scalar_lea.sflag [#allocation12], %s3045_s6 }
0x1908   : > { %3700 = dma.done.wait (%p3336_p4), %s3056_s29, 512  }
0x1909   : > { %3702 = vsyncadd (%p3336_p4), %s3056_s29, 4294966784  ;;  %s4692_s27 = sld [smem:[#allocation21_spill]]  ;;  %s4695_s2 = smov %s3709_s25 }
0x190a   : > { %s4693_s24 = sld [smem:[#allocation19_spill]] }
0x190b   : > { %s4694_s26 = sld [smem:[#allocation22_spill]] }
0x190f   : > { %p38_p5 = scmp.ge.s32.totalorder %s4692_s27, 8  }
0x1910   : > { %s4696_s25 = smov %s4693_s24 }
0x1911   :  { %40 = sbr.rel (!%p38_p5) target bundleno = 24 (0x18), region = 203 }
0x1916   :  { %3062 = vsyncpa [#allocation3], 1 }
0x1917   :  { %3064 = vsyncpa [#allocation3 + $0x1], 1 }
0x1918   :  { %3065 = vsyncpa [#allocation6], 1 }
0x1919   :  { %3066 = vsyncpa [#allocation9], 1 }
0x191a   :  { %3067 = vsyncpa [#allocation4], 1 }
0x191b   :  { %3069 = vsyncpa [#allocation4 + $0x1], 1 }
0x191c   :  { %3070 = vsyncpa [#allocation12], 1 }
0x191d   :  { %3072 = vsyncpa [#allocation12 + $0x1], 1 }

</bundles_post_ra>
